<compile_context>
chip_gen: v7x
topology: tpu7x:2x2x1
jax: 0.10.0
libtpu: 0.0.40
codegen_flags: <defaults>
</compile_context>

<pallas_src>
import functools

import jax
import jax.numpy as jnp
from jax import lax
from jax.experimental import pallas as pl
from jax.experimental.pallas import tpu as pltpu


def _resblock_kernel(x_ref, w1_ref, b1_ref, w2_ref, b2_ref, o_ref, *,
                     res_scale, K, H, W, C):
    # x_ref : (1, H, W, C)   f32 input (also the residual branch)
    # w*_ref: (K*K*C, C)     bf16 conv weights (HWIO flattened)
    # b*_ref: (1, C)         f32 biases
    # o_ref : (1, H, W*C)    f32 lane-dense output
    p = K // 2
    x = x_ref[0]                                             # (H, W, C) f32

    def conv(a, w_ref, b_ref):
        # a: (H, W, C) bf16. Zero 'same' padding built as a value
        # (concatenate); avoids a padded HBM roundtrip, a padded VMEM scratch
        # and per-grid-step re-zeroing.
        zr = jnp.zeros((p, W, C), jnp.bfloat16)
        ap = jnp.concatenate([zr, a, zr], axis=0)            # (H+2p, W, C)
        zc = jnp.zeros((H + 2 * p, p, C), jnp.bfloat16)
        ap = jnp.concatenate([zc, ap, zc], axis=1)           # (H+2p, W+2p, C)
        # im2col: column order (kh, kw, cin) matches w.reshape(K*K*C, Cout).
        cols = [ap[kh:kh + H, kw:kw + W, :]
                for kh in range(K) for kw in range(K)]
        patches = jnp.concatenate(cols, axis=-1)             # (H, W, K*K*C) bf16
        patches = patches.reshape(H * W, K * K * C)
        y = jnp.dot(patches, w_ref[...],
                    preferred_element_type=jnp.float32)      # (H*W, C) f32
        return y + b_ref[...]

    # conv1 + ReLU (f32 accumulate, ReLU on f32)
    y1 = jnp.maximum(conv(x.astype(jnp.bfloat16), w1_ref, b1_ref), 0.0)
    # conv2
    y2 = conv(y1.astype(jnp.bfloat16).reshape(H, W, C), w2_ref, b2_ref)

    out = y2.reshape(H, W, C) * res_scale + x                # scaled residual
    o_ref[0] = out.reshape(H, W * C).astype(o_ref.dtype)


def resblock_forward(x_nchw, w1, b1, w2, b2, *, res_scale=0.1):
    """x_nchw: (N, C, H, W); w*: (K, K, C, C) HWIO; b*: (C,)."""
    N, C, H, W = x_nchw.shape
    K = w1.shape[0]

    x = jnp.transpose(x_nchw, (0, 2, 3, 1))                  # NHWC
    w1m = w1.reshape(K * K * C, C).astype(jnp.bfloat16)      # (kh,kw,cin) major
    w2m = w2.reshape(K * K * C, C).astype(jnp.bfloat16)
    b1r = b1.reshape(1, C).astype(jnp.float32)
    b2r = b2.reshape(1, C).astype(jnp.float32)

    kernel = functools.partial(_resblock_kernel, res_scale=res_scale,
                               K=K, H=H, W=W, C=C)

    out = pl.pallas_call(
        kernel,
        out_shape=jax.ShapeDtypeStruct((N, H, W * C), x.dtype),
        grid_spec=pltpu.PrefetchScalarGridSpec(
            num_scalar_prefetch=0,
            grid=(N,),
            in_specs=[
                pl.BlockSpec((1, H, W, C), lambda n: (n, 0, 0, 0)),
                pl.BlockSpec((K * K * C, C), lambda n: (0, 0)),
                pl.BlockSpec((1, C), lambda n: (0, 0)),
                pl.BlockSpec((K * K * C, C), lambda n: (0, 0)),
                pl.BlockSpec((1, C), lambda n: (0, 0)),
            ],
            out_specs=pl.BlockSpec((1, H, W * C), lambda n: (n, 0, 0)),
        ),
        compiler_params=pltpu.CompilerParams(
            dimension_semantics=("parallel",)),
    )(x, w1m, b1r, w2m, b2r)

    out = out.reshape(N, H, W, C)
    return jnp.transpose(out, (0, 3, 1, 2))                  # back to NCHW


def _reference(x_nchw, w1, b1, w2, b2, res_scale):
    """Pure-JAX f32 reference (NHWC conv) for verification."""
    x = jnp.transpose(x_nchw, (0, 2, 3, 1))
    dn = ('NHWC', 'HWIO', 'NHWC')
    y = lax.conv_general_dilated(x, w1, (1, 1), 'SAME', dimension_numbers=dn) + b1
    y = jnp.maximum(y, 0.0)
    y = lax.conv_general_dilated(y, w2, (1, 1), 'SAME', dimension_numbers=dn) + b2
    out = y * res_scale + x
    return jnp.transpose(out, (0, 3, 1, 2))


if __name__ == "__main__":
    # Small shapes consistent with ResBlock(conv, n_feats=32, kernel_size=3).
    N, C, H, W = 2, 32, 16, 16
    K = 3
    res_scale = 0.1

    key = jax.random.PRNGKey(0)
    kx, kw1, kb1, kw2, kb2 = jax.random.split(key, 5)

    x = jax.random.normal(kx, (N, C, H, W), jnp.float32)
    fan_in = C * K * K
    w1 = jax.random.normal(kw1, (K, K, C, C), jnp.float32) / jnp.sqrt(fan_in)
    b1 = jax.random.normal(kb1, (C,), jnp.float32) * 0.01
    w2 = jax.random.normal(kw2, (K, K, C, C), jnp.float32) / jnp.sqrt(fan_in)
    b2 = jax.random.normal(kb2, (C,), jnp.float32) * 0.01

    out = resblock_forward(x, w1, b1, w2, b2, res_scale=res_scale)
    out = jax.block_until_ready(out)

    ref = _reference(x, w1, b1, w2, b2, res_scale)
    assert out.shape == (N, C, H, W)
    # bf16 MXU staging (f32 accumulation); residual branch is scaled by 0.1,
    # so observed error is ~1e-3 — 1e-2 tolerance leaves ample margin.
    assert jnp.allclose(out, ref, atol=1e-2, rtol=1e-2), "mismatch vs reference"

    print("KERNEL_OK")
</pallas_src>

<mosaic_0001>
module attributes {stable_mosaic.version = 11 : i64} {
  func.func @_resblock_kernel(%arg0: i32, %arg1: memref<1x16x16x32xf32, #tpu.memory_space<vmem>>, %arg2: memref<288x32xbf16, #tpu.memory_space<vmem>>, %arg3: memref<1x32xf32, #tpu.memory_space<vmem>>, %arg4: memref<288x32xbf16, #tpu.memory_space<vmem>>, %arg5: memref<1x32xf32, #tpu.memory_space<vmem>>, %arg6: memref<1x16x512xf32, #tpu.memory_space<vmem>>) attributes {dimension_semantics = [#tpu.dimension_semantics<parallel>], iteration_bounds = array<i64: 2>, scalar_prefetch = 0 : i64, scratch_operands = 0 : i64, tpu.core_type = #tpu.core_type<tc>, window_params = [{transform_indices = @transform_0, window_bounds = array<i64: 1, 16, 16, 32>}, {pipeline_mode = #tpu.pipeline_mode<synchronous>, transform_indices = @transform_1, window_bounds = array<i64: 288, 32>}, {pipeline_mode = #tpu.pipeline_mode<synchronous>, transform_indices = @transform_2, window_bounds = array<i64: 1, 32>}, {pipeline_mode = #tpu.pipeline_mode<synchronous>, transform_indices = @transform_3, window_bounds = array<i64: 288, 32>}, {pipeline_mode = #tpu.pipeline_mode<synchronous>, transform_indices = @transform_4, window_bounds = array<i64: 1, 32>}, {transform_indices = @transform_5, window_bounds = array<i64: 1, 16, 512>}]} {
    %c0 = arith.constant 0 : index
    %c0_0 = arith.constant 0 : index
    %c0_1 = arith.constant 0 : index
    %c0_2 = arith.constant 0 : index
    %0 = vector.load %arg1[%c0, %c0_0, %c0_1, %c0_2] : memref<1x16x16x32xf32, #tpu.memory_space<vmem>>, vector<1x16x16x32xf32>
    %1 = vector.shape_cast %0 : vector<1x16x16x32xf32> to vector<16x16x32xf32>
    %2 = arith.truncf %1 : vector<16x16x32xf32> to vector<16x16x32xbf16>
    %cst = arith.constant 0.000000e+00 : bf16
    %3 = vector.broadcast %cst : bf16 to vector<1x16x32xbf16>
    %4 = tpu.concatenate %3, %2, %3 in 0 : vector<1x16x32xbf16>, vector<16x16x32xbf16>, vector<1x16x32xbf16> -> vector<18x16x32xbf16>
    %cst_3 = arith.constant 0.000000e+00 : bf16
    %5 = vector.broadcast %cst_3 : bf16 to vector<18x1x32xbf16>
    %6 = tpu.concatenate %5, %4, %5 in 1 : vector<18x1x32xbf16>, vector<18x16x32xbf16>, vector<18x1x32xbf16> -> vector<18x18x32xbf16>
    %7 = vector.extract_strided_slice %6 {offsets = [0, 0, 0], sizes = [16, 16, 32], strides = [1, 1, 1]} : vector<18x18x32xbf16> to vector<16x16x32xbf16>
    %8 = vector.extract_strided_slice %6 {offsets = [0, 1, 0], sizes = [16, 16, 32], strides = [1, 1, 1]} : vector<18x18x32xbf16> to vector<16x16x32xbf16>
    %9 = vector.extract_strided_slice %6 {offsets = [0, 2, 0], sizes = [16, 16, 32], strides = [1, 1, 1]} : vector<18x18x32xbf16> to vector<16x16x32xbf16>
    %10 = vector.extract_strided_slice %6 {offsets = [1, 0, 0], sizes = [16, 16, 32], strides = [1, 1, 1]} : vector<18x18x32xbf16> to vector<16x16x32xbf16>
    %11 = vector.extract_strided_slice %6 {offsets = [1, 1, 0], sizes = [16, 16, 32], strides = [1, 1, 1]} : vector<18x18x32xbf16> to vector<16x16x32xbf16>
    %12 = vector.extract_strided_slice %6 {offsets = [1, 2, 0], sizes = [16, 16, 32], strides = [1, 1, 1]} : vector<18x18x32xbf16> to vector<16x16x32xbf16>
    %13 = vector.extract_strided_slice %6 {offsets = [2, 0, 0], sizes = [16, 16, 32], strides = [1, 1, 1]} : vector<18x18x32xbf16> to vector<16x16x32xbf16>
    %14 = vector.extract_strided_slice %6 {offsets = [2, 1, 0], sizes = [16, 16, 32], strides = [1, 1, 1]} : vector<18x18x32xbf16> to vector<16x16x32xbf16>
    %15 = vector.extract_strided_slice %6 {offsets = [2, 2, 0], sizes = [16, 16, 32], strides = [1, 1, 1]} : vector<18x18x32xbf16> to vector<16x16x32xbf16>
    %16 = tpu.concatenate %7, %8, %9, %10, %11, %12, %13, %14, %15 in 2 : vector<16x16x32xbf16>, vector<16x16x32xbf16>, vector<16x16x32xbf16>, vector<16x16x32xbf16>, vector<16x16x32xbf16>, vector<16x16x32xbf16>, vector<16x16x32xbf16>, vector<16x16x32xbf16>, vector<16x16x32xbf16> -> vector<16x16x288xbf16>
    %17 = vector.shape_cast %16 : vector<16x16x288xbf16> to vector<256x288xbf16>
    %c0_4 = arith.constant 0 : index
    %c0_5 = arith.constant 0 : index
    %18 = vector.load %arg2[%c0_4, %c0_5] : memref<288x32xbf16, #tpu.memory_space<vmem>>, vector<288x32xbf16>
    %cst_6 = arith.constant dense<0.000000e+00> : vector<256x32xf32>
    %19 = tpu.matmul %17, %18, %cst_6 {dimension_numbers = #tpu.dot_dimension_numbers<[1], [0], [0], [1], [0, 0, 1, 1], [], []>} : vector<256x288xbf16>, vector<288x32xbf16>, vector<256x32xf32> -> vector<256x32xf32>
    %c0_7 = arith.constant 0 : index
    %c0_8 = arith.constant 0 : index
    %20 = vector.load %arg3[%c0_7, %c0_8] : memref<1x32xf32, #tpu.memory_space<vmem>>, vector<1x32xf32>
    %21 = vector.broadcast %20 : vector<1x32xf32> to vector<256x32xf32>
    %22 = arith.addf %19, %21 : vector<256x32xf32>
    %cst_9 = arith.constant 0.000000e+00 : f32
    %23 = vector.broadcast %cst_9 : f32 to vector<256x32xf32>
    %24 = arith.maximumf %22, %23 : vector<256x32xf32>
    %25 = arith.truncf %24 : vector<256x32xf32> to vector<256x32xbf16>
    %26 = vector.shape_cast %25 : vector<256x32xbf16> to vector<16x16x32xbf16>
    %cst_10 = arith.constant 0.000000e+00 : bf16
    %27 = vector.broadcast %cst_10 : bf16 to vector<1x16x32xbf16>
    %28 = tpu.concatenate %27, %26, %27 in 0 : vector<1x16x32xbf16>, vector<16x16x32xbf16>, vector<1x16x32xbf16> -> vector<18x16x32xbf16>
    %cst_11 = arith.constant 0.000000e+00 : bf16
    %29 = vector.broadcast %cst_11 : bf16 to vector<18x1x32xbf16>
    %30 = tpu.concatenate %29, %28, %29 in 1 : vector<18x1x32xbf16>, vector<18x16x32xbf16>, vector<18x1x32xbf16> -> vector<18x18x32xbf16>
    %31 = vector.extract_strided_slice %30 {offsets = [0, 0, 0], sizes = [16, 16, 32], strides = [1, 1, 1]} : vector<18x18x32xbf16> to vector<16x16x32xbf16>
    %32 = vector.extract_strided_slice %30 {offsets = [0, 1, 0], sizes = [16, 16, 32], strides = [1, 1, 1]} : vector<18x18x32xbf16> to vector<16x16x32xbf16>
    %33 = vector.extract_strided_slice %30 {offsets = [0, 2, 0], sizes = [16, 16, 32], strides = [1, 1, 1]} : vector<18x18x32xbf16> to vector<16x16x32xbf16>
    %34 = vector.extract_strided_slice %30 {offsets = [1, 0, 0], sizes = [16, 16, 32], strides = [1, 1, 1]} : vector<18x18x32xbf16> to vector<16x16x32xbf16>
    %35 = vector.extract_strided_slice %30 {offsets = [1, 1, 0], sizes = [16, 16, 32], strides = [1, 1, 1]} : vector<18x18x32xbf16> to vector<16x16x32xbf16>
    %36 = vector.extract_strided_slice %30 {offsets = [1, 2, 0], sizes = [16, 16, 32], strides = [1, 1, 1]} : vector<18x18x32xbf16> to vector<16x16x32xbf16>
    %37 = vector.extract_strided_slice %30 {offsets = [2, 0, 0], sizes = [16, 16, 32], strides = [1, 1, 1]} : vector<18x18x32xbf16> to vector<16x16x32xbf16>
    %38 = vector.extract_strided_slice %30 {offsets = [2, 1, 0], sizes = [16, 16, 32], strides = [1, 1, 1]} : vector<18x18x32xbf16> to vector<16x16x32xbf16>
    %39 = vector.extract_strided_slice %30 {offsets = [2, 2, 0], sizes = [16, 16, 32], strides = [1, 1, 1]} : vector<18x18x32xbf16> to vector<16x16x32xbf16>
    %40 = tpu.concatenate %31, %32, %33, %34, %35, %36, %37, %38, %39 in 2 : vector<16x16x32xbf16>, vector<16x16x32xbf16>, vector<16x16x32xbf16>, vector<16x16x32xbf16>, vector<16x16x32xbf16>, vector<16x16x32xbf16>, vector<16x16x32xbf16>, vector<16x16x32xbf16>, vector<16x16x32xbf16> -> vector<16x16x288xbf16>
    %41 = vector.shape_cast %40 : vector<16x16x288xbf16> to vector<256x288xbf16>
    %c0_12 = arith.constant 0 : index
    %c0_13 = arith.constant 0 : index
    %42 = vector.load %arg4[%c0_12, %c0_13] : memref<288x32xbf16, #tpu.memory_space<vmem>>, vector<288x32xbf16>
    %cst_14 = arith.constant dense<0.000000e+00> : vector<256x32xf32>
    %43 = tpu.matmul %41, %42, %cst_14 {dimension_numbers = #tpu.dot_dimension_numbers<[1], [0], [0], [1], [0, 0, 1, 1], [], []>} : vector<256x288xbf16>, vector<288x32xbf16>, vector<256x32xf32> -> vector<256x32xf32>
    %c0_15 = arith.constant 0 : index
    %c0_16 = arith.constant 0 : index
    %44 = vector.load %arg5[%c0_15, %c0_16] : memref<1x32xf32, #tpu.memory_space<vmem>>, vector<1x32xf32>
    %45 = vector.broadcast %44 : vector<1x32xf32> to vector<256x32xf32>
    %46 = arith.addf %43, %45 : vector<256x32xf32>
    %47 = vector.shape_cast %46 : vector<256x32xf32> to vector<16x16x32xf32>
    %cst_17 = arith.constant 1.000000e-01 : f32
    %48 = vector.broadcast %cst_17 : f32 to vector<16x16x32xf32>
    %49 = arith.mulf %47, %48 : vector<16x16x32xf32>
    %50 = arith.addf %49, %1 : vector<16x16x32xf32>
    %51 = vector.shape_cast %50 : vector<16x16x32xf32> to vector<16x512xf32>
    %c0_18 = arith.constant 0 : index
    %c0_19 = arith.constant 0 : index
    %c0_20 = arith.constant 0 : index
    %52 = vector.load %arg6[%c0_18, %c0_19, %c0_20] : memref<1x16x512xf32, #tpu.memory_space<vmem>>, vector<1x16x512xf32>
    %53 = vector.shape_cast %52 : vector<1x16x512xf32> to vector<16x512xf32>
    %54 = vector.shape_cast %51 : vector<16x512xf32> to vector<1x16x512xf32>
    tpu.vector_store %arg6[%c0_18, %c0_19, %c0_20], %54 {strides = array<i32>} : memref<1x16x512xf32, #tpu.memory_space<vmem>>, vector<1x16x512xf32>,
    return
  }
  func.func @transform_0(%arg0: i32) -> (i32, i32, i32, i32) {
    %c0_i32 = arith.constant 0 : i32
    %c0_i32_0 = arith.constant 0 : i32
    %c0_i32_1 = arith.constant 0 : i32
    %c0_i32_2 = arith.constant 0 : i32
    return %arg0, %c0_i32, %c0_i32_0, %c0_i32_1 : i32, i32, i32, i32
  }
  func.func @transform_1(%arg0: i32) -> (i32, i32) {
    %c0_i32 = arith.constant 0 : i32
    %c0_i32_0 = arith.constant 0 : i32
    %c0_i32_1 = arith.constant 0 : i32
    return %c0_i32, %c0_i32_0 : i32, i32
  }
  func.func @transform_2(%arg0: i32) -> (i32, i32) {
    %c0_i32 = arith.constant 0 : i32
    %c0_i32_0 = arith.constant 0 : i32
    %c0_i32_1 = arith.constant 0 : i32
    return %c0_i32, %c0_i32_0 : i32, i32
  }
  func.func @transform_3(%arg0: i32) -> (i32, i32) {
    %c0_i32 = arith.constant 0 : i32
    %c0_i32_0 = arith.constant 0 : i32
    %c0_i32_1 = arith.constant 0 : i32
    return %c0_i32, %c0_i32_0 : i32, i32
  }
  func.func @transform_4(%arg0: i32) -> (i32, i32) {
    %c0_i32 = arith.constant 0 : i32
    %c0_i32_0 = arith.constant 0 : i32
    %c0_i32_1 = arith.constant 0 : i32
    return %c0_i32, %c0_i32_0 : i32, i32
  }
  func.func @transform_5(%arg0: i32) -> (i32, i32, i32) {
    %c0_i32 = arith.constant 0 : i32
    %c0_i32_0 = arith.constant 0 : i32
    %c0_i32_1 = arith.constant 0 : i32
    return %arg0, %c0_i32, %c0_i32_0 : i32, i32, i32
  }
}

</mosaic_0001>

<bundles_post_ra>
// kernel: tpu_custom_call.1
= control target key start
LH: loop header
LB: loop body
LE: loop exit
PB: predicated region body
PF: predicated region fallthrough
CT: control target
= control target key end

     0   :  { %10 = vsyncpa [#allocation3], 0  ;;  %s6827_s0 = inlined_call_operand.hbm [shape: f32[2,16,16,32], index: 0, kind: input, shape index: {}]   ;;  %s6828_s1 = inlined_call_operand.vmem [shape: bf16[288,32], index: 1, kind: input, shape index: {}]   ;;  %s6829_s2 = inlined_call_operand.vmem [shape: f32[1,32], index: 2, kind: input, shape index: {}]   ;;  %s6830_s3 = inlined_call_operand.vmem [shape: bf16[288,32], index: 3, kind: input, shape index: {}]   ;;  %s6831_s4 = inlined_call_operand.vmem [shape: f32[1,32], index: 4, kind: input, shape index: {}]   ;;  %s6832_s5 = inlined_call_operand.hbm [shape: f32[2,16,512], index: 5, kind: output, shape index: {}]  }
   0x1   :  { %12 = vsyncpa [#allocation3 + $0x1], 0 }
   0x2   :  { %13 = vsyncpa [#allocation4], 0 }
   0x3   :  { %15 = vsyncpa [#allocation4 + $0x1], 0  ;;  %s4671_s18 = smov 0   ;;  %s4673_s19 = smov 0  }
   0x4   :  { %s4675_s20 = smov 0   ;;  %s4677_s21 = smov 0  }
   0x5 LB: > { %s4692_s22 = sadd.s32 4294967295, %s4628_s21   ;;  %s3984_s23 = sadd.s32 4294967294, %s4628_s21   ;;  %s4628_s21 = sphi %s4677_s21, %s6847_s21   ;;  %s4624_s20 = sphi %s4675_s20, %s6846_s20   ;;  %s4620_s19 = sphi %s4673_s19, %s6845_s19   ;;  %s4616_s18 = sphi %s4671_s18, %s6844_s18  }
   0x6   : > { %s4696_s24 = sadd.s32 1, %s4628_s21   ;;  %s28_s25 = sadd.s32 1, %s4624_s20 }
   0x7   : > { %s25_s26 = ssub.s32 %s4628_s21, %s4696_s24  ;;  %p35_p0 = scmp.ne.s32.totalorder %s4624_s20, %s4620_s19 }
   0x8   : > { %p26_p1 = scmp.eq.s32.totalorder %s25_s26, 0  ;;  %p36_p2 = scmp.eq.s32.totalorder %s4628_s21, 0 }
   0x9   : > { %p41_p3 = scmp.ne.s32.totalorder %s4620_s19, %s4616_s18  ;;  %p42_p4 = scmp.eq.s32.totalorder %s4692_s22, 0 }
   0xa   : > { %s4708_s27 = scalar_select %p26_p1, %s4624_s20, %s28_s25  }
   0xb   : > { %p4710_p5 = por %p36_p2, %p35_p0  ;;  %p4714_p6 = por %p42_p4, %p41_p3 }
   0xc   : > { %p149_p7 = scmp.eq.s32.totalorder %s4692_s22, 1  ;;  %p155_p8 = scmp.eq.s32.totalorder %s3984_s23, 1 }
   0xd   : > { %p4418_p10 = scmp.lt.s32.totalorder %s4628_s21, 2  ;;  %s187_s7 = sand.u32 1, %s4624_s20  }
   0xe   : > { %p4721_p11 = por %p149_p7, %p35_p0  ;;  %p4725_p12 = por %p155_p8, %p41_p3 }
   0xf   : > { %s4068_s8 = sshll.u32 %s4628_s21, 12  ;;  %s3987_s9 = sshll.u32 %s187_s7, 8 }
  0x10   : > { %s6836_s30 = scalar_select %p4721_p11, 1, 0 }
  0x11   : > { %s6837_s6 = scalar_select %p4725_p12, 1, 0 }
  0x12   : > { %s4734_s12 = scalar_lea.hbm %s6827_s0, %s4068_s8  ;;  %s191_s13 = scalar_lea.vmem [#allocation2], %s3987_s9 }
  0x13   : > { %s198_s14 = sshll.u32 %s191_s13, 4  ;;  %p4738_p13 = pnand %p4418_p10, %p4710_p5  ;;  %s4742_s14 = int_to_ptr.vmem [resolvable:$true] %s198_s14 }
  0x14   : > { %s4744_s16 = scalar_lea.sflag [#allocation3], %s187_s7  ;;  %s4532_s17 = scalar_lea.hbm %s4734_s12, 4096 }
  0x15   : > { %p4533_p0 = scmp.ne.s32.totalorder %s4734_s12, %s4532_s17  ;;  %p4534_p1 = pneg %p4738_p13 }
  0x16   : > { %s4537_s26 = scalar_lea.hbm %s6827_s0, 8192  ;;  %p4538_p4 = scmp.lt.u32.totalorder %s4734_s12, %s6827_s0 }
  0x17   : > { %p4535_p2 = pnand %p4534_p1, %p4533_p0  ;;  %p4539_p5 = scmp.lt.u32.totalorder %s4537_s26, %s4532_s17 }
  0x18   : > { %p4541_p8 = scmp.lt.u32.totalorder %s4532_s17, %s4734_s12 }
  0x19   : > { %p4536_p3 = pneg %p4535_p2  ;;  %p4540_p7 = por %p4539_p5, %p4538_p4 }
  0x1b   : > { %p4542_p10 = por %p4541_p8, %p4540_p7 }
  0x1d   : > { %p4543_p9 = pnand %p4542_p10, %p4536_p3 }
  0x1f   : > { %4546 = shalt.err (!%p4543_p9)
}
  0x20   : > { %s4547_s7 = scalar_lea.vmem %s4742_s14, 4096  ;;  %s4630_s9 = smov [#allocation2]  }
  0x21   : > { %p4548_p0 = scmp.ne.s32.totalorder %s4742_s14, %s4547_s7  ;;  %s4552_s10 = sshll.u32 %s4630_s9, 4  ;;  %s4553_s10 = int_to_ptr.vmem [resolvable:$false] %s4552_s10 }
  0x22   : > { %s4554_s11 = scalar_lea.vmem %s4553_s10, 8192  ;;  %p4555_p11 = scmp.lt.s32.totalorder %s4742_s14, %s4553_s10 }
  0x23   : > { %p4550_p2 = pnand %p4548_p0, %p4534_p1  ;;  %p4556_p4 = scmp.lt.s32.totalorder %s4554_s11, %s4547_s7 }
  0x25   : > { %p4551_p12 = pneg %p4550_p2  ;;  %p4557_p5 = por %p4556_p4, %p4555_p11 }
  0x27   : > { %p4558_p7 = pnand %p4557_p5, %p4551_p12 }
  0x29   : > { %4561 = shalt.err (!%p4558_p7)
}
  0x2a   : > { %s4631_s13 = smov 128   ;;  %s4632_s17 = smov 8  }
  0x2b   : > { %4413 = dma.hbm_to_vmem [thread:$0]  (!%p4738_p13), %s4734_s12, 4096, %s4742_s14, %s4744_s16, %s4631_s13, %s4631_s13, %s4632_s17  }
  0x2c   : > { %p3990_p9 = scmp.ge.s32.totalorder %s4628_s21, 1  ;;  %p206_p1 = scmp.lt.s32.totalorder %s4628_s21, 3 }
  0x2e   : > { %p207_p3 = pnand %p3990_p9, %p206_p1 }
  0x2f   : > { %s4775_s23 = sand.u32 (!%p207_p3), 1, %s4620_s19  }
  0x30   : > { %210 = sbr.rel (%p207_p3) target bundleno = 1152 (0x480), region = 40  ;;  %s3991_s25 = sshll.u32 (!%p207_p3), %s4775_s23, 8 }
  0x31   : > { %s213_s26 = scalar_lea.sflag (!%p207_p3), [#allocation3], %s4775_s23  ;;  %s4779_s28 = scalar_lea.vmem (!%p207_p3), [#allocation2], %s3991_s25 }
  0x37   : > { %4607 = dma.done.wait (%p4714_p6), %s213_s26, 4096  }
  0x38   : > { %4609 = vsyncadd (%p4714_p6), %s213_s26, 4294963200  ;;  %vm445_vm0 = vcmask 1040384   ;;  %vm446_vm1 = vsmask.f32 256  ;;  %v4633_v0 = vmov 0   ;;  %vm739_vm3 = vcmask 1046528  }
  0x39   : > { %v295_v1 = vrot.slane %v4633_v0, 7  ;;  %vm4785_vm2 = vmand %vm445_vm0, %vm446_vm1  ;;  %s4634_s29 = smov 64   ;;  %vm482_vm4 = vsmask.f32 7424  ;;  %v248_v13 = vld [vmem:[%s4779_s28 + $0x20] sm:$0xff]  ;;  %v249_v14 = vld [vmem:[%s4779_s28 + $0x28] sm:$0xff] }
  0x3a   : > { %v246_v15 = vld [vmem:[%s4779_s28 + $0x10] sm:$0xff]  ;;  %v278_v17 = vpack.c.bf16 %v249_v14, %v248_v13  ;;  %v247_v18 = vld [vmem:[%s4779_s28 + $0x18] sm:$0xff]  ;;  %v244_v19 = vld [vmem:[%s4779_s28] sm:$0xff]  ;;  %s4635_s12 = smov 32   ;;  %vm965_vm5 = vcmask 261120   ;;  %s4636_s13 = smov 96  }
  0x3b   : > { %v4791_v3 = vsel %vm4785_vm2, 0, %v295_v1  ;;  %v465_v4 = vsel %vm4785_vm2, %v295_v1, 0  ;;  %v245_v20 = vld [vmem:[%s4779_s28 + $0x8] sm:$0xff]  ;;  %v277_v21 = vpack.c.bf16 %v247_v18, %v246_v15  ;;  %v250_v23 = vld [vmem:[%s4779_s28 + $0x30] sm:$0xff]  ;;  %v251_v24 = vld [vmem:[%s4779_s28 + $0x38] sm:$0xff]  ;;  %vm998_vm6 = vcmask 523264  }
  0x3c   : > { %v740_v5 = vrot.slane %v4791_v3, 1  ;;  %v741_v6 = vrot.slane %v465_v4, 1  ;;  %v484_v7 = vshrl.u32 %v4791_v3, 16  ;;  %v486_v8 = vshll.u32 %v4791_v3, 16  ;;  %v4461_v38 = vld [vmem:[%s6828_s1 + $0x40] sm:$0xff]   ;;  %v253_v49 = vld [vmem:[%s4779_s28 + $0x48] sm:$0xff] }
  0x3d   : > { %v491_v9 = vshll.u32 %v465_v4, 16  ;;  %v276_v22 = vpack.c.bf16 %v245_v20, %v244_v19  ;;  %v314_v26 = vshrl.u32 %v278_v17, 16  ;;  %v317_v27 = vshll.u32 %v278_v17, 16  ;;  %4070 = vmatprep.subr.bf16.mxu0 %v4461_v38  ;;  %v252_v48 = vld [vmem:[%s4779_s28 + $0x40] sm:$0xff]  ;;  %v4463_v51 = vld [vmem:[%s6828_s1 + $0x48] sm:$0xff]   ;;  %v4466_v13 = vld [vmem:[%s6828_s1 + $0x10] sm:$0xff]  }
  0x3e   : > { %v4799_v10 = vsel %vm739_vm3, %v740_v5, %v741_v6  ;;  %v488_v11 = vrot.slane %v486_v8, 1  ;;  %v279_v28 = vpack.c.bf16 %v251_v24, %v250_v23  ;;  %v307_v29 = vshrl.u32 %v277_v21, 16  ;;  %v4462_v50 = vld [vmem:[%s6828_s1] sm:$0xff]   ;;  %v4464_v59 = vld [vmem:[%s6828_s1 + $0x8] sm:$0xff]   ;;  %v4467_v20 = vld [vmem:[%s6828_s1 + $0x58] sm:$0xff]   ;;  %p6841_p11 = scmp.ne.s32.totalorder %s6836_s30, 0 }
  0x3f   : > { %788 = vrot.lane.b32.xlu1 %v4799_v10, %s4634_s29  ;;  %v493_v12 = vrot.slane %v491_v9, 1  ;;  %v310_v30 = vshll.u32 %v277_v21, 16  ;;  %v300_v31 = vshrl.u32 %v276_v22, 16  ;;  %v303_v32 = vshll.u32 %v276_v22, 16  ;;  %4071 = vmatpush3.bf16.msra.mxu0 %v4462_v50  ;;  %v4470_v38 = vld [vmem:[%s6828_s1 + $0x20] sm:$0xff]   ;;  %v4473_v50 = vld [vmem:[%s6828_s1 + $0x70] sm:$0xff]  }
  0x40   : > { %v489_v16 = vor.u32 %v488_v11, %v484_v7  ;;  %v316_v33 = vrot.slane %v314_v26, 7  ;;  %v309_v34 = vrot.slane %v307_v29, 7  ;;  %v321_v37 = vshrl.u32 %v279_v28, 16  ;;  %4072 = vmatprep.subr.bf16.mxu0 %v4463_v51  ;;  %v4468_v26 = vld [vmem:[%s6828_s1 + $0x18] sm:$0xff]   ;;  %v4476_v51 = vld [vmem:[%s6828_s1 + $0x80] sm:$0xff]   ;;  %s4639_s26 = smov [#allocation5]  }
  0x41   : > { %v302_v35 = vrot.slane %v300_v31, 7  ;;  %v324_v58 = vshll.u32 %v279_v28, 16  ;;  %v280_v6 = vpack.c.bf16 %v253_v49, %v252_v48  ;;  %v254_v28 = vld [vmem:[%s4779_s28 + $0x50] sm:$0xff]  ;;  %v255_v29 = vld [vmem:[%s4779_s28 + $0x58] sm:$0xff]  ;;  %v4472_v49 = vld [vmem:[%s6828_s1 + $0x28] sm:$0xff]   ;;  %4330 = vmatprep.subr.bf16.mxu1 %v4476_v51  ;;  %vm1031_vm7 = vcmask 785408  }
  0x42   : > { %v4812_v25 = vsel %vm482_vm4, %v489_v16, %v493_v12  ;;  %v319_v36 = vor.u32 %v317_v27, %v316_v33  ;;  %v312_v39 = vor.u32 %v310_v30, %v309_v34  ;;  %v467_v42 = vsel %vm4785_vm2, %v309_v34, 0  ;;  %v4465_v12 = vld [vmem:[%s6828_s1 + $0x50] sm:$0xff]   ;;  %v4469_v27 = vld [vmem:[%s6828_s1 + $0x60] sm:$0xff]   ;;  %4331 = vmatpush3.bf16.msra.mxu1 %v4476_v51  ;;  %s4566_s14 = sshll.u32 %s4639_s26, 4  ;;  %s4567_s14 = int_to_ptr.vmem [resolvable:$false] %s4566_s14 }
  0x43   : > { %675 = vrot.lane.b32.xlu0 %v4812_v25, %s4635_s12  ;;  %v305_v40 = vor.u32 %v303_v32, %v302_v35  ;;  %v466_v41 = vsel %vm4785_vm2, %v302_v35, 0  ;;  %v747_v45 = vrot.slane %v467_v42, 1  ;;  %v468_v54 = vsel %vm4785_vm2, %v316_v33, 0  ;;  %4073 = vmatpush3.bf16.msra.mxu0 %v4464_v59  ;;  %v4474_v59 = vld [vmem:[%s6828_s1 + $0x30] sm:$0xff]   ;;  %s4568_s15 = scalar_lea.vmem %s4567_s14, 2048 }
  0x44   : > { %v4825_v43 = vsel %vm4785_vm2, 0, %v319_v36  ;;  %v744_v44 = vrot.slane %v466_v41, 1  ;;  %v4831_v46 = vsel %vm4785_vm2, 0, %v312_v39  ;;  %v323_v57 = vrot.slane %v321_v37, 7  ;;  %4074 = vmatprep.subr.bf16.mxu0 %v4465_v12  ;;  %v4471_v39 = vld [vmem:[%s6828_s1 + $0x68] sm:$0xff]  }
  0x45   : > { %v4835_v47 = vsel %vm4785_vm2, 0, %v305_v40  ;;  %901 = vrot.lane.b32.xlu1 %v4831_v46, %s4634_s29  ;;  %v746_v53 = vrot.slane %v4831_v46, 1  ;;  %v510_v55 = vshll.u32 %v4831_v46, 16  ;;  %v749_v62 = vrot.slane %v4825_v43, 1 }
  0x46   : > { %v743_v52 = vrot.slane %v4835_v47, 1  ;;  %v498_v56 = vshll.u32 %v4835_v47, 16  ;;  %v750_v63 = vrot.slane %v468_v54, 1  ;;  %v508_v0 = vshrl.u32 %v4831_v46, 16 }
  0x47   : > { %903 = vrot.lane.b32.xlu0 %v4825_v43, %s4634_s29  ;;  %v4858_v61 = vsel %vm739_vm3, %v746_v53, %v747_v45  ;;  %v515_v1 = vshll.u32 %v467_v42, 16  ;;  %v512_v4 = vrot.slane %v510_v55, 1  ;;  %v522_v5 = vshll.u32 %v4825_v43, 16  ;;  %4075 = vmatpush3.bf16.msra.mxu0 %v4466_v13 }
  0x48   : > { %v745_v60 = vsel %vm739_vm3, %v743_v52, %v744_v44  ;;  %4334 = vmatprep.mubr.msk.bf16.mxu1 %vm965_vm5, %v4858_v61  ;;  %v496_v7 = vshrl.u32 %v4835_v47, 16  ;;  %v500_v8 = vrot.slane %v498_v56, 1  ;;  %v503_v9 = vshll.u32 %v466_v41, 16  ;;  %4076 = vmatprep.subr.bf16.mxu0 %v4467_v20 }
  0x49   : > { %821 = vrot.lane.b32.xlu1 %v4835_v47, %s4636_s13  ;;  %v326_v11 = vor.u32 %v324_v58, %v323_v57  ;;  %v4878_v14 = vsel %vm739_vm3, %v749_v62, %v750_v63  ;;  %v517_v15 = vrot.slane %v515_v1, 1  ;;  %v513_v16 = vor.u32 %v512_v4, %v508_v0  ;;  %v257_v58 = vld [vmem:[%s4779_s28 + $0x68] sm:$0xff]  ;;  %v258_v62 = vld [vmem:[%s4779_s28 + $0x70] sm:$0xff]  ;;  %v259_v63 = vld [vmem:[%s4779_s28 + $0x78] sm:$0xff] }
  0x4a   : > { %v520_v17 = vshrl.u32 %v4825_v43, 16  ;;  %v524_v18 = vrot.slane %v522_v5, 1  ;;  %v527_v19 = vshll.u32 %v468_v54, 16  ;;  %v501_v21 = vor.u32 %v500_v8, %v496_v7  ;;  %v4475_v0 = vld [vmem:[%s6828_s1 + $0x78] sm:$0xff]  }
  0x4b   : > { %869 = vrot.lane.b32.xlu0 %v745_v60, %s4635_s12  ;;  %v505_v22 = vrot.slane %v503_v9, 1  ;;  %v4888_v23 = vsel %vm4785_vm2, 0, %v326_v11  ;;  %v328_v24 = vshrl.u32 %v280_v6, 16  ;;  %v4902_v30 = vsel %vm482_vm4, %v513_v16, %v517_v15  ;;  %4077 = vmatpush3.bf16.msra.mxu0 %v4468_v26  ;;  %v4477_v8 = vld [vmem:[%s6828_s1 + $0x38] sm:$0xff]   ;;  %v4478_v11 = vld [vmem:[%s6828_s1 + $0x88] sm:$0xff]  }
  0x4c   : > { %v525_v31 = vor.u32 %v524_v18, %v520_v17  ;;  %v529_v32 = vrot.slane %v527_v19, 1  ;;  %v534_v33 = vshll.u32 %v4888_v23, 16  ;;  %v469_v35 = vsel %vm4785_vm2, %v323_v57, 0  ;;  %4078 = vmatprep.subr.bf16.mxu0 %v4469_v27  ;;  %v256_v57 = vld [vmem:[%s4779_s28 + $0x60] sm:$0xff]  ;;  %4332 = vmatprep.subr.bf16.mxu1 %v4478_v11  ;;  %v261_v19 = vld [vmem:[%s4779_s28 + $0x88] sm:$0xff] }
  0x4d   : > { %823 = vrot.lane.b32.xlu1 %v4831_v46, %s4636_s13  ;;  %v4906_v34 = vsel %vm482_vm4, %v501_v21, %v505_v22  ;;  %v330_v36 = vrot.slane %v328_v24, 7  ;;  %v331_v37 = vshll.u32 %v280_v6, 16  ;;  %v281_v40 = vpack.c.bf16 %v255_v29, %v254_v28  ;;  %v260_v18 = vld [vmem:[%s4779_s28 + $0x80] sm:$0xff]  ;;  %4333 = vmatpush3.bf16.msra.mxu1 %v4478_v11  ;;  %v262_v22 = vld [vmem:[%s4779_s28 + $0x90] sm:$0xff]  ;;  %v263_v24 = vld [vmem:[%s4779_s28 + $0x98] sm:$0xff] }
  0x4e   : > { %v4921_v41 = vsel %vm482_vm4, %v525_v31, %v529_v32  ;;  %v532_v42 = vshrl.u32 %v4888_v23, 16  ;;  %v536_v44 = vrot.slane %v534_v33, 1  ;;  %v539_v45 = vshll.u32 %v469_v35, 16 }
  0x4f   : > { %871 = vrot.lane.b32.xlu0 %v4858_v61, %s4635_s12  ;;  %v333_v48 = vor.u32 %v331_v37, %v330_v36  ;;  %4079 = vmatpush3.bf16.msra.mxu0 %v4470_v38  ;;  %v335_v54 = vshrl.u32 %v281_v40, 16  ;;  %v753_v55 = vrot.slane %v469_v35, 1  ;;  %v470_v1 = vsel %vm4785_vm2, %v330_v36, 0 }
  0x50   : > { %4080 = vmatprep.subr.bf16.mxu0 %v4471_v39  ;;  %v537_v52 = vor.u32 %v536_v44, %v532_v42  ;;  %v541_v53 = vrot.slane %v539_v45, 1  ;;  %v338_v4 = vshll.u32 %v281_v40, 16  ;;  %v282_v9 = vpack.c.bf16 %v257_v58, %v256_v57  ;;  %4335 = vmatmul.mubr.msk.bf16.vlgmr.msra.gmra.mrb[0].mxu1 %vm965_vm5, %v4878_v14  ;;  %v266_v57 = vld [vmem:[%s4779_s28 + $0xb0] sm:$0xff] }
  0x51   : > { %790 = vrot.lane.b32.xlu1 %v745_v60, %s4634_s29  ;;  %v4939_v56 = vsel %vm4785_vm2, 0, %v333_v48  ;;  %v752_v60 = vrot.slane %v4888_v23, 1  ;;  %v337_v7 = vrot.slane %v335_v54, 7  ;;  %v283_v12 = vpack.c.bf16 %v259_v63, %v258_v62  ;;  %v267_v63 = vld [vmem:[%s4779_s28 + $0xb8] sm:$0xff] }
  0x52   : > { %v4959_v5 = vsel %vm482_vm4, %v537_v52, %v541_v53  ;;  %v546_v6 = vshll.u32 %v4939_v56, 16  ;;  %v544_v15 = vshrl.u32 %v4939_v56, 16  ;;  %v342_v20 = vshrl.u32 %v282_v9, 16  ;;  %v265_v53 = vld [vmem:[%s4779_s28 + $0xa8] sm:$0xff] }
  0x53   : > { %873 = vrot.lane.b32.xlu0 %v4878_v14, %s4635_s12  ;;  %4081 = vmatpush3.bf16.msra.mxu0 %v4472_v49  ;;  %v4973_v13 = vsel %vm739_vm3, %v752_v60, %v753_v55  ;;  %v340_v17 = vor.u32 %v338_v4, %v337_v7  ;;  %v349_v21 = vshrl.u32 %v283_v12, 16  ;;  %v284_v29 = vpack.c.bf16 %v261_v19, %v260_v18 }
  0x54   : > { %4082 = vmatprep.subr.bf16.mxu0 %v4473_v50  ;;  %v548_v16 = vrot.slane %v546_v6, 1  ;;  %v756_v31 = vrot.slane %v470_v1, 1  ;;  %v345_v32 = vshll.u32 %v282_v9, 16  ;;  %4338 = vmatprep.mubr.msk.bf16.mxu1 %vm965_vm5, %v4973_v13  ;;  %v755_v33 = vrot.slane %v4939_v56, 1  ;;  %v264_v50 = vld [vmem:[%s4779_s28 + $0xa0] sm:$0xff] }
  0x55   : > { %677 = vrot.lane.b32.xlu1 %v4906_v34, %s4635_s12  ;;  %v4986_v28 = vsel %vm4785_vm2, 0, %v340_v17  ;;  %v471_v35 = vsel %vm4785_vm2, %v337_v7, 0  ;;  %v344_v36 = vrot.slane %v342_v20, 7  ;;  %v285_v37 = vpack.c.bf16 %v263_v24, %v262_v22  ;;  %v268_v24 = vld [vmem:[%s4779_s28 + $0xc0] sm:$0xff] }
  0x56   : > { %v549_v26 = vor.u32 %v548_v16, %v544_v15  ;;  %v558_v38 = vshll.u32 %v4986_v28, 16  ;;  %v759_v39 = vrot.slane %v471_v35, 1  ;;  %v351_v40 = vrot.slane %v349_v21, 7 }
  0x57   : > { %933 = vrot.lane.b32.xlu0 %v4902_v30, %s4636_s13  ;;  %4083 = vmatpush3.bf16.msra.mxu0 %v4474_v59  ;;  %v352_v42 = vshll.u32 %v283_v12, 16  ;;  %v758_v45 = vrot.slane %v4986_v28, 1  ;;  %v356_v48 = vshrl.u32 %v284_v29, 16  ;;  %v563_v49 = vshll.u32 %v471_v35, 16 }
  0x58   : > { %4084 = vmatprep.subr.bf16.mxu0 %v4475_v0  ;;  %v347_v51 = vor.u32 %v345_v32, %v344_v36  ;;  %v363_v52 = vshrl.u32 %v285_v37, 16  ;;  %v5009_v54 = vsel %vm739_vm3, %v755_v33, %v756_v31  ;;  %v560_v58 = vrot.slane %v558_v38, 1  ;;  %v270_v32 = vld [vmem:[%s4779_s28 + $0xd0] sm:$0xff]  ;;  %v271_v33 = vld [vmem:[%s4779_s28 + $0xd8] sm:$0xff] }
  0x59   : > { %679 = vrot.lane.b32.xlu1 %v4902_v30, %s4635_s12  ;;  %v354_v55 = vor.u32 %v352_v42, %v351_v40  ;;  %v5016_v59 = vsel %vm739_vm3, %v758_v45, %v759_v39  ;;  %v358_v60 = vrot.slane %v356_v48, 7  ;;  %v359_v62 = vshll.u32 %v284_v29, 16  ;;  %4339 = vmatmul.mubr.msk.bf16.gmra.mrb[4].mxu1 %vm965_vm5, %v5009_v54 }
  0x5a   : > { %v565_v0 = vrot.slane %v563_v49, 1  ;;  %v286_v4 = vpack.c.bf16 %v265_v53, %v264_v50  ;;  %4342 = vmatprep.mubr.msk.bf16.mxu1 %vm965_vm5, %v5016_v59  ;;  %v5027_v6 = vsel %vm4785_vm2, 0, %v347_v51  ;;  %v366_v9 = vshll.u32 %v285_v37, 16 }
  0x5b   : > { %935 = vrot.lane.b32.xlu0 %v4921_v41, %s4636_s13  ;;  %4085 = vmatpush3.bf16.msra.mxu0 %v4477_v8  ;;  %v365_v8 = vrot.slane %v363_v52, 7  ;;  %v761_v11 = vrot.slane %v5027_v6, 1  ;;  %v5038_v12 = vsel %vm4785_vm2, %v351_v40, 0  ;;  %v287_v15 = vpack.c.bf16 %v267_v63, %v266_v57  ;;  %v272_v63 = vld [vmem:[%s4779_s28 + $0xe0] sm:$0xff] }
  0x5c   : > { %v765_v18 = vrot.slane %v5038_v12, 1  ;;  %v361_v19 = vor.u32 %v359_v62, %v358_v60  ;;  %v370_v20 = vshrl.u32 %v286_v4, 16  ;;  %v5068_v38 = vsel %vm4785_vm2, %v358_v60, 0 }
  0x5d   : > { %792 = vrot.lane.b32.xlu1 %v4858_v61, %s4634_s29  ;;  %v551_v61 = vshll.u32 %v470_v1, 16  ;;  %v472_v1 = vsel %vm4785_vm2, %v344_v36, 0  ;;  %v368_v22 = vor.u32 %v366_v9, %v365_v8  ;;  %v377_v31 = vshrl.u32 %v287_v15, 16 }
  0x5e   : > { %v762_v7 = vrot.slane %v472_v1, 1  ;;  %v575_v21 = vshll.u32 %v472_v1, 16  ;;  %v5064_v37 = vsel %vm4785_vm2, 0, %v361_v19  ;;  %v372_v40 = vrot.slane %v370_v20, 7 }
  0x5f   : > { %905 = vrot.lane.b32.xlu0 %v4888_v23, %s4634_s29  ;;  %v553_v27 = vrot.slane %v551_v61, 1  ;;  %v5034_v61 = vsel %vm4785_vm2, 0, %v354_v55  ;;  %v767_v39 = vrot.slane %v5064_v37, 1  ;;  %v373_v42 = vshll.u32 %v286_v4, 16 }
  0x60   : > { %v764_v17 = vrot.slane %v5034_v61, 1  ;;  %v5050_v29 = vsel %vm739_vm3, %v761_v11, %v762_v7  ;;  %v5078_v45 = vsel %vm4785_vm2, 0, %v368_v22  ;;  %v5082_v48 = vsel %vm4785_vm2, %v365_v8, 0 }
  0x61   : > { %825 = vrot.lane.b32.xlu1 %v4825_v43, %s4636_s13  ;;  %v5001_v44 = vsel %vm482_vm4, %v549_v26, %v553_v27  ;;  %v269_v26 = vld [vmem:[%s4779_s28 + $0xc8] sm:$0xff]  ;;  %v570_v27 = vshll.u32 %v5027_v6, 16  ;;  %4343 = vmatmul.mubr.msk.bf16.gmra.mrb[8].mxu1 %vm965_vm5, %v5050_v29  ;;  %v289_v50 = vpack.c.bf16 %v271_v33, %v270_v32  ;;  %v379_v51 = vrot.slane %v377_v31, 7 }
  0x62   : > { %v5060_v36 = vsel %vm739_vm3, %v764_v17, %v765_v18  ;;  %v288_v49 = vpack.c.bf16 %v269_v26, %v268_v24  ;;  %v380_v52 = vshll.u32 %v287_v15, 16  ;;  %v568_v53 = vshrl.u32 %v5027_v6, 16  ;;  %v274_v15 = vld [vmem:[%s4779_s28 + $0xf0] sm:$0xff] }
  0x63   : > { %937 = vrot.lane.b32.xlu0 %v4959_v5, %s4636_s13  ;;  %4346 = vmatprep.mubr.msk.bf16.mxu1 %vm965_vm5, %v5060_v36  ;;  %v770_v55 = vrot.slane %v5078_v45, 1  ;;  %v771_v57 = vrot.slane %v5082_v48, 1  ;;  %v391_v62 = vshrl.u32 %v289_v50, 16  ;;  %v577_v8 = vrot.slane %v575_v21, 1 }
  0x64   : > { %v384_v60 = vshrl.u32 %v288_v49, 16  ;;  %v382_v4 = vor.u32 %v380_v52, %v379_v51  ;;  %v5105_v11 = vsel %vm4785_vm2, %v372_v40, 0  ;;  %v387_v21 = vshll.u32 %v288_v49, 16 }
  0x65   : > { %681 = vrot.lane.b32.xlu1 %v4921_v41, %s4635_s12  ;;  %v5101_v9 = vsel %vm739_vm3, %v770_v55, %v771_v57  ;;  %v774_v18 = vrot.slane %v5105_v11, 1  ;;  %v393_v22 = vrot.slane %v391_v62, 7  ;;  %v394_v24 = vshll.u32 %v289_v50, 16 }
  0x66   : > { %v386_v20 = vrot.slane %v384_v60, 7  ;;  %v5127_v31 = vsel %vm4785_vm2, %v379_v51, 0 }
  0x67   : > { %875 = vrot.lane.b32.xlu0 %v4973_v13, %s4635_s12  ;;  %v396_v49 = vor.u32 %v394_v24, %v393_v22 }
  0x68   : > { %v5153_v57 = vsel %vm4785_vm2, %v386_v20, 0 }
  0x69   : > { %794 = vrot.lane.b32.xlu1 %v4878_v14, %s4634_s29  ;;  %v556_v14 = vshrl.u32 %v4986_v28, 16  ;;  %v5164_v62 = vsel %vm4785_vm2, 0, %v396_v49 }
  0x6b   : > { %907 = vrot.lane.b32.xlu0 %v4939_v56, %s4634_s29  ;;  %v561_v16 = vor.u32 %v560_v58, %v556_v14  ;;  %v572_v14 = vrot.slane %v570_v27, 1  ;;  %v375_v58 = vor.u32 %v373_v42, %v372_v40  ;;  %v5123_v27 = vsel %vm4785_vm2, 0, %v382_v4 }
  0x6c   : > { %v777_v40 = vrot.slane %v5127_v31, 1  ;;  %v389_v42 = vor.u32 %v387_v21, %v386_v20  ;;  %v5171_v4 = vsel %vm4785_vm2, %v393_v22, 0 }
  0x6d   : > { %827 = vrot.lane.b32.xlu1 %v4888_v23, %s4636_s13  ;;  %v5057_v35 = vsel %vm482_vm4, %v561_v16, %v565_v0  ;;  %v273_v0 = vld [vmem:[%s4779_s28 + $0xe8] sm:$0xff]  ;;  %v573_v7 = vor.u32 %v572_v14, %v568_v53  ;;  %v275_v16 = vld [vmem:[%s4779_s28 + $0xf8] sm:$0xff]  ;;  %v5113_v17 = vsel %vm4785_vm2, 0, %v375_v58  ;;  %v587_v14 = vshll.u32 %v5038_v12, 16 }
  0x6e   : > { %v290_v19 = vpack.c.bf16 %v273_v0, %v272_v63  ;;  %v773_v26 = vrot.slane %v5113_v17, 1  ;;  %v291_v32 = vpack.c.bf16 %v275_v16, %v274_v15  ;;  %v5159_v60 = vsel %vm4785_vm2, 0, %v389_v42 }
  0x6f   : > { %939 = vrot.lane.b32.xlu0 %v5001_v44, %s4636_s13  ;;  %v5132_v33 = vsel %vm482_vm4, %v573_v7, %v577_v8  ;;  %v780_v12 = vrot.slane %v5153_v57, 1  ;;  %v779_v0 = vrot.slane %v5159_v60, 1  ;;  %v589_v16 = vrot.slane %v587_v14, 1 }
  0x70   : > { %v398_v50 = vshrl.u32 %v290_v19, 16  ;;  %v5140_v51 = vsel %vm739_vm3, %v773_v26, %v774_v18  ;;  %v405_v52 = vshrl.u32 %v291_v32, 16  ;;  %v401_v58 = vshll.u32 %v290_v19, 16 }
  0x71   : > { %683 = vrot.lane.b32.xlu1 %v4959_v5, %s4635_s12  ;;  %v408_v8 = vshll.u32 %v291_v32, 16  ;;  %v782_v18 = vrot.slane %v5164_v62, 1  ;;  %v783_v19 = vrot.slane %v5171_v4, 1  ;;  %v5180_v21 = vsel %vm739_vm3, %v779_v0, %v780_v12 }
  0x72   : > { %v400_v63 = vrot.slane %v398_v50, 7  ;;  %v407_v7 = vrot.slane %v405_v52, 7  ;;  %v594_v26 = vshll.u32 %v5064_v37, 16  ;;  %v592_v50 = vshrl.u32 %v5064_v37, 16 }
  0x73   : > { %877 = vrot.lane.b32.xlu0 %v5009_v54, %s4635_s12  ;;  %v5189_v32 = vsel %vm739_vm3, %v782_v18, %v783_v19 }
  0x74   : > { %v403_v20 = vor.u32 %v401_v58, %v400_v63  ;;  %v410_v22 = vor.u32 %v408_v8, %v407_v7  ;;  %v596_v52 = vrot.slane %v594_v26, 1  ;;  %v604_v8 = vshrl.u32 %v5078_v45, 16 }
  0x75   : > { %796 = vrot.lane.b32.xlu1 %v4973_v13, %s4634_s29  ;;  %v768_v13 = vrot.slane %v5068_v38, 1  ;;  %v623_v26 = vshll.u32 %v5105_v11, 16  ;;  %v630_v11 = vshll.u32 %v5123_v27, 16 }
  0x76   : > { %v5210_v49 = vsel %vm4785_vm2, 0, %v410_v22  ;;  %v597_v58 = vor.u32 %v596_v52, %v592_v50  ;;  %v628_v52 = vshrl.u32 %v5123_v27, 16 }
  0x77   : > { %909 = vrot.lane.b32.xlu0 %v4986_v28, %s4634_s29  ;;  %v5096_v1 = vsel %vm739_vm3, %v767_v39, %v768_v13  ;;  %v582_v39 = vshll.u32 %v5034_v61, 16  ;;  %v776_v13 = vrot.slane %v5123_v27, 1 }
  0x78   : > { %4347 = vmatmul.mubr.msk.bf16.gmra.mrb[12].mxu1 %vm965_vm5, %v5096_v1 }
  0x79   : > { %829 = vrot.lane.b32.xlu1 %v4939_v56, %s4636_s13  ;;  %4350 = vmatprep.mubr.msk.bf16.mxu1 %vm965_vm5, %v5101_v9  ;;  %v584_v53 = vrot.slane %v582_v39, 1  ;;  %v5147_v55 = vsel %vm739_vm3, %v776_v13, %v777_v40  ;;  %v599_v39 = vshll.u32 %v5068_v38, 16  ;;  %v5198_v13 = vsel %vm4785_vm2, 0, %v403_v20 }
  0x7a   : > { %v785_v40 = vrot.slane %v5198_v13, 1  ;;  %v5214_v38 = vsel %vm4785_vm2, %v407_v7, 0  ;;  %v606_v7 = vshll.u32 %v5078_v45, 16  ;;  %v616_v20 = vshrl.u32 %v5113_v17, 16 }
  0x7b   : > { %941 = vrot.lane.b32.xlu0 %v5057_v35, %s4636_s13  ;;  %v601_v12 = vrot.slane %v599_v39, 1  ;;  %v625_v39 = vrot.slane %v623_v26, 1 }
  0x7d   : > { %685 = vrot.lane.b32.xlu1 %v5001_v44, %s4635_s12  ;;  %v5240_v0 = vsel %vm482_vm4, %v597_v58, %v601_v12 }
  0x7f   : > { %879 = vrot.lane.b32.xlu0 %v5016_v59, %s4635_s12 }
  0x80   : > { %4351 = vmatmul.mubr.msk.bf16.gmra.mrb[16].mxu1 %vm965_vm5, %v5140_v51 }
  0x81   : > { %798 = vrot.lane.b32.xlu1 %v5009_v54, %s4634_s29  ;;  %v580_v54 = vshrl.u32 %v5034_v61, 16  ;;  %4354 = vmatprep.mubr.msk.bf16.mxu1 %vm965_vm5, %v5147_v55 }
  0x83   : > { %911 = vrot.lane.b32.xlu0 %v5027_v6, %s4634_s29  ;;  %v585_v15 = vor.u32 %v584_v53, %v580_v54  ;;  %v866_v54 = vrot.slane %v5210_v49, 1  ;;  %v867_v53 = vrot.slane %v5214_v38, 1 }
  0x85   : > { %831 = vrot.lane.b32.xlu1 %v4986_v28, %s4636_s13  ;;  %v5185_v24 = vsel %vm482_vm4, %v585_v15, %v589_v16  ;;  %v608_v15 = vrot.slane %v606_v7, 1  ;;  %v611_v16 = vshll.u32 %v5082_v48, 16  ;;  %v618_v48 = vshll.u32 %v5113_v17, 16 }
  0x87   : > { %943 = vrot.lane.b32.xlu0 %v5132_v33, %s4636_s13  ;;  %v613_v18 = vrot.slane %v611_v16, 1  ;;  %v620_v22 = vrot.slane %v618_v48, 1  ;;  %v642_v16 = vshll.u32 %v5159_v60, 16  ;;  %v640_v48 = vshrl.u32 %v5159_v60, 16 }
  0x88   : > { %4355 = vmatmul.mubr.msk.bf16.gmra.mrb[20].mxu1 %vm965_vm5, %v5180_v21 }
  0x89   : > { %687 = vrot.lane.b32.xlu1 %v5057_v35, %s4635_s12  ;;  %4358 = vmatprep.mubr.msk.bf16.mxu1 %vm965_vm5, %v5189_v32 }
  0x8b   : > { %881 = vrot.lane.b32.xlu0 %v5050_v29, %s4635_s12 }
  0x8d   : > { %800 = vrot.lane.b32.xlu1 %v5016_v59, %s4634_s29  ;;  %v5202_v59 = vsel %vm4785_vm2, %v400_v63, 0  ;;  %v5229_v63 = vsel %vm739_vm3, %v866_v54, %v867_v53  ;;  %v632_v54 = vrot.slane %v630_v11, 1  ;;  %v635_v53 = vshll.u32 %v5127_v31, 16 }
  0x8e   : > { %v786_v42 = vrot.slane %v5202_v59, 1 }
  0x8f   : > { %913 = vrot.lane.b32.xlu0 %v5034_v61, %s4634_s29  ;;  %v637_v7 = vrot.slane %v635_v53, 1 }
  0x90   : > { %v5224_v14 = vsel %vm739_vm3, %v785_v40, %v786_v42 }
  0x91   : > { %833 = vrot.lane.b32.xlu1 %v5027_v6, %s4636_s13  ;;  %4359 = vmatmul.mubr.msk.bf16.gmra.mrb[24].mxu1 %vm965_vm5, %v5224_v14 }
  0x92   : > { %4362 = vmatprep.mubr.msk.bf16.mxu1 %vm965_vm5, %v5229_v63 }
  0x93   : > { %945 = vrot.lane.b32.xlu0 %v5185_v24, %s4636_s13 }
  0x95   : > { %689 = vrot.lane.b32.xlu1 %v5132_v33, %s4635_s12 }
  0x97   : > { %883 = vrot.lane.b32.xlu0 %v5060_v36, %s4635_s12 }
  0x99   : > { %802 = vrot.lane.b32.xlu1 %v5050_v29, %s4634_s29  ;;  %4363 = vmatmul.mubr.msk.bf16.gmra.mrb[28].mxu1 %vm965_vm5, %v4799_v10  ;;  %v609_v29 = vor.u32 %v608_v15, %v604_v8 }
  0x9b   : > { %915 = vrot.lane.b32.xlu0 %v5064_v37, %s4634_s29  ;;  %v5260_v19 = vsel %vm482_vm4, %v609_v29, %v613_v18 }
  0x9d   : > { %835 = vrot.lane.b32.xlu1 %v5034_v61, %s4636_s13 }
  0x9f   : > { %947 = vrot.lane.b32.xlu0 %v5240_v0, %s4636_s13 }
  0xa1   : > { %691 = vrot.lane.b32.xlu1 %v5185_v24, %s4635_s12 }
  0xa3   : > { %885 = vrot.lane.b32.xlu0 %v5096_v1, %s4635_s12 }
  0xa5   : > { %804 = vrot.lane.b32.xlu1 %v5060_v36, %s4634_s29  ;;  %v621_v36 = vor.u32 %v620_v22, %v616_v20  ;;  %v644_v20 = vrot.slane %v642_v16, 1  ;;  %v647_v22 = vshll.u32 %v5153_v57, 16 }
  0xa7   : > { %917 = vrot.lane.b32.xlu0 %v5078_v45, %s4634_s29  ;;  %v5278_v50 = vsel %vm482_vm4, %v621_v36, %v625_v39  ;;  %v645_v11 = vor.u32 %v644_v20, %v640_v48 }
  0xa9   : > { %837 = vrot.lane.b32.xlu1 %v5064_v37, %s4636_s13 }
  0xab   : > { %949 = vrot.lane.b32.xlu0 %v5260_v19, %s4636_s13 }
  0xad   : > { %693 = vrot.lane.b32.xlu1 %v5240_v0, %s4635_s12 }
  0xaf   : > { %887 = vrot.lane.b32.xlu0 %v5101_v9, %s4635_s12 }
  0xb1   : > { %806 = vrot.lane.b32.xlu1 %v5096_v1, %s4634_s29  ;;  %v789_v42 = vpop.permute.xlu1 %788  ;;  %v633_v1 = vor.u32 %v632_v54, %v628_v52  ;;  %v649_v52 = vrot.slane %v647_v22, 1 }
  0xb3   : > { %919 = vrot.lane.b32.xlu0 %v5113_v17, %s4634_s29  ;;  %v5296_v31 = vsel %vm482_vm4, %v633_v1, %v637_v7 }
  0xb5   : > { %v676_v40 = vpop.permute.xlu0 %675  ;;  %839 = vrot.lane.b32.xlu1 %v5078_v45, %s4636_s13 }
  0xb6   : > { %v967_v39 = vsel %vm965_vm5, %v4791_v3, %v676_v40 }
  0xb7   : > { %951 = vrot.lane.b32.xlu0 %v5278_v50, %s4636_s13  ;;  %v902_v12 = vpop.permute.xlu1 %901  ;;  %v5318_v40 = vsel %vm998_vm6, %v967_v39, %v789_v42 }
  0xb9   : > { %v904_v58 = vpop.permute.xlu0 %903  ;;  %695 = vrot.lane.b32.xlu1 %v5260_v19, %s4635_s12 }
  0xbb   : > { %889 = vrot.lane.b32.xlu0 %v5140_v51, %s4635_s12  ;;  %v822_v15 = vpop.permute.xlu1 %821 }
  0xbc   : > { %v1033_v7 = vsel %vm1031_vm7, %v5318_v40, %v822_v15  ;;  %v652_v15 = vshrl.u32 %v5164_v62, 16 }
  0xbd   : > { %v870_v8 = vpop.permute.xlu0 %869  ;;  %808 = vrot.lane.b32.xlu1 %v5101_v9, %s4634_s29 }
  0xbe   : > { %v1082_v9 = vsel %vm965_vm5, %v4906_v34, %v870_v8 }
  0xbf   : > { %921 = vrot.lane.b32.xlu0 %v5123_v27, %s4634_s29  ;;  %v824_v18 = vpop.permute.xlu1 %823  ;;  %v1129_v57 = vsel %vm998_vm6, %v1082_v9, %v902_v12  ;;  %v5327_v12 = vsel %vm482_vm4, %v645_v11, %v649_v52 }
  0xc1   : > { %v872_v29 = vpop.permute.xlu0 %871  ;;  %841 = vrot.lane.b32.xlu1 %v5113_v17, %s4636_s13 }
  0xc2   : > { %v1085_v34 = vsel %vm965_vm5, %v4902_v30, %v872_v29  ;;  %v654_v30 = vshll.u32 %v5164_v62, 16 }
  0xc3   : > { %953 = vrot.lane.b32.xlu0 %v5296_v31, %s4636_s13  ;;  %v791_v36 = vpop.permute.xlu1 %790  ;;  %v1131_v16 = vsel %vm998_vm6, %v1085_v34, %v904_v58 }
  0xc4   : > { %v656_v20 = vrot.slane %v654_v30, 1 }
  0xc5   : > { %v874_v26 = vpop.permute.xlu0 %873  ;;  %697 = vrot.lane.b32.xlu1 %v5278_v50, %s4635_s12 }
  0xc6   : > { %v1088_v39 = vsel %vm965_vm5, %v4921_v41, %v874_v26 }
  0xc7   : > { %891 = vrot.lane.b32.xlu0 %v5147_v55, %s4635_s12  ;;  %v678_v53 = vpop.permute.xlu1 %677 }
  0xc8   : > { %v969_v42 = vsel %vm965_vm5, %v4835_v47, %v678_v53  ;;  %v659_v47 = vshll.u32 %v5171_v4, 16 }
  0xc9   : > { %v934_v54 = vpop.permute.xlu0 %933  ;;  %810 = vrot.lane.b32.xlu1 %v5140_v51, %s4634_s29  ;;  %v1002_v51 = vsel %vm998_vm6, %v969_v42, %v791_v36  ;;  %v657_v36 = vor.u32 %v656_v20, %v652_v15 }
  0xca   : > { %v1161_v1 = vsel %vm1031_vm7, %v1129_v57, %v934_v54  ;;  %v1036_v58 = vsel %vm1031_vm7, %v1002_v51, %v824_v18  ;;  %v661_v11 = vrot.slane %v659_v47, 1 }
  0xcb   : > { %923 = vrot.lane.b32.xlu0 %v5159_v60, %s4634_s29  ;;  %1439 = vmatprep.mubr.bf16.mxu0 %v1161_v1  ;;  %v680_v29 = vpop.permute.xlu1 %679 }
  0xcc   : > { %1440 = vmatmul.mubr.bf16.vlgmr.msra.gmra.mrb[0].mxu0 %v1033_v7  ;;  %v971_v52 = vsel %vm965_vm5, %v4831_v46, %v680_v29  ;;  %v5358_v18 = vsel %vm482_vm4, %v657_v36, %v661_v11  ;;  %v666_v46 = vshll.u32 %v5198_v13, 16  ;;  %v664_v7 = vshrl.u32 %v5198_v13, 16 }
  0xcd   : > { %v936_v8 = vpop.permute.xlu0 %935  ;;  %843 = vrot.lane.b32.xlu1 %v5123_v27, %s4636_s13  ;;  %v854_v36 = vshrl.u32 %v5210_v49, 16 }
  0xce   : > { %v1164_v48 = vsel %vm1031_vm7, %v1131_v16, %v936_v8  ;;  %v668_v30 = vrot.slane %v666_v46, 1 }
  0xcf   : > { %955 = vrot.lane.b32.xlu0 %v5327_v12, %s4636_s13  ;;  %1447 = vmatprep.mubr.bf16.mxu0 %v1164_v48  ;;  %v793_v9 = vpop.permute.xlu1 %792 }
  0xd0   : > { %v1004_v41 = vsel %vm998_vm6, %v971_v52, %v793_v9  ;;  %v669_v51 = vor.u32 %v668_v30, %v664_v7  ;;  %v856_v9 = vshll.u32 %v5210_v49, 16  ;;  %v861_v52 = vshll.u32 %v5214_v38, 16 }
  0xd1   : > { %v906_v22 = vpop.permute.xlu0 %905  ;;  %699 = vrot.lane.b32.xlu1 %v5296_v31, %s4635_s12 }
  0xd2   : > { %v1133_v4 = vsel %vm998_vm6, %v1088_v39, %v906_v22  ;;  %v858_v11 = vrot.slane %v856_v9, 1  ;;  %v863_v46 = vrot.slane %v861_v52, 1 }
  0xd3   : > { %893 = vrot.lane.b32.xlu0 %v5180_v21, %s4635_s12  ;;  %v826_v57 = vpop.permute.xlu1 %825 }
  0xd4   : > { %1448 = vmatmul.mubr.bf16.gmra.mrb[4].mxu0 %v1036_v58  ;;  %v1039_v1 = vsel %vm1031_vm7, %v1004_v41, %v826_v57  ;;  %v859_v41 = vor.u32 %v858_v11, %v854_v36 }
  0xd5   : > { %v938_v54 = vpop.permute.xlu0 %937  ;;  %812 = vrot.lane.b32.xlu1 %v5147_v55, %s4634_s29  ;;  %v671_v55 = vshll.u32 %v5202_v59, 16 }
  0xd6   : > { %v1167_v34 = vsel %vm1031_vm7, %v1133_v4, %v938_v54 }
  0xd7   : > { %925 = vrot.lane.b32.xlu0 %v5164_v62, %s4634_s29  ;;  %1455 = vmatprep.mubr.bf16.mxu0 %v1167_v34  ;;  %v682_v53 = vpop.permute.xlu1 %681  ;;  %v673_v15 = vrot.slane %v671_v55, 1 }
  0xd8   : > { %v973_v42 = vsel %vm965_vm5, %v4825_v43, %v682_v53 }
  0xd9   : > { %v876_v26 = vpop.permute.xlu0 %875  ;;  %845 = vrot.lane.b32.xlu1 %v5159_v60, %s4636_s13  ;;  %v5385_v22 = vsel %vm482_vm4, %v669_v51, %v673_v15 }
  0xda   : > { %v1091_v16 = vsel %vm965_vm5, %v4959_v5, %v876_v26 }
  0xdb   : > { %957 = vrot.lane.b32.xlu0 %v5358_v18, %s4636_s13  ;;  %v795_v29 = vpop.permute.xlu1 %794 }
  0xdc   : > { %1456 = vmatmul.mubr.bf16.gmra.mrb[8].mxu0 %v1039_v1  ;;  %v1006_v48 = vsel %vm998_vm6, %v973_v42, %v795_v29  ;;  %v5411_v1 = vsel %vm482_vm4, %v859_v41, %v863_v46 }
  0xdd   : > { %v908_v8 = vpop.permute.xlu0 %907  ;;  %701 = vrot.lane.b32.xlu1 %v5327_v12, %s4635_s12 }
  0xde   : > { %v1135_v59 = vsel %vm998_vm6, %v1091_v16, %v908_v8 }
  0xdf   : > { %895 = vrot.lane.b32.xlu0 %v5189_v32, %s4635_s12  ;;  %v828_v47 = vpop.permute.xlu1 %827 }
  0xe0   : > { %v1042_v5 = vsel %vm1031_vm7, %v1006_v48, %v828_v47 }
  0xe1   : > { %v940_v20 = vpop.permute.xlu0 %939  ;;  %814 = vrot.lane.b32.xlu1 %v5180_v21, %s4634_s29 }
  0xe2   : > { %v1170_v43 = vsel %vm1031_vm7, %v1135_v59, %v940_v20 }
  0xe3   : > { %927 = vrot.lane.b32.xlu0 %v5198_v13, %s4634_s29  ;;  %1463 = vmatprep.mubr.bf16.mxu0 %v1170_v43  ;;  %v684_v39 = vpop.permute.xlu1 %683 }
  0xe4   : > { %1464 = vmatmul.mubr.bf16.gmra.mrb[12].mxu0 %v1042_v5  ;;  %v975_v21 = vsel %vm965_vm5, %v4888_v23, %v684_v39 }
  0xe5   : > { %v878_v58 = vpop.permute.xlu0 %877  ;;  %847 = vrot.lane.b32.xlu1 %v5164_v62, %s4636_s13 }
  0xe6   : > { %v1094_v54 = vsel %vm965_vm5, %v5001_v44, %v878_v58 }
  0xe7   : > { %959 = vrot.lane.b32.xlu0 %v5385_v22, %s4636_s13  ;;  %v797_v57 = vpop.permute.xlu1 %796 }
  0xe8   : > { %v1008_v34 = vsel %vm998_vm6, %v975_v21, %v797_v57 }
  0xe9   : > { %v910_v4 = vpop.permute.xlu0 %909  ;;  %703 = vrot.lane.b32.xlu1 %v5358_v18, %s4635_s12 }
  0xea   : > { %v1137_v38 = vsel %vm998_vm6, %v1094_v54, %v910_v4 }
  0xeb   : > { %897 = vrot.lane.b32.xlu0 %v5224_v14, %s4635_s12  ;;  %v830_v53 = vpop.permute.xlu1 %829 }
  0xec   : > { %v1045_v44 = vsel %vm1031_vm7, %v1008_v34, %v830_v53 }
  0xed   : > { %v942_v26 = vpop.permute.xlu0 %941  ;;  %816 = vrot.lane.b32.xlu1 %v5189_v32, %s4634_s29 }
  0xee   : > { %v1173_v23 = vsel %vm1031_vm7, %v1137_v38, %v942_v26 }
  0xef   : > { %929 = vrot.lane.b32.xlu0 %v5210_v49, %s4634_s29  ;;  %1471 = vmatprep.mubr.bf16.mxu0 %v1173_v23  ;;  %v686_v30 = vpop.permute.xlu1 %685 }
  0xf0   : > { %1472 = vmatmul.mubr.bf16.gmra.mrb[16].mxu0 %v1045_v44  ;;  %v977_v55 = vsel %vm965_vm5, %v4939_v56, %v686_v30 }
  0xf1   : > { %v880_v7 = vpop.permute.xlu0 %879  ;;  %849 = vrot.lane.b32.xlu1 %v5198_v13, %s4636_s13 }
  0xf2   : > { %v1097_v8 = vsel %vm965_vm5, %v5057_v35, %v880_v7 }
  0xf3   : > { %961 = vrot.lane.b32.xlu0 %v5411_v1, %s4636_s13  ;;  %v799_v32 = vpop.permute.xlu1 %798 }
  0xf4   : > { %v1010_v16 = vsel %vm998_vm6, %v977_v55, %v799_v32 }
  0xf5   : > { %v912_v42 = vpop.permute.xlu0 %911  ;;  %705 = vrot.lane.b32.xlu1 %v5385_v22, %s4635_s12 }
  0xf6   : > { %v1139_v29 = vsel %vm998_vm6, %v1097_v8, %v912_v42 }
  0xf7   : > { %899 = vrot.lane.b32.xlu0 %v5229_v63, %s4635_s12  ;;  %v832_v51 = vpop.permute.xlu1 %831 }
  0xf8   : > { %v1048_v56 = vsel %vm1031_vm7, %v1010_v16, %v832_v51 }
  0xf9   : > { %v944_v48 = vpop.permute.xlu0 %943  ;;  %818 = vrot.lane.b32.xlu1 %v5224_v14, %s4634_s29 }
  0xfa   : > { %v1176_v15 = vsel %vm1031_vm7, %v1139_v29, %v944_v48 }
  0xfb   : > { %931 = vrot.lane.b32.xlu0 %v4791_v3, %s4634_s29  ;;  %1479 = vmatprep.mubr.bf16.mxu0 %v1176_v15  ;;  %v688_v63 = vpop.permute.xlu1 %687 }
  0xfc   : > { %1480 = vmatmul.mubr.bf16.gmra.mrb[20].mxu0 %v1048_v56  ;;  %v979_v59 = vsel %vm965_vm5, %v4986_v28, %v688_v63 }
  0xfd   : > { %v882_v35 = vpop.permute.xlu0 %881  ;;  %851 = vrot.lane.b32.xlu1 %v5210_v49, %s4636_s13 }
  0xfe   : > { %v1100_v3 = vsel %vm965_vm5, %v5132_v33, %v882_v35 }
  0xff   : > { %963 = vrot.lane.b32.xlu0 %v4812_v25, %s4636_s13  ;;  %v801_v47 = vpop.permute.xlu1 %800 }
 0x100   : > { %v1012_v43 = vsel %vm998_vm6, %v979_v59, %v801_v47 }
 0x101   : > { %v914_v20 = vpop.permute.xlu0 %913 }
 0x102   : > { %v1141_v14 = vsel %vm998_vm6, %v1100_v3, %v914_v20 }
 0x103   : > { %v834_v9 = vpop.permute.xlu1 %833 }
 0x104   : > { %v1051_v25 = vsel %vm1031_vm7, %v1012_v43, %v834_v9 }
 0x105   : > { %v946_v5 = vpop.permute.xlu0 %945 }
 0x106   : > { %v1179_v58 = vsel %vm1031_vm7, %v1141_v14, %v946_v5 }
 0x107   : > { %1487 = vmatprep.mubr.bf16.mxu0 %v1179_v58  ;;  %v690_v39 = vpop.permute.xlu1 %689 }
 0x108   : > { %1488 = vmatmul.mubr.bf16.gmra.mrb[24].mxu0 %v1051_v25  ;;  %v981_v28 = vsel %vm965_vm5, %v5027_v6, %v690_v39 }
 0x109   : > { %v884_v49 = vpop.permute.xlu0 %883 }
 0x10a   : > { %v1103_v33 = vsel %vm965_vm5, %v5185_v24, %v884_v49 }
 0x10b   : > { %v803_v11 = vpop.permute.xlu1 %802 }
 0x10c   : > { %v1014_v52 = vsel %vm998_vm6, %v981_v28, %v803_v11 }
 0x10d   : > { %v916_v36 = vpop.permute.xlu0 %915 }
 0x10e   : > { %v1143_v21 = vsel %vm998_vm6, %v1103_v33, %v916_v36 }
 0x10f   : > { %v836_v54 = vpop.permute.xlu1 %835 }
 0x110   : > { %v1054_v34 = vsel %vm1031_vm7, %v1014_v52, %v836_v54 }
 0x111   : > { %v948_v4 = vpop.permute.xlu0 %947 }
 0x112   : > { %v1182_v57 = vsel %vm1031_vm7, %v1143_v21, %v948_v4  ;;  %v5492_v21 = vld [vmem:[%s6830_s3 + $0x80] sm:$0xff]  }
 0x113   : > { %1495 = vmatprep.mubr.bf16.mxu0 %v1182_v57  ;;  %v692_v46 = vpop.permute.xlu1 %691  ;;  %4366 = vmatprep.subr.bf16.mxu0 %v5492_v21 }
 0x114   : > { %1496 = vmatmul.mubr.bf16.gmra.mrb[28].mxu0 %v1054_v34  ;;  %v983_v6 = vsel %vm965_vm5, %v5034_v61, %v692_v46  ;;  %v4480_v34 = vld [vmem:[%s6830_s3 + $0x88] sm:$0xff]  }
 0x115   : > { %v886_v41 = vpop.permute.xlu0 %885  ;;  %4367 = vmatpush3.bf16.msra.mxu0 %v5492_v21 }
 0x116   : > { %v1106_v24 = vsel %vm965_vm5, %v5240_v0, %v886_v41  ;;  %4368 = vmatprep.subr.bf16.mxu0 %v4480_v34 }
 0x117   : > { %v805_v26 = vpop.permute.xlu1 %804 }
 0x118   : > { %v1016_v53 = vsel %vm998_vm6, %v983_v6, %v805_v26 }
 0x119   : > { %v918_v38 = vpop.permute.xlu0 %917  ;;  %4369 = vmatpush3.bf16.msra.mxu0 %v4480_v34 }
 0x11a   : > { %v1145_v23 = vsel %vm998_vm6, %v1106_v24, %v918_v38 }
 0x11b   : > { %v838_v7 = vpop.permute.xlu1 %837 }
 0x11c   : > { %v1057_v55 = vsel %vm1031_vm7, %v1016_v53, %v838_v7 }
 0x11d   : > { %v950_v44 = vpop.permute.xlu0 %949 }
 0x11e   : > { %v1185_v30 = vsel %vm1031_vm7, %v1145_v23, %v950_v44 }
 0x11f   : > { %1503 = vmatprep.mubr.bf16.mxu0 %v1185_v30  ;;  %v694_v8 = vpop.permute.xlu1 %693 }
 0x120   : > { %1504 = vmatmul.mubr.bf16.gmra.mrb[32].mxu0 %v1057_v55  ;;  %v985_v61 = vsel %vm965_vm5, %v5064_v37, %v694_v8 }
 0x121   : > { %v888_v42 = vpop.permute.xlu0 %887 }
 0x122   : > { %v1109_v0 = vsel %vm965_vm5, %v5260_v19, %v888_v42 }
 0x123   : > { %v807_v16 = vpop.permute.xlu1 %806 }
 0x124   : > { %v1018_v29 = vsel %vm998_vm6, %v985_v61, %v807_v16 }
 0x125   : > { %v920_v32 = vpop.permute.xlu0 %919 }
 0x126   : > { %v1147_v48 = vsel %vm998_vm6, %v1109_v0, %v920_v32 }
 0x127   : > { %v840_v15 = vpop.permute.xlu1 %839 }
 0x128   : > { %v1060_v35 = vsel %vm1031_vm7, %v1018_v29, %v840_v15 }
 0x129   : > { %v952_v51 = vpop.permute.xlu0 %951 }
 0x12a   : > { %v1188_v56 = vsel %vm1031_vm7, %v1147_v48, %v952_v51 }
 0x12b   : > { %1511 = vmatprep.mubr.bf16.mxu0 %v1188_v56  ;;  %v696_v59 = vpop.permute.xlu1 %695 }
 0x12c   : > { %1512 = vmatmul.mubr.bf16.gmra.mrb[36].mxu0 %v1060_v35  ;;  %v987_v37 = vsel %vm965_vm5, %v5078_v45, %v696_v59  ;;  %v5477_v45 = vpop.f32.mrb[0].mxu1 }
 0x12d   : > { %v890_v63 = vpop.permute.xlu0 %889  ;;  %v5479_v39 = vpop.f32.mrb[1].mxu1 }
 0x12e   : > { %v1112_v19 = vsel %vm965_vm5, %v5278_v50, %v890_v63  ;;  %v5483_v36 = vpop.f32.mrb[2].mxu1 }
 0x12f   : > { %v809_v3 = vpop.permute.xlu1 %808  ;;  %v5487_v52 = vpop.f32.mrb[3].mxu1 }
 0x130   : > { %v1020_v47 = vsel %vm998_vm6, %v987_v37, %v809_v3  ;;  %v5503_v46 = vpop.f32.mrb[4].mxu1 }
 0x131   : > { %v922_v20 = vpop.permute.xlu0 %921  ;;  %v5505_v6 = vpop.f32.mrb[5].mxu1 }
 0x132   : > { %v1149_v43 = vsel %vm998_vm6, %v1112_v19, %v922_v20  ;;  %v5507_v24 = vpop.f32.mrb[6].mxu1 }
 0x133   : > { %v842_v5 = vpop.permute.xlu1 %841  ;;  %v5509_v53 = vpop.f32.mrb[7].mxu1 }
 0x134   : > { %v1063_v58 = vsel %vm1031_vm7, %v1020_v47, %v842_v5  ;;  %v5515_v55 = vpop.f32.mrb[8].mxu1 }
 0x135   : > { %v954_v14 = vpop.permute.xlu0 %953  ;;  %v5518_v8 = vpop.f32.mrb[9].mxu1 }
 0x136   : > { %v1191_v9 = vsel %vm1031_vm7, %v1149_v43, %v954_v14  ;;  %v5521_v0 = vpop.f32.mrb[10].mxu1 }
 0x137   : > { %1519 = vmatprep.mubr.bf16.mxu0 %v1191_v9  ;;  %v698_v49 = vpop.permute.xlu1 %697 }
 0x138   : > { %1520 = vmatmul.mubr.bf16.gmra.mrb[40].mxu0 %v1063_v58  ;;  %v989_v50 = vsel %vm965_vm5, %v5113_v17, %v698_v49 }
 0x139   : > { %v892_v25 = vpop.permute.xlu0 %891 }
 0x13a   : > { %v1115_v33 = vsel %vm965_vm5, %v5296_v31, %v892_v25 }
 0x13b   : > { %v811_v11 = vpop.permute.xlu1 %810 }
 0x13c   : > { %v1022_v4 = vsel %vm998_vm6, %v989_v50, %v811_v11 }
 0x13d   : > { %v924_v28 = vpop.permute.xlu0 %923 }
 0x13e   : > { %v1151_v17 = vsel %vm998_vm6, %v1115_v33, %v924_v28 }
 0x13f   : > { %v844_v57 = vpop.permute.xlu1 %843 }
 0x140   : > { %v1066_v41 = vsel %vm1031_vm7, %v1022_v4, %v844_v57 }
 0x141   : > { %v956_v54 = vpop.permute.xlu0 %955 }
 0x142   : > { %v1194_v31 = vsel %vm1031_vm7, %v1151_v17, %v956_v54 }
 0x143   : > { %1527 = vmatprep.mubr.bf16.mxu0 %v1194_v31  ;;  %v700_v26 = vpop.permute.xlu1 %699 }
 0x144   : > { %1528 = vmatmul.mubr.bf16.gmra.mrb[44].mxu0 %v1066_v41  ;;  %v991_v23 = vsel %vm965_vm5, %v5123_v27, %v700_v26  ;;  %v5524_v27 = vpop.f32.mrb[11].mxu1 }
 0x145   : > { %v894_v38 = vpop.permute.xlu0 %893 }
 0x146   : > { %v1118_v7 = vsel %vm965_vm5, %v5327_v12, %v894_v38 }
 0x147   : > { %v813_v30 = vpop.permute.xlu1 %812 }
 0x148   : > { %v1024_v42 = vsel %vm998_vm6, %v991_v23, %v813_v30 }
 0x149   : > { %v926_v44 = vpop.permute.xlu0 %925 }
 0x14a   : > { %v1153_v61 = vsel %vm998_vm6, %v1118_v7, %v926_v44 }
 0x14b   : > { %v846_v16 = vpop.permute.xlu1 %845 }
 0x14c   : > { %v1069_v12 = vsel %vm1031_vm7, %v1024_v42, %v846_v16 }
 0x14d   : > { %v958_v32 = vpop.permute.xlu0 %957 }
 0x14e   : > { %v1197_v29 = vsel %vm1031_vm7, %v1153_v61, %v958_v32 }
 0x14f   : > { %1535 = vmatprep.mubr.bf16.mxu0 %v1197_v29  ;;  %v702_v51 = vpop.permute.xlu1 %701 }
 0x150   : > { %1536 = vmatmul.mubr.bf16.gmra.mrb[48].mxu0 %v1069_v12  ;;  %v993_v15 = vsel %vm965_vm5, %v5159_v60, %v702_v51  ;;  %v5535_v60 = vpop.f32.mrb[12].mxu1  ;;  %v4482_v51 = vld [vmem:[%s6830_s3] sm:$0xff]  }
 0x151   : > { %v896_v48 = vpop.permute.xlu0 %895  ;;  %v5539_v9 = vpop.f32.mrb[13].mxu1 }
 0x152   : > { %v1121_v35 = vsel %vm965_vm5, %v5358_v18, %v896_v48  ;;  %v5543_v49 = vpop.f32.mrb[14].mxu1  ;;  %v4481_v48 = vld [vmem:[%s6830_s3 + $0x40] sm:$0xff]  }
 0x153   : > { %v815_v63 = vpop.permute.xlu1 %814  ;;  %v5545_v50 = vpop.f32.mrb[15].mxu1  ;;  %4200 = vmatprep.subr.bf16.mxu1 %v4481_v48  ;;  %v4492_v48 = vld [vmem:[%s6830_s3 + $0x28] sm:$0xff]  }
 0x154   : > { %v1026_v59 = vsel %vm998_vm6, %v993_v15, %v815_v63  ;;  %v5565_v30 = vpop.f32.mrb[16].mxu1  ;;  %4201 = vmatpush3.bf16.msra.mxu1 %v4482_v51  ;;  %v4483_v15 = vld [vmem:[%s6830_s3 + $0x48] sm:$0xff]   ;;  %v4485_v63 = vld [vmem:[%s6830_s3 + $0x50] sm:$0xff]  }
 0x155   : > { %v928_v56 = vpop.permute.xlu0 %927  ;;  %v5567_v42 = vpop.f32.mrb[17].mxu1  ;;  %4202 = vmatprep.subr.bf16.mxu1 %v4483_v15 }
 0x156   : > { %v1155_v37 = vsel %vm998_vm6, %v1121_v35, %v928_v56  ;;  %v4484_v56 = vld [vmem:[%s6830_s3 + $0x8] sm:$0xff]  }
 0x157   : > { %v848_v19 = vpop.permute.xlu1 %847 }
 0x158   : > { %v1072_v47 = vsel %vm1031_vm7, %v1026_v59, %v848_v19  ;;  %4203 = vmatpush3.bf16.msra.mxu1 %v4484_v56 }
 0x159   : > { %v960_v20 = vpop.permute.xlu0 %959  ;;  %4204 = vmatprep.subr.bf16.mxu1 %v4485_v63 }
 0x15a   : > { %v1200_v3 = vsel %vm1031_vm7, %v1155_v37, %v960_v20  ;;  %v5599_v37 = vld [vmem:[%s6829_s2] ss:$0 sm:$0xff]  ;;  %v4486_v20 = vld [vmem:[%s6830_s3 + $0x10] sm:$0xff]  }
 0x15b   : > { %1543 = vmatprep.mubr.bf16.mxu0 %v1200_v3  ;;  %v704_v14 = vpop.permute.xlu1 %703 }
 0x15c   : > { %1544 = vmatmul.mubr.bf16.gmra.mrb[52].mxu0 %v1072_v47  ;;  %v995_v18 = vsel %vm965_vm5, %v5164_v62, %v704_v14  ;;  %4205 = vmatpush3.bf16.msra.mxu1 %v4486_v20 }
 0x15d   : > { %v898_v43 = vpop.permute.xlu0 %897 }
 0x15e   : > { %v1124_v58 = vsel %vm965_vm5, %v5385_v22, %v898_v43 }
 0x15f   : > { %v817_v25 = vpop.permute.xlu1 %816 }
 0x160   : > { %v1028_v28 = vsel %vm998_vm6, %v995_v18, %v817_v25  ;;  %v4487_v18 = vld [vmem:[%s6830_s3 + $0x58] sm:$0xff]  }
 0x161   : > { %v930_v5 = vpop.permute.xlu0 %929  ;;  %4206 = vmatprep.subr.bf16.mxu1 %v4487_v18 }
 0x162   : > { %v1157_v33 = vsel %vm998_vm6, %v1124_v58, %v930_v5  ;;  %v4488_v5 = vld [vmem:[%s6830_s3 + $0x18] sm:$0xff]  }
 0x163   : > { %v850_v4 = vpop.permute.xlu1 %849  ;;  %4207 = vmatpush3.bf16.msra.mxu1 %v4488_v5 }
 0x164   : > { %v1075_v62 = vsel %vm1031_vm7, %v1028_v28, %v850_v4 }
 0x165   : > { %v962_v11 = vpop.permute.xlu0 %961 }
 0x166   : > { %v1203_v17 = vsel %vm1031_vm7, %v1157_v33, %v962_v11  ;;  %v4489_v11 = vld [vmem:[%s6830_s3 + $0x60] sm:$0xff]  }
 0x167   : > { %1551 = vmatprep.mubr.bf16.mxu0 %v1203_v17  ;;  %v706_v57 = vpop.permute.xlu1 %705  ;;  %4208 = vmatprep.subr.bf16.mxu1 %v4489_v11 }
 0x168   : > { %1552 = vmatmul.mubr.bf16.gmra.mrb[56].mxu0 %v1075_v62  ;;  %v997_v22 = vsel %vm965_vm5, %v5198_v13, %v706_v57  ;;  %v4490_v62 = vld [vmem:[%s6830_s3 + $0x20] sm:$0xff]  }
 0x169   : > { %v900_v54 = vpop.permute.xlu0 %899  ;;  %4209 = vmatpush3.bf16.msra.mxu1 %v4490_v62 }
 0x16a   : > { %v1127_v34 = vsel %vm965_vm5, %v5411_v1, %v900_v54  ;;  %v5569_v1 = vpop.f32.mrb[18].mxu1 }
 0x16b   : > { %v819_v41 = vpop.permute.xlu1 %818  ;;  %v5571_v61 = vpop.f32.mrb[19].mxu1 }
 0x16c   : > { %v1030_v38 = vsel %vm998_vm6, %v997_v22, %v819_v41  ;;  %v5573_v32 = vpop.f32.mrb[20].mxu1 }
 0x16d   : > { %v5553_v31 = vpop.permute.xlu0 %931  ;;  %v5575_v16 = vpop.f32.mrb[21].mxu1 }
 0x16e   : > { %v1159_v26 = vsel %vm998_vm6, %v1127_v34, %v5553_v31  ;;  %v5577_v29 = vpop.f32.mrb[22].mxu1 }
 0x16f   : > { %v852_v44 = vpop.permute.xlu1 %851  ;;  %v5579_v12 = vpop.f32.mrb[23].mxu1 }
 0x170   : > { %v1078_v13 = vsel %vm1031_vm7, %v1030_v38, %v852_v44  ;;  %v5617_v17 = vpop.f32.mrb[24].mxu1 }
 0x171   : > { %v5560_v23 = vpop.permute.xlu0 %963  ;;  %v5622_v34 = vpop.f32.mrb[25].mxu1 }
 0x172   : > { %v1206_v7 = vsel %vm1031_vm7, %v1159_v26, %v5560_v23  ;;  %v5624_v41 = vpop.f32.mrb[26].mxu1 }
 0x173   : > { %1559 = vmatprep.mubr.bf16.mxu0 %v1206_v7  ;;  %v5627_v7 = vpop.f32.mrb[27].mxu1 }
 0x174   : > { %1560 = vmatmul.mubr.bf16.gmra.mrb[60].mxu0 %v1078_v13  ;;  %v4491_v13 = vld [vmem:[%s6830_s3 + $0x68] sm:$0xff]  }
 0x175   : > { %4210 = vmatprep.subr.bf16.mxu1 %v4491_v13 }
 0x176   : > { %4211 = vmatpush3.bf16.msra.mxu1 %v4492_v48 }
 0x19f   : > { %v4086_v35 = vpop.f32.mrb[0].mxu0 }
 0x1a0   : > { %v4087_v59 = vpop.f32.mrb[1].mxu0 }
 0x1a1   : > { %v4088_v19 = vadd.f32 %v4087_v59, %v4086_v35  ;;  %v4089_v3 = vpop.f32.mrb[2].mxu0 }
 0x1a2   : > { %v4090_v47 = vpop.f32.mrb[3].mxu0 }
 0x1a3   : > { %v4091_v43 = vadd.f32 %v4090_v47, %v4089_v3  ;;  %v1442_v14 = vadd.f32 %v4088_v19, %v5599_v37  ;;  %v4493_v19 = vld [vmem:[%s6830_s3 + $0x70] sm:$0xff]  }
 0x1a4   : > { %4212 = vmatprep.subr.bf16.mxu1 %v4493_v19 }
 0x1a5   : > { %v1603_v58 = vadd.f32 %v5479_v39, %v1442_v14  ;;  %v1445_v25 = vadd.f32 %v4091_v43, %v5599_v37  ;;  %v4494_v43 = vld [vmem:[%s6830_s3 + $0x30] sm:$0xff]  }
 0x1a6   : > { %4213 = vmatpush3.bf16.msra.mxu1 %v4494_v43 }
 0x1a7   : > { %v1606_v28 = vadd.f32 %v5487_v52, %v1445_v25  ;;  %v4092_v33 = vpop.f32.mrb[4].mxu0  ;;  %v1729_v54 = vmax.f32 %v1603_v58, 0.0 }
 0x1a8   : > { %v4093_v4 = vpop.f32.mrb[5].mxu0 }
 0x1a9   : > { %v1730_v39 = vmax.f32 %v1606_v28, 0.0  ;;  %v4094_v57 = vadd.f32 %v4093_v4, %v4092_v33  ;;  %v4095_v22 = vpop.f32.mrb[6].mxu0  ;;  %v4495_v4 = vld [vmem:[%s6830_s3 + $0x78] sm:$0xff]  }
 0x1aa   : > { %v4096_v52 = vpop.f32.mrb[7].mxu0  ;;  %4214 = vmatprep.subr.bf16.mxu1 %v4495_v4 }
 0x1ab   : > { %v1761_v38 = vpack.c.bf16 %v1730_v39, %v1729_v54  ;;  %v1450_v26 = vadd.f32 %v4094_v57, %v5599_v37  ;;  %v4097_v44 = vadd.f32 %v4096_v52, %v4095_v22  ;;  %v4496_v22 = vld [vmem:[%s6830_s3 + $0x38] sm:$0xff]  }
 0x1ac   : > { %4215 = vmatpush3.bf16.msra.mxu1 %v4496_v22 }
 0x1ad   : > { %v1778_v51 = vshrl.u32 %v1761_v38, 16  ;;  %v1611_v15 = vadd.f32 %v5477_v45, %v1450_v26  ;;  %v1453_v56 = vadd.f32 %v4097_v44, %v5599_v37  ;;  %v1781_v63 = vshll.u32 %v1761_v38, 16  ;;  %4402 = vmatprep.subr.bf16.mxu1 %v5492_v21 }
 0x1af   : > { %v1780_v35 = vrot.slane %v1778_v51, 7  ;;  %v1614_v59 = vadd.f32 %v5483_v36, %v1453_v56  ;;  %v4098_v20 = vpop.f32.mrb[8].mxu0  ;;  %v1731_v3 = vmax.f32 %v1611_v15, 0.0 }
 0x1b0   : > { %v4099_v47 = vpop.f32.mrb[9].mxu0 }
 0x1b1   : > { %v1783_v45 = vor.u32 %v1781_v63, %v1780_v35  ;;  %v1732_v14 = vmax.f32 %v1614_v59, 0.0  ;;  %v4100_v18 = vadd.f32 %v4099_v47, %v4098_v20  ;;  %v4101_v5 = vpop.f32.mrb[10].mxu0  ;;  %v1937_v58 = vsel %vm4785_vm2, %v1780_v35, 0 }
 0x1b2   : > { %v4102_v36 = vpop.f32.mrb[11].mxu0  ;;  %v1961_v62 = vshll.u32 %v1937_v58, 16  ;;  %v2194_v39 = vrot.slane %v1937_v58, 1 }
 0x1b3   : > { %v1762_v25 = vpack.c.bf16 %v1732_v14, %v1731_v3  ;;  %v4103_v28 = vadd.f32 %v4102_v36, %v4101_v5  ;;  %v1458_v33 = vadd.f32 %v4100_v18, %v5599_v37  ;;  %v5649_v11 = vsel %vm4785_vm2, 0, %v1783_v45 }
 0x1b4   : > { %2269 = vrot.lane.b32.xlu1 %v5649_v11, %s4636_s13  ;;  %v2193_v54 = vrot.slane %v5649_v11, 1  ;;  %v1956_v57 = vshll.u32 %v5649_v11, 16  ;;  %v1954_v13 = vshrl.u32 %v5649_v11, 16  ;;  %v1963_v20 = vrot.slane %v1961_v62, 1 }
 0x1b5   : > { %v1785_v52 = vshrl.u32 %v1762_v25, 16  ;;  %v1619_v38 = vadd.f32 %v5505_v6, %v1458_v33  ;;  %v1461_v26 = vadd.f32 %v4103_v28, %v5599_v37  ;;  %v1788_v15 = vshll.u32 %v1762_v25, 16 }
 0x1b6   : > { %v2195_v44 = vsel %vm739_vm3, %v2193_v54, %v2194_v39  ;;  %v1958_v48 = vrot.slane %v1956_v57, 1 }
 0x1b7   : > { %v1787_v51 = vrot.slane %v1785_v52, 7  ;;  %v1622_v56 = vadd.f32 %v5509_v53, %v1461_v26  ;;  %v4104_v35 = vpop.f32.mrb[12].mxu0  ;;  %2317 = vrot.lane.b32.xlu0 %v2195_v44, %s4635_s12  ;;  %v1733_v63 = vmax.f32 %v1619_v38, 0.0 }
 0x1b8   : > { %v4105_v6 = vpop.f32.mrb[13].mxu0  ;;  %2238 = vrot.lane.b32.xlu1 %v2195_v44, %s4634_s29  ;;  %v1959_v59 = vor.u32 %v1958_v48, %v1954_v13  ;;  %v5692_v13 = vpop.f32.mrb[28].mxu1 }
 0x1b9   : > { %v1790_v19 = vor.u32 %v1788_v15, %v1787_v51  ;;  %v1734_v3 = vmax.f32 %v1622_v56, 0.0  ;;  %v4106_v47 = vadd.f32 %v4105_v6, %v4104_v35  ;;  %v4107_v43 = vpop.f32.mrb[14].mxu0  ;;  %v1938_v45 = vsel %vm4785_vm2, %v1787_v51, 0  ;;  %v5696_v35 = vpop.f32.mrb[29].mxu1 }
 0x1ba   : > { %v4108_v14 = vpop.f32.mrb[15].mxu0  ;;  %v5672_v53 = vsel %vm482_vm4, %v1959_v59, %v1963_v20  ;;  %v2197_v25 = vrot.slane %v1938_v45, 1  ;;  %v1973_v33 = vshll.u32 %v1938_v45, 16 }
 0x1bb   : > { %v5676_v21 = vsel %vm4785_vm2, 0, %v1790_v19  ;;  %v1763_v18 = vpack.c.bf16 %v1734_v3, %v1733_v63  ;;  %v1466_v5 = vadd.f32 %v4106_v47, %v5599_v37  ;;  %v4109_v58 = vadd.f32 %v4108_v14, %v4107_v43  ;;  %v5701_v63 = vpop.f32.mrb[30].mxu1 }
 0x1bc   : > { %2133 = vrot.lane.b32.xlu1 %v5672_v53, %s4635_s12  ;;  %v2196_v36 = vrot.slane %v5676_v21, 1  ;;  %v1968_v28 = vshll.u32 %v5676_v21, 16  ;;  %v1966_v57 = vshrl.u32 %v5676_v21, 16  ;;  %v5709_v19 = vpop.f32.mrb[31].mxu1 }
 0x1bd   : > { %v1792_v4 = vshrl.u32 %v1763_v18, 16  ;;  %v1627_v62 = vadd.f32 %v5503_v46, %v1466_v5  ;;  %v1469_v54 = vadd.f32 %v4109_v58, %v5599_v37  ;;  %v1795_v38 = vshll.u32 %v1763_v18, 16 }
 0x1be   : > { %v2198_v39 = vsel %vm739_vm3, %v2196_v36, %v2197_v25  ;;  %v1970_v22 = vrot.slane %v1968_v28, 1  ;;  %v1975_v46 = vrot.slane %v1973_v33, 1 }
 0x1bf   : > { %v1794_v52 = vrot.slane %v1792_v4, 7  ;;  %v1630_v26 = vadd.f32 %v5507_v24, %v1469_v54  ;;  %4370 = vmatprep.mubr.msk.bf16.mxu0 %vm965_vm5, %v2198_v39  ;;  %2319 = vrot.lane.b32.xlu0 %v2198_v39, %s4635_s12  ;;  %v1735_v15 = vmax.f32 %v1627_v62, 0.0 }
 0x1c0   : > { %2349 = vrot.lane.b32.xlu1 %v5676_v21, %s4634_s29  ;;  %v1971_v44 = vor.u32 %v1970_v22, %v1966_v57 }
 0x1c1   : > { %v1797_v48 = vor.u32 %v1795_v38, %v1794_v52  ;;  %v1939_v51 = vsel %vm4785_vm2, %v1794_v52, 0  ;;  %v1736_v56 = vmax.f32 %v1630_v26, 0.0 }
 0x1c2   : > { %v5699_v24 = vsel %vm482_vm4, %v1971_v44, %v1975_v46  ;;  %v2200_v3 = vrot.slane %v1939_v51, 1  ;;  %v1985_v57 = vshll.u32 %v1939_v51, 16 }
 0x1c3   : > { %v5705_v6 = vsel %vm4785_vm2, 0, %v1797_v48  ;;  %v1764_v59 = vpack.c.bf16 %v1736_v56, %v1735_v15  ;;  %v4110_v20 = vpop.f32.mrb[16].mxu0  ;;  %2379 = vrot.lane.b32.xlu0 %v5699_v24, %s4636_s13 }
 0x1c4   : > { %v4111_v47 = vpop.f32.mrb[17].mxu0  ;;  %2271 = vrot.lane.b32.xlu1 %v5676_v21, %s4636_s13  ;;  %v2199_v43 = vrot.slane %v5705_v6, 1  ;;  %v1980_v45 = vshll.u32 %v5705_v6, 16  ;;  %v1978_v54 = vshrl.u32 %v5705_v6, 16  ;;  %v1987_v51 = vrot.slane %v1985_v57, 1 }
 0x1c5   : > { %v1799_v14 = vshrl.u32 %v1764_v59, 16  ;;  %v4112_v18 = vadd.f32 %v4111_v47, %v4110_v20  ;;  %v4113_v5 = vpop.f32.mrb[18].mxu0  ;;  %v1802_v33 = vshll.u32 %v1764_v59, 16 }
 0x1c6   : > { %v4114_v58 = vpop.f32.mrb[19].mxu0  ;;  %v2201_v36 = vsel %vm739_vm3, %v2199_v43, %v2200_v3  ;;  %v1982_v25 = vrot.slane %v1980_v45, 1 }
 0x1c7   : > { %v1801_v28 = vrot.slane %v1799_v14, 7  ;;  %v4115_v4 = vadd.f32 %v4114_v58, %v4113_v5  ;;  %4371 = vmatmul.mubr.msk.bf16.vlgmr.msra.gmra.mrb[64].mxu0 %vm965_vm5, %v2201_v36  ;;  %2351 = vrot.lane.b32.xlu0 %v5705_v6, %s4634_s29  ;;  %v1474_v62 = vadd.f32 %v4112_v18, %v5599_v37 }
 0x1c8   : > { %2240 = vrot.lane.b32.xlu1 %v2198_v39, %s4634_s29  ;;  %v1983_v44 = vor.u32 %v1982_v25, %v1978_v54 }
 0x1c9   : > { %v1804_v22 = vor.u32 %v1802_v33, %v1801_v28  ;;  %v1635_v52 = vadd.f32 %v5518_v8, %v1474_v62  ;;  %v1477_v38 = vadd.f32 %v4115_v4, %v5599_v37  ;;  %v1940_v26 = vsel %vm4785_vm2, %v1801_v28, 0 }
 0x1ca   : > { %v2203_v8 = vrot.slane %v1940_v26, 1  ;;  %v5737_v20 = vsel %vm482_vm4, %v1983_v44, %v1987_v51  ;;  %v1997_v54 = vshll.u32 %v1940_v26, 16 }
 0x1cb   : > { %v5728_v46 = vsel %vm4785_vm2, 0, %v1804_v22  ;;  %v1638_v48 = vadd.f32 %v5524_v27, %v1477_v38  ;;  %2321 = vrot.lane.b32.xlu0 %v2201_v36, %s4635_s12  ;;  %v1737_v15 = vmax.f32 %v1635_v52, 0.0 }
 0x1cc   : > { %2135 = vrot.lane.b32.xlu1 %v5699_v24, %s4635_s12  ;;  %v2202_v39 = vrot.slane %v5728_v46, 1  ;;  %v1992_v3 = vshll.u32 %v5728_v46, 16  ;;  %v1990_v62 = vshrl.u32 %v5728_v46, 16 }
 0x1cd   : > { %v1738_v56 = vmax.f32 %v1638_v48, 0.0 }
 0x1ce   : > { %v2204_v59 = vsel %vm739_vm3, %v2202_v39, %v2203_v8  ;;  %v1994_v58 = vrot.slane %v1992_v3, 1  ;;  %v1999_v8 = vrot.slane %v1997_v54, 1 }
 0x1cf   : > { %v1765_v47 = vpack.c.bf16 %v1738_v56, %v1737_v15  ;;  %v4116_v27 = vpop.f32.mrb[20].mxu0  ;;  %4374 = vmatprep.mubr.msk.bf16.mxu0 %vm965_vm5, %v2204_v59  ;;  %2381 = vrot.lane.b32.xlu0 %v5737_v20, %s4636_s13 }
 0x1d0   : > { %v4117_v43 = vpop.f32.mrb[21].mxu0  ;;  %2273 = vrot.lane.b32.xlu1 %v5705_v6, %s4636_s13  ;;  %v1995_v44 = vor.u32 %v1994_v58, %v1990_v62 }
 0x1d1   : > { %v1806_v45 = vshrl.u32 %v1765_v47, 16  ;;  %v4118_v14 = vadd.f32 %v4117_v43, %v4116_v27  ;;  %v4119_v18 = vpop.f32.mrb[22].mxu0  ;;  %v1809_v28 = vshll.u32 %v1765_v47, 16 }
 0x1d2   : > { %v4120_v5 = vpop.f32.mrb[23].mxu0  ;;  %v5765_v56 = vsel %vm482_vm4, %v1995_v44, %v1999_v8 }
 0x1d3   : > { %v1808_v25 = vrot.slane %v1806_v45, 7  ;;  %v1482_v33 = vadd.f32 %v4118_v14, %v5599_v37  ;;  %v4121_v4 = vadd.f32 %v4120_v5, %v4119_v18  ;;  %2353 = vrot.lane.b32.xlu0 %v5728_v46, %s4634_s29 }
 0x1d4   : > { %2242 = vrot.lane.b32.xlu1 %v2201_v36, %s4634_s29 }
 0x1d5   : > { %v1811_v57 = vor.u32 %v1809_v28, %v1808_v25  ;;  %v1941_v22 = vsel %vm4785_vm2, %v1808_v25, 0  ;;  %v1643_v52 = vadd.f32 %v5515_v55, %v1482_v33  ;;  %v1485_v38 = vadd.f32 %v4121_v4, %v5599_v37 }
 0x1d6   : > { %v2206_v26 = vrot.slane %v1941_v22, 1  ;;  %v2009_v62 = vshll.u32 %v1941_v22, 16 }
 0x1d7   : > { %v5756_v48 = vsel %vm4785_vm2, 0, %v1811_v57  ;;  %v1646_v39 = vadd.f32 %v5521_v0, %v1485_v38  ;;  %2323 = vrot.lane.b32.xlu0 %v2204_v59, %s4635_s12  ;;  %v1739_v51 = vmax.f32 %v1643_v52, 0.0 }
 0x1d8   : > { %2137 = vrot.lane.b32.xlu1 %v5737_v20, %s4635_s12  ;;  %v2205_v36 = vrot.slane %v5756_v48, 1  ;;  %v2004_v3 = vshll.u32 %v5756_v48, 16  ;;  %v2002_v4 = vshrl.u32 %v5756_v48, 16  ;;  %v2011_v22 = vrot.slane %v2009_v62, 1 }
 0x1d9   : > { %v1740_v55 = vmax.f32 %v1646_v39, 0.0 }
 0x1da   : > { %v2207_v15 = vsel %vm739_vm3, %v2205_v36, %v2206_v26  ;;  %v2006_v5 = vrot.slane %v2004_v3, 1 }
 0x1db   : > { %v1766_v47 = vpack.c.bf16 %v1740_v55, %v1739_v51  ;;  %v4122_v0 = vpop.f32.mrb[24].mxu0  ;;  %4375 = vmatmul.mubr.msk.bf16.gmra.mrb[68].mxu0 %vm965_vm5, %v2207_v15  ;;  %2383 = vrot.lane.b32.xlu0 %v5765_v56, %s4636_s13 }
 0x1dc   : > { %v4123_v27 = vpop.f32.mrb[25].mxu0  ;;  %2275 = vrot.lane.b32.xlu1 %v5728_v46, %s4636_s13  ;;  %v2007_v44 = vor.u32 %v2006_v5, %v2002_v4 }
 0x1dd   : > { %v1813_v43 = vshrl.u32 %v1766_v47, 16  ;;  %v4124_v45 = vadd.f32 %v4123_v27, %v4122_v0  ;;  %v4125_v14 = vpop.f32.mrb[26].mxu0  ;;  %v1816_v25 = vshll.u32 %v1766_v47, 16 }
 0x1de   : > { %v4126_v18 = vpop.f32.mrb[27].mxu0  ;;  %v5793_v55 = vsel %vm482_vm4, %v2007_v44, %v2011_v22 }
 0x1df   : > { %v1815_v58 = vrot.slane %v1813_v43, 7  ;;  %v4127_v28 = vadd.f32 %v4126_v18, %v4125_v14  ;;  %2355 = vrot.lane.b32.xlu0 %v5756_v48, %s4634_s29  ;;  %v1490_v33 = vadd.f32 %v4124_v45, %v5599_v37 }
 0x1e0   : > { %2244 = vrot.lane.b32.xlu1 %v2204_v59, %s4634_s29 }
 0x1e1   : > { %v1818_v54 = vor.u32 %v1816_v25, %v1815_v58  ;;  %v1651_v57 = vadd.f32 %v5539_v9, %v1490_v33  ;;  %v1493_v52 = vadd.f32 %v4127_v28, %v5599_v37  ;;  %v1942_v38 = vsel %vm4785_vm2, %v1815_v58, 0 }
 0x1e2   : > { %v2209_v9 = vrot.slane %v1942_v38, 1  ;;  %v2021_v4 = vshll.u32 %v1942_v38, 16 }
 0x1e3   : > { %v5784_v39 = vsel %vm4785_vm2, 0, %v1818_v54  ;;  %v1654_v36 = vadd.f32 %v5545_v50, %v1493_v52  ;;  %2325 = vrot.lane.b32.xlu0 %v2207_v15, %s4635_s12  ;;  %v1741_v26 = vmax.f32 %v1651_v57, 0.0 }
 0x1e4   : > { %2139 = vrot.lane.b32.xlu1 %v5765_v56, %s4635_s12  ;;  %v2208_v59 = vrot.slane %v5784_v39, 1  ;;  %v2016_v3 = vshll.u32 %v5784_v39, 16  ;;  %v2014_v33 = vshrl.u32 %v5784_v39, 16 }
 0x1e5   : > { %v1742_v8 = vmax.f32 %v1654_v36, 0.0 }
 0x1e6   : > { %v2210_v51 = vsel %vm739_vm3, %v2208_v59, %v2209_v9  ;;  %v2018_v18 = vrot.slane %v2016_v3, 1  ;;  %v2023_v9 = vrot.slane %v2021_v4, 1 }
 0x1e7   : > { %v1767_v47 = vpack.c.bf16 %v1742_v8, %v1741_v26  ;;  %v4128_v50 = vpop.f32.mrb[28].mxu0  ;;  %4378 = vmatprep.mubr.msk.bf16.mxu0 %vm965_vm5, %v2210_v51  ;;  %2385 = vrot.lane.b32.xlu0 %v5793_v55, %s4636_s13 }
 0x1e8   : > { %v4129_v0 = vpop.f32.mrb[29].mxu0  ;;  %2277 = vrot.lane.b32.xlu1 %v5756_v48, %s4636_s13  ;;  %v2019_v44 = vor.u32 %v2018_v18, %v2014_v33 }
 0x1e9   : > { %v1820_v27 = vshrl.u32 %v1767_v47, 16  ;;  %v4130_v43 = vadd.f32 %v4129_v0, %v4128_v50  ;;  %v4131_v45 = vpop.f32.mrb[30].mxu0  ;;  %v1823_v58 = vshll.u32 %v1767_v47, 16 }
 0x1ea   : > { %v4132_v14 = vpop.f32.mrb[31].mxu0  ;;  %v5821_v8 = vsel %vm482_vm4, %v2019_v44, %v2023_v9 }
 0x1eb   : > { %v1822_v5 = vrot.slane %v1820_v27, 7  ;;  %v1498_v25 = vadd.f32 %v4130_v43, %v5599_v37  ;;  %v4133_v28 = vadd.f32 %v4132_v14, %v4131_v45  ;;  %2357 = vrot.lane.b32.xlu0 %v5784_v39, %s4634_s29 }
 0x1ec   : > { %2246 = vrot.lane.b32.xlu1 %v2207_v15, %s4634_s29 }
 0x1ed   : > { %v1825_v62 = vor.u32 %v1823_v58, %v1822_v5  ;;  %v1943_v54 = vsel %vm4785_vm2, %v1822_v5, 0  ;;  %v1659_v57 = vadd.f32 %v5535_v60, %v1498_v25  ;;  %v1501_v52 = vadd.f32 %v4133_v28, %v5599_v37 }
 0x1ee   : > { %v2212_v38 = vrot.slane %v1943_v54, 1  ;;  %v2033_v33 = vshll.u32 %v1943_v54, 16 }
 0x1ef   : > { %v5812_v36 = vsel %vm4785_vm2, 0, %v1825_v62  ;;  %v1662_v59 = vadd.f32 %v5543_v49, %v1501_v52  ;;  %2327 = vrot.lane.b32.xlu0 %v2210_v51, %s4635_s12  ;;  %v1743_v22 = vmax.f32 %v1659_v57, 0.0 }
 0x1f0   : > { %2141 = vrot.lane.b32.xlu1 %v5793_v55, %s4635_s12  ;;  %v2211_v15 = vrot.slane %v5812_v36, 1  ;;  %v2028_v3 = vshll.u32 %v5812_v36, 16  ;;  %v2026_v28 = vshrl.u32 %v5812_v36, 16  ;;  %v2035_v54 = vrot.slane %v2033_v33, 1 }
 0x1f1   : > { %v1744_v60 = vmax.f32 %v1662_v59, 0.0 }
 0x1f2   : > { %v2213_v26 = vsel %vm739_vm3, %v2211_v15, %v2212_v38  ;;  %v2030_v14 = vrot.slane %v2028_v3, 1 }
 0x1f3   : > { %v1768_v47 = vpack.c.bf16 %v1744_v60, %v1743_v22  ;;  %v4134_v49 = vpop.f32.mrb[32].mxu0  ;;  %4379 = vmatmul.mubr.msk.bf16.gmra.mrb[72].mxu0 %vm965_vm5, %v2213_v26  ;;  %2387 = vrot.lane.b32.xlu0 %v5821_v8, %s4636_s13 }
 0x1f4   : > { %v4135_v50 = vpop.f32.mrb[33].mxu0  ;;  %2279 = vrot.lane.b32.xlu1 %v5784_v39, %s4636_s13  ;;  %v2031_v44 = vor.u32 %v2030_v14, %v2026_v28 }
 0x1f5   : > { %v1827_v0 = vshrl.u32 %v1768_v47, 16  ;;  %v4136_v27 = vadd.f32 %v4135_v50, %v4134_v49  ;;  %v4137_v43 = vpop.f32.mrb[34].mxu0  ;;  %v1830_v5 = vshll.u32 %v1768_v47, 16 }
 0x1f6   : > { %v4138_v45 = vpop.f32.mrb[35].mxu0  ;;  %v5849_v60 = vsel %vm482_vm4, %v2031_v44, %v2035_v54 }
 0x1f7   : > { %v1829_v18 = vrot.slane %v1827_v0, 7  ;;  %v4139_v58 = vadd.f32 %v4138_v45, %v4137_v43  ;;  %2359 = vrot.lane.b32.xlu0 %v5812_v36, %s4634_s29  ;;  %v1506_v25 = vadd.f32 %v4136_v27, %v5599_v37 }
 0x1f8   : > { %2248 = vrot.lane.b32.xlu1 %v2210_v51, %s4634_s29 }
 0x1f9   : > { %v1832_v4 = vor.u32 %v1830_v5, %v1829_v18  ;;  %v1667_v62 = vadd.f32 %v5567_v42, %v1506_v25  ;;  %v1509_v57 = vadd.f32 %v4139_v58, %v5599_v37  ;;  %v1944_v52 = vsel %vm4785_vm2, %v1829_v18, 0 }
 0x1fa   : > { %v2215_v42 = vrot.slane %v1944_v52, 1  ;;  %v2045_v28 = vshll.u32 %v1944_v52, 16 }
 0x1fb   : > { %v5840_v59 = vsel %vm4785_vm2, 0, %v1832_v4  ;;  %v1670_v15 = vadd.f32 %v5571_v61, %v1509_v57  ;;  %2329 = vrot.lane.b32.xlu0 %v2213_v26, %s4635_s12  ;;  %v1745_v38 = vmax.f32 %v1667_v62, 0.0 }
 0x1fc   : > { %2143 = vrot.lane.b32.xlu1 %v5821_v8, %s4635_s12  ;;  %v2214_v51 = vrot.slane %v5840_v59, 1  ;;  %v2040_v3 = vshll.u32 %v5840_v59, 16  ;;  %v2038_v25 = vshrl.u32 %v5840_v59, 16 }
 0x1fd   : > { %v1746_v9 = vmax.f32 %v1670_v15, 0.0 }
 0x1fe   : > { %v2216_v22 = vsel %vm739_vm3, %v2214_v51, %v2215_v42  ;;  %v2042_v45 = vrot.slane %v2040_v3, 1  ;;  %v2047_v42 = vrot.slane %v2045_v28, 1 }
 0x1ff   : > { %v1769_v47 = vpack.c.bf16 %v1746_v9, %v1745_v38  ;;  %v4140_v61 = vpop.f32.mrb[36].mxu0  ;;  %4382 = vmatprep.mubr.msk.bf16.mxu0 %vm965_vm5, %v2216_v22  ;;  %2389 = vrot.lane.b32.xlu0 %v5849_v60, %s4636_s13 }
 0x200   : > { %v4141_v49 = vpop.f32.mrb[37].mxu0  ;;  %2281 = vrot.lane.b32.xlu1 %v5812_v36, %s4636_s13  ;;  %v2043_v44 = vor.u32 %v2042_v45, %v2038_v25 }
 0x201   : > { %v1834_v50 = vshrl.u32 %v1769_v47, 16  ;;  %v4142_v0 = vadd.f32 %v4141_v49, %v4140_v61  ;;  %v4143_v27 = vpop.f32.mrb[38].mxu0  ;;  %v1837_v18 = vshll.u32 %v1769_v47, 16 }
 0x202   : > { %v4144_v43 = vpop.f32.mrb[39].mxu0  ;;  %v5877_v9 = vsel %vm482_vm4, %v2043_v44, %v2047_v42 }
 0x203   : > { %v1836_v14 = vrot.slane %v1834_v50, 7  ;;  %v1514_v5 = vadd.f32 %v4142_v0, %v5599_v37  ;;  %v4145_v58 = vadd.f32 %v4144_v43, %v4143_v27  ;;  %2361 = vrot.lane.b32.xlu0 %v5840_v59, %s4634_s29 }
 0x204   : > { %2250 = vrot.lane.b32.xlu1 %v2213_v26, %s4634_s29 }
 0x205   : > { %v1839_v33 = vor.u32 %v1837_v18, %v1836_v14  ;;  %v1945_v4 = vsel %vm4785_vm2, %v1836_v14, 0  ;;  %v1675_v62 = vadd.f32 %v5565_v30, %v1514_v5  ;;  %v1517_v57 = vadd.f32 %v4145_v58, %v5599_v37 }
 0x206   : > { %v2218_v52 = vrot.slane %v1945_v4, 1  ;;  %v2057_v25 = vshll.u32 %v1945_v4, 16 }
 0x207   : > { %v5868_v15 = vsel %vm4785_vm2, 0, %v1839_v33  ;;  %v1678_v51 = vadd.f32 %v5569_v1, %v1517_v57  ;;  %2331 = vrot.lane.b32.xlu0 %v2216_v22, %s4635_s12  ;;  %v1747_v54 = vmax.f32 %v1675_v62, 0.0 }
 0x208   : > { %2145 = vrot.lane.b32.xlu1 %v5849_v60, %s4635_s12  ;;  %v2217_v26 = vrot.slane %v5868_v15, 1  ;;  %v2052_v3 = vshll.u32 %v5868_v15, 16  ;;  %v2050_v58 = vshrl.u32 %v5868_v15, 16  ;;  %v2059_v4 = vrot.slane %v2057_v25, 1 }
 0x209   : > { %v1748_v30 = vmax.f32 %v1678_v51, 0.0 }
 0x20a   : > { %v2219_v38 = vsel %vm739_vm3, %v2217_v26, %v2218_v52  ;;  %v2054_v43 = vrot.slane %v2052_v3, 1 }
 0x20b   : > { %v1770_v47 = vpack.c.bf16 %v1748_v30, %v1747_v54  ;;  %v4146_v1 = vpop.f32.mrb[40].mxu0  ;;  %4383 = vmatmul.mubr.msk.bf16.gmra.mrb[76].mxu0 %vm965_vm5, %v2219_v38  ;;  %2391 = vrot.lane.b32.xlu0 %v5877_v9, %s4636_s13 }
 0x20c   : > { %v4147_v61 = vpop.f32.mrb[41].mxu0  ;;  %2283 = vrot.lane.b32.xlu1 %v5840_v59, %s4636_s13  ;;  %v2055_v44 = vor.u32 %v2054_v43, %v2050_v58 }
 0x20d   : > { %v1841_v49 = vshrl.u32 %v1770_v47, 16  ;;  %v4148_v50 = vadd.f32 %v4147_v61, %v4146_v1  ;;  %v4149_v0 = vpop.f32.mrb[42].mxu0  ;;  %v1844_v14 = vshll.u32 %v1770_v47, 16 }
 0x20e   : > { %v4150_v27 = vpop.f32.mrb[43].mxu0  ;;  %v5905_v30 = vsel %vm482_vm4, %v2055_v44, %v2059_v4 }
 0x20f   : > { %v1843_v45 = vrot.slane %v1841_v49, 7  ;;  %v4151_v18 = vadd.f32 %v4150_v27, %v4149_v0  ;;  %2363 = vrot.lane.b32.xlu0 %v5868_v15, %s4634_s29  ;;  %v1522_v5 = vadd.f32 %v4148_v50, %v5599_v37 }
 0x210   : > { %2252 = vrot.lane.b32.xlu1 %v2216_v22, %s4634_s29 }
 0x211   : > { %v1846_v28 = vor.u32 %v1844_v14, %v1843_v45  ;;  %v1683_v33 = vadd.f32 %v5575_v16, %v1522_v5  ;;  %v1525_v62 = vadd.f32 %v4151_v18, %v5599_v37  ;;  %v1946_v57 = vsel %vm4785_vm2, %v1843_v45, 0 }
 0x212   : > { %v2221_v16 = vrot.slane %v1946_v57, 1  ;;  %v2069_v58 = vshll.u32 %v1946_v57, 16 }
 0x213   : > { %v5896_v51 = vsel %vm4785_vm2, 0, %v1846_v28  ;;  %v1686_v26 = vadd.f32 %v5579_v12, %v1525_v62  ;;  %2333 = vrot.lane.b32.xlu0 %v2219_v38, %s4635_s12  ;;  %v1749_v52 = vmax.f32 %v1683_v33, 0.0 }
 0x214   : > { %2147 = vrot.lane.b32.xlu1 %v5877_v9, %s4635_s12  ;;  %v2220_v22 = vrot.slane %v5896_v51, 1  ;;  %v2064_v3 = vshll.u32 %v5896_v51, 16  ;;  %v2062_v5 = vshrl.u32 %v5896_v51, 16 }
 0x215   : > { %v1750_v42 = vmax.f32 %v1686_v26, 0.0 }
 0x216   : > { %v2222_v54 = vsel %vm739_vm3, %v2220_v22, %v2221_v16  ;;  %v2066_v27 = vrot.slane %v2064_v3, 1  ;;  %v2071_v16 = vrot.slane %v2069_v58, 1 }
 0x217   : > { %v1771_v47 = vpack.c.bf16 %v1750_v42, %v1749_v52  ;;  %v4152_v12 = vpop.f32.mrb[44].mxu0  ;;  %4386 = vmatprep.mubr.msk.bf16.mxu0 %vm965_vm5, %v2222_v54  ;;  %2393 = vrot.lane.b32.xlu0 %v5905_v30, %s4636_s13 }
 0x218   : > { %v4153_v1 = vpop.f32.mrb[45].mxu0  ;;  %2285 = vrot.lane.b32.xlu1 %v5868_v15, %s4636_s13  ;;  %v2067_v44 = vor.u32 %v2066_v27, %v2062_v5 }
 0x219   : > { %v1848_v61 = vshrl.u32 %v1771_v47, 16  ;;  %v4154_v49 = vadd.f32 %v4153_v1, %v4152_v12  ;;  %v4155_v50 = vpop.f32.mrb[46].mxu0  ;;  %v1851_v45 = vshll.u32 %v1771_v47, 16 }
 0x21a   : > { %v4156_v0 = vpop.f32.mrb[47].mxu0  ;;  %v5935_v42 = vsel %vm482_vm4, %v2067_v44, %v2071_v16 }
 0x21b   : > { %v1850_v43 = vrot.slane %v1848_v61, 7  ;;  %v1530_v14 = vadd.f32 %v4154_v49, %v5599_v37  ;;  %v4157_v18 = vadd.f32 %v4156_v0, %v4155_v50  ;;  %2365 = vrot.lane.b32.xlu0 %v5896_v51, %s4634_s29 }
 0x21c   : > { %2254 = vrot.lane.b32.xlu1 %v2219_v38, %s4634_s29 }
 0x21d   : > { %v1853_v25 = vor.u32 %v1851_v45, %v1850_v43  ;;  %v1947_v28 = vsel %vm4785_vm2, %v1850_v43, 0  ;;  %v1691_v33 = vadd.f32 %v5573_v32, %v1530_v14  ;;  %v1533_v62 = vadd.f32 %v4157_v18, %v5599_v37 }
 0x21e   : > { %v2224_v57 = vrot.slane %v1947_v28, 1  ;;  %v2081_v58 = vshll.u32 %v1947_v28, 16 }
 0x21f   : > { %v5924_v26 = vsel %vm4785_vm2, 0, %v1853_v25  ;;  %v1694_v22 = vadd.f32 %v5577_v29, %v1533_v62  ;;  %2335 = vrot.lane.b32.xlu0 %v2222_v54, %s4635_s12  ;;  %v1751_v4 = vmax.f32 %v1691_v33, 0.0 }
 0x220   : > { %2149 = vrot.lane.b32.xlu1 %v5905_v30, %s4635_s12  ;;  %v2223_v38 = vrot.slane %v5924_v26, 1  ;;  %v2076_v3 = vshll.u32 %v5924_v26, 16  ;;  %v2074_v5 = vshrl.u32 %v5924_v26, 16  ;;  %v2083_v16 = vrot.slane %v2081_v58, 1 }
 0x221   : > { %v1752_v32 = vmax.f32 %v1694_v22, 0.0 }
 0x222   : > { %v5932_v52 = vsel %vm739_vm3, %v2223_v38, %v2224_v57  ;;  %v2078_v27 = vrot.slane %v2076_v3, 1 }
 0x223   : > { %v1772_v29 = vpack.c.bf16 %v1752_v32, %v1751_v4  ;;  %v4158_v47 = vpop.f32.mrb[48].mxu0  ;;  %4387 = vmatmul.mubr.msk.bf16.gmra.mrb[80].mxu0 %vm965_vm5, %v5932_v52  ;;  %2395 = vrot.lane.b32.xlu0 %v5935_v42, %s4636_s13 }
 0x224   : > { %v4159_v12 = vpop.f32.mrb[49].mxu0  ;;  %2287 = vrot.lane.b32.xlu1 %v5896_v51, %s4636_s13  ;;  %v2079_v38 = vor.u32 %v2078_v27, %v2074_v5 }
 0x225   : > { %v1855_v1 = vshrl.u32 %v1772_v29, 16  ;;  %v4160_v61 = vadd.f32 %v4159_v12, %v4158_v47  ;;  %v4161_v49 = vpop.f32.mrb[50].mxu0  ;;  %v1858_v45 = vshll.u32 %v1772_v29, 16 }
 0x226   : > { %v4162_v50 = vpop.f32.mrb[51].mxu0  ;;  %v2270_v0 = vpop.permute.xlu1 %2269 }
 0x227   : > { %v1857_v43 = vrot.slane %v1855_v1, 7  ;;  %v4163_v14 = vadd.f32 %v4162_v50, %v4161_v49  ;;  %2367 = vrot.lane.b32.xlu0 %v5924_v26, %s4634_s29  ;;  %v1538_v18 = vadd.f32 %v4160_v61, %v5599_v37 }
 0x228   : > { %2256 = vrot.lane.b32.xlu1 %v2222_v54, %s4634_s29 }
 0x229   : > { %v1860_v25 = vor.u32 %v1858_v45, %v1857_v43  ;;  %v1699_v33 = vadd.f32 %v5622_v34, %v1538_v18  ;;  %v1541_v62 = vadd.f32 %v4163_v14, %v5599_v37  ;;  %v1948_v44 = vsel %vm4785_vm2, %v1857_v43, 0  ;;  %v2318_v32 = vpop.permute.xlu0 %2317 }
 0x22a   : > { %v5953_v22 = vpop.permute.xlu1 %2238  ;;  %v2227_v28 = vrot.slane %v1948_v44, 1  ;;  %v2519_v14 = vsel %vm965_vm5, %v5672_v53, %v2318_v32 }
 0x22b   : > { %v5957_v57 = vsel %vm4785_vm2, 0, %v1860_v25  ;;  %v1702_v54 = vadd.f32 %v5627_v7, %v1541_v62  ;;  %2337 = vrot.lane.b32.xlu0 %v5932_v52, %s4635_s12  ;;  %v1753_v4 = vmax.f32 %v1699_v33, 0.0  ;;  %v5971_v7 = vsel %vm482_vm4, %v2079_v38, %v2083_v16 }
 0x22c   : > { %2151 = vrot.lane.b32.xlu1 %v5935_v42, %s4635_s12  ;;  %v2226_v34 = vrot.slane %v5957_v57, 1  ;;  %v2088_v12 = vshll.u32 %v5957_v57, 16 }
 0x22d   : > { %v1754_v3 = vmax.f32 %v1702_v54, 0.0 }
 0x22e   : > { %v5965_v29 = vpop.permute.xlu1 %2133  ;;  %v5968_v47 = vsel %vm739_vm3, %v2226_v34, %v2227_v28  ;;  %v2090_v58 = vrot.slane %v2088_v12, 1  ;;  %v2086_v34 = vshrl.u32 %v5957_v57, 16  ;;  %v2093_v28 = vshll.u32 %v1948_v44, 16 }
 0x22f   : > { %v1773_v1 = vpack.c.bf16 %v1754_v3, %v1753_v4  ;;  %v4164_v61 = vpop.f32.mrb[52].mxu0  ;;  %4390 = vmatprep.mubr.msk.bf16.mxu0 %vm965_vm5, %v5968_v47  ;;  %2397 = vrot.lane.b32.xlu0 %v5971_v7, %s4636_s13 }
 0x230   : > { %v4165_v49 = vpop.f32.mrb[53].mxu0  ;;  %2289 = vrot.lane.b32.xlu1 %v5924_v26, %s4636_s13 }
 0x231   : > { %v1862_v50 = vshrl.u32 %v1773_v1, 16  ;;  %v4166_v27 = vadd.f32 %v4165_v49, %v4164_v61  ;;  %v4167_v43 = vpop.f32.mrb[54].mxu0  ;;  %v2320_v45 = vpop.permute.xlu0 %2319  ;;  %v1865_v33 = vshll.u32 %v1773_v1, 16  ;;  %v2091_v61 = vor.u32 %v2090_v58, %v2086_v34  ;;  %v4498_v58 = vld [vmem:[%s6830_s3 + $0x88] sm:$0xff]  }
 0x232   : > { %v4168_v18 = vpop.f32.mrb[55].mxu0  ;;  %v2350_v5 = vpop.permute.xlu1 %2349 }
 0x233   : > { %v1864_v25 = vrot.slane %v1862_v50, 7  ;;  %v1546_v62 = vadd.f32 %v4166_v27, %v5599_v37  ;;  %v4169_v38 = vadd.f32 %v4168_v18, %v4167_v43  ;;  %2369 = vrot.lane.b32.xlu0 %v5957_v57, %s4634_s29  ;;  %v2566_v54 = vsel %vm998_vm6, %v2519_v14, %v2350_v5 }
 0x234   : > { %2258 = vrot.lane.b32.xlu1 %v5932_v52, %s4634_s29  ;;  %v2470_v52 = vsel %vm1031_vm7, %v5318_v40, %v2270_v0  ;;  %v2095_v50 = vrot.slane %v2093_v28, 1 }
 0x235   : > { %v1867_v53 = vor.u32 %v1865_v33, %v1864_v25  ;;  %v5991_v16 = vsel %vm4785_vm2, %v1864_v25, 0  ;;  %v1707_v4 = vadd.f32 %v5617_v17, %v1546_v62  ;;  %v1549_v32 = vadd.f32 %v4169_v38, %v5599_v37  ;;  %v2380_v3 = vpop.permute.xlu0 %2379 }
 0x236   : > { %v5995_v12 = vpop.permute.xlu1 %2271  ;;  %v2597_v1 = vsel %vm1031_vm7, %v2566_v54, %v2380_v3  ;;  %v2230_v17 = vrot.slane %v5991_v16, 1  ;;  %v6020_v18 = vsel %vm482_vm4, %v2091_v61, %v2095_v50 }
 0x237   : > { %v6002_v44 = vsel %vm4785_vm2, 0, %v1867_v53  ;;  %v1710_v49 = vadd.f32 %v5624_v41, %v1549_v32  ;;  %2339 = vrot.lane.b32.xlu0 %v5968_v47, %s4635_s12  ;;  %2871 = vmatprep.mubr.bf16.mxu1 %v2597_v1  ;;  %v1755_v40 = vmax.f32 %v1707_v4, 0.0  ;;  %v4497_v41 = vld [vmem:[%s6830_s3 + $0x80] sm:$0xff]   ;;  %v2410_v53 = vsel %vm965_vm5, %v5649_v11, %v5965_v29 }
 0x238   : > { %2153 = vrot.lane.b32.xlu1 %v5971_v7, %s4635_s12  ;;  %2872 = vmatmul.mubr.bf16.vlgmr.msra.gmra.mrb[32].mxu1 %v2470_v52  ;;  %v2229_v37 = vrot.slane %v6002_v44, 1  ;;  %v2100_v5 = vshll.u32 %v6002_v44, 16  ;;  %v2522_v4 = vsel %vm965_vm5, %v5699_v24, %v2320_v45  ;;  %v2098_v11 = vshrl.u32 %v6002_v44, 16 }
 0x239   : > { %v1756_v0 = vmax.f32 %v1710_v49, 0.0  ;;  %v2352_v27 = vpop.permute.xlu0 %2351  ;;  %4404 = vmatpush3.bf16.msra.mxu1 %v4497_v41  ;;  %v2105_v24 = vshll.u32 %v5991_v16, 16 }
 0x23a   : > { %v6014_v43 = vpop.permute.xlu1 %2240  ;;  %v6017_v14 = vsel %vm739_vm3, %v2229_v37, %v2230_v17  ;;  %4403 = vmatprep.subr.bf16.mxu1 %v4498_v58  ;;  %v2102_v1 = vrot.slane %v2100_v5, 1  ;;  %v4499_v37 = vld [vmem:[%s6829_s2] ss:$0 sm:$0xff]  ;;  %v2568_v50 = vsel %vm998_vm6, %v2522_v4, %v2352_v27  ;;  %v2440_v27 = vsel %vm998_vm6, %v2410_v53, %v5953_v22 }
 0x23b   : > { %v1774_v25 = vpack.c.bf16 %v1756_v0, %v1755_v40  ;;  %v4170_v33 = vpop.f32.mrb[56].mxu0  ;;  %4391 = vmatmul.mubr.msk.bf16.gmra.mrb[84].mxu0 %vm965_vm5, %v6017_v14  ;;  %2399 = vrot.lane.b32.xlu0 %v6020_v18, %s4636_s13 }
 0x23c   : > { %v4171_v62 = vpop.f32.mrb[57].mxu0  ;;  %2291 = vrot.lane.b32.xlu1 %v5957_v57, %s4636_s13 }
 0x23d   : > { %v1869_v38 = vshrl.u32 %v1774_v25, 16  ;;  %v4172_v54 = vadd.f32 %v4171_v62, %v4170_v33  ;;  %v4173_v34 = vpop.f32.mrb[58].mxu0  ;;  %v2322_v28 = vpop.permute.xlu0 %2321  ;;  %4405 = vmatpush3.bf16.msra.mxu1 %v4498_v58  ;;  %v1872_v52 = vshll.u32 %v1774_v25, 16  ;;  %v2107_v62 = vrot.slane %v2105_v24, 1 }
 0x23e   : > { %v4174_v32 = vpop.f32.mrb[59].mxu0  ;;  %v2136_v3 = vpop.permute.xlu1 %2135 }
 0x23f   : > { %v1871_v61 = vrot.slane %v1869_v38, 7  ;;  %v4175_v49 = vadd.f32 %v4174_v32, %v4173_v34  ;;  %2371 = vrot.lane.b32.xlu0 %v6002_v44, %s4634_s29  ;;  %v1554_v17 = vadd.f32 %v4499_v37, %v4172_v54  ;;  %v2412_v24 = vsel %vm965_vm5, %v5676_v21, %v2136_v3 }
 0x240   : > { %2260 = vrot.lane.b32.xlu1 %v5968_v47, %s4634_s29  ;;  %v2103_v47 = vor.u32 %v2102_v1, %v2098_v11  ;;  %v2525_v11 = vsel %vm965_vm5, %v5737_v20, %v2322_v28 }
 0x241   : > { %v1874_v29 = vor.u32 %v1872_v52, %v1871_v61  ;;  %v1715_v45 = vadd.f32 %v5696_v35, %v1554_v17  ;;  %v2382_v40 = vpop.permute.xlu0 %2381  ;;  %v1557_v0 = vadd.f32 %v4499_v37, %v4175_v49  ;;  %v6050_v41 = vsel %vm4785_vm2, %v1871_v61, 0 }
 0x242   : > { %v2274_v5 = vpop.permute.xlu1 %2273  ;;  %v2600_v58 = vsel %vm1031_vm7, %v2568_v50, %v2382_v40  ;;  %v2473_v35 = vsel %vm1031_vm7, %v2440_v27, %v5995_v12  ;;  %v2233_v33 = vrot.slane %v6050_v41, 1  ;;  %v6074_v4 = vsel %vm482_vm4, %v2103_v47, %v2107_v62 }
 0x243   : > { %v6057_v25 = vsel %vm4785_vm2, 0, %v1874_v29  ;;  %v1718_v16 = vadd.f32 %v5709_v19, %v1557_v0  ;;  %2341 = vrot.lane.b32.xlu0 %v6017_v14, %s4635_s12  ;;  %2879 = vmatprep.mubr.bf16.mxu1 %v2600_v58  ;;  %v1757_v38 = vmax.f32 %v1715_v45, 0.0  ;;  %v2117_v28 = vshll.u32 %v6050_v41, 16 }
 0x244   : > { %2155 = vrot.lane.b32.xlu1 %v6020_v18, %s4635_s12  ;;  %2880 = vmatmul.mubr.bf16.gmra.mrb[36].mxu1 %v2473_v35  ;;  %v2232_v22 = vrot.slane %v6057_v25, 1  ;;  %v2112_v12 = vshll.u32 %v6057_v25, 16  ;;  %v2110_v20 = vshrl.u32 %v6057_v25, 16 }
 0x245   : > { %v1758_v54 = vmax.f32 %v1718_v16, 0.0  ;;  %v2354_v34 = vpop.permute.xlu0 %2353 }
 0x246   : > { %v6068_v19 = vpop.permute.xlu1 %2242  ;;  %v6071_v53 = vsel %vm739_vm3, %v2232_v22, %v2233_v33  ;;  %v2114_v40 = vrot.slane %v2112_v12, 1  ;;  %v2570_v16 = vsel %vm998_vm6, %v2525_v11, %v2354_v34  ;;  %v2119_v12 = vrot.slane %v2117_v28, 1 }
 0x247   : > { %v1775_v32 = vpack.c.bf16 %v1758_v54, %v1757_v38  ;;  %v4176_v1 = vpop.f32.mrb[60].mxu0  ;;  %4394 = vmatprep.mubr.msk.bf16.mxu0 %vm965_vm5, %v6071_v53  ;;  %2401 = vrot.lane.b32.xlu0 %v6074_v4, %s4636_s13  ;;  %v2442_v54 = vsel %vm998_vm6, %v2412_v24, %v6014_v43 }
 0x248   : > { %v4177_v61 = vpop.f32.mrb[61].mxu0  ;;  %2293 = vrot.lane.b32.xlu1 %v6002_v44, %s4636_s13  ;;  %v2115_v34 = vor.u32 %v2114_v40, %v2110_v20 }
 0x249   : > { %v1876_v52 = vshrl.u32 %v1775_v32, 16  ;;  %v4178_v49 = vadd.f32 %v4177_v61, %v4176_v1  ;;  %v4179_v17 = vpop.f32.mrb[62].mxu0  ;;  %v2324_v50 = vpop.permute.xlu0 %2323  ;;  %v1879_v58 = vshll.u32 %v1775_v32, 16 }
 0x24a   : > { %v4180_v29 = vpop.f32.mrb[63].mxu0  ;;  %v2138_v45 = vpop.permute.xlu1 %2137 }
 0x24b   : > { %v1878_v0 = vrot.slane %v1876_v52, 7  ;;  %v1562_v27 = vadd.f32 %v4499_v37, %v4178_v49  ;;  %v4181_v47 = vadd.f32 %v4180_v29, %v4179_v17  ;;  %2373 = vrot.lane.b32.xlu0 %v6057_v25, %s4634_s29  ;;  %v6115_v49 = vsel %vm482_vm4, %v2115_v34, %v2119_v12 }
 0x24c   : > { %2262 = vrot.lane.b32.xlu1 %v6017_v14, %s4634_s29 }
 0x24d   : > { %v1881_v21 = vor.u32 %v1879_v58, %v1878_v0  ;;  %v1951_v3 = vsel %vm4785_vm2, %v1878_v0, 0  ;;  %v1723_v35 = vadd.f32 %v5692_v13, %v1562_v27  ;;  %v1565_v22 = vadd.f32 %v4499_v37, %v4181_v47  ;;  %v2384_v33 = vpop.permute.xlu0 %2383 }
 0x24e   : > { %v2276_v62 = vpop.permute.xlu1 %2275  ;;  %v2603_v38 = vsel %vm1031_vm7, %v2570_v16, %v2384_v33  ;;  %v2476_v13 = vsel %vm1031_vm7, %v2442_v54, %v2274_v5  ;;  %v2236_v43 = vrot.slane %v1951_v3, 1  ;;  %v2414_v27 = vsel %vm965_vm5, %v5705_v6, %v2138_v45 }
 0x24f   : > { %v6102_v14 = vsel %vm4785_vm2, 0, %v1881_v21  ;;  %v1726_v41 = vadd.f32 %v5701_v63, %v1565_v22  ;;  %2343 = vrot.lane.b32.xlu0 %v6071_v53, %s4635_s12  ;;  %2887 = vmatprep.mubr.bf16.mxu1 %v2603_v38  ;;  %v1759_v32 = vmax.f32 %v1723_v35, 0.0  ;;  %v2528_v47 = vsel %vm965_vm5, %v5765_v56, %v2324_v50 }
 0x250   : > { %2157 = vrot.lane.b32.xlu1 %v6074_v4, %s4635_s12  ;;  %2888 = vmatmul.mubr.bf16.gmra.mrb[40].mxu1 %v2476_v13  ;;  %v2235_v37 = vrot.slane %v6102_v14, 1  ;;  %v2124_v5 = vshll.u32 %v6102_v14, 16  ;;  %v2122_v16 = vshrl.u32 %v6102_v14, 16  ;;  %v2129_v20 = vshll.u32 %v1951_v3, 16 }
 0x251   : > { %v1760_v1 = vmax.f32 %v1726_v41, 0.0  ;;  %v2356_v61 = vpop.permute.xlu0 %2355  ;;  %v2444_v6 = vsel %vm998_vm6, %v2414_v27, %v6068_v19 }
 0x252   : > { %v2245_v52 = vpop.permute.xlu1 %2244  ;;  %v6112_v63 = vsel %vm739_vm3, %v2235_v37, %v2236_v43  ;;  %v2126_v40 = vrot.slane %v2124_v5, 1  ;;  %v2572_v28 = vsel %vm998_vm6, %v2528_v47, %v2356_v61  ;;  %v2479_v56 = vsel %vm1031_vm7, %v2444_v6, %v2276_v62 }
 0x253   : > { %v1776_v17 = vpack.c.bf16 %v1760_v1, %v1759_v32  ;;  %4395 = vmatmul.mubr.msk.bf16.gmra.mrb[88].mxu0 %vm965_vm5, %v6112_v63  ;;  %2403 = vrot.lane.b32.xlu0 %v6115_v49, %s4636_s13  ;;  %v2131_v50 = vrot.slane %v2129_v20, 1 }
 0x254   : > { %2295 = vrot.lane.b32.xlu1 %v6057_v25, %s4636_s13  ;;  %v2127_v45 = vor.u32 %v2126_v40, %v2122_v16 }
 0x255   : > { %v1883_v11 = vshrl.u32 %v1776_v17, 16  ;;  %v2326_v24 = vpop.permute.xlu0 %2325  ;;  %v1886_v58 = vshll.u32 %v1776_v17, 16 }
 0x256   : > { %v2140_v29 = vpop.permute.xlu1 %2139  ;;  %v6147_v34 = vsel %vm482_vm4, %v2127_v45, %v2131_v50  ;;  %v2531_v32 = vsel %vm965_vm5, %v5793_v55, %v2326_v24 }
 0x257   : > { %v1885_v0 = vrot.slane %v1883_v11, 7  ;;  %2375 = vrot.lane.b32.xlu0 %v6102_v14, %s4634_s29  ;;  %v2416_v2 = vsel %vm965_vm5, %v5728_v46, %v2140_v29 }
 0x258   : > { %2264 = vrot.lane.b32.xlu1 %v6071_v53, %s4634_s29  ;;  %v2446_v46 = vsel %vm998_vm6, %v2416_v2, %v2245_v52 }
 0x259   : > { %v2386_v21 = vpop.permute.xlu0 %2385  ;;  %v1888_v35 = vor.u32 %v1886_v58, %v1885_v0  ;;  %v1952_v19 = vsel %vm4785_vm2, %v1885_v0, 0 }
 0x25a   : > { %v2278_v22 = vpop.permute.xlu1 %2277  ;;  %v2606_v33 = vsel %vm1031_vm7, %v2572_v28, %v2386_v21  ;;  %v2309_v13 = vshll.u32 %v1952_v19, 16  ;;  %v2315_v24 = vrot.slane %v1952_v19, 1 }
 0x25b   : > { %2345 = vrot.lane.b32.xlu0 %v6112_v63, %s4635_s12  ;;  %2895 = vmatprep.mubr.bf16.mxu1 %v2606_v33  ;;  %v1936_v53 = vsel %vm4785_vm2, 0, %v1888_v35  ;;  %v2482_v55 = vsel %vm1031_vm7, %v2446_v46, %v2278_v22 }
 0x25c   : > { %2159 = vrot.lane.b32.xlu1 %v6115_v49, %s4635_s12  ;;  %2896 = vmatmul.mubr.bf16.gmra.mrb[44].mxu1 %v2479_v56  ;;  %v2304_v3 = vshll.u32 %v1936_v53, 16  ;;  %v2302_v62 = vshrl.u32 %v1936_v53, 16  ;;  %v2311_v1 = vrot.slane %v2309_v13, 1  ;;  %v2314_v29 = vrot.slane %v1936_v53, 1 }
 0x25d   : > { %v2358_v38 = vpop.permute.xlu0 %2357 }
 0x25e   : > { %v2247_v54 = vpop.permute.xlu1 %2246  ;;  %v2306_v41 = vrot.slane %v2304_v3, 1  ;;  %v2574_v61 = vsel %vm998_vm6, %v2531_v32, %v2358_v38  ;;  %v6171_v27 = vsel %vm739_vm3, %v2314_v29, %v2315_v24 }
 0x25f   : > { %2405 = vrot.lane.b32.xlu0 %v6147_v34, %s4636_s13 }
 0x260   : > { %2297 = vrot.lane.b32.xlu1 %v6102_v14, %s4636_s13  ;;  %v2307_v12 = vor.u32 %v2306_v41, %v2302_v62 }
 0x261   : > { %v2328_v37 = vpop.permute.xlu0 %2327 }
 0x262   : > { %v2142_v43 = vpop.permute.xlu1 %2141  ;;  %v6162_v11 = vsel %vm482_vm4, %v2307_v12, %v2311_v1  ;;  %v2534_v20 = vsel %vm965_vm5, %v5821_v8, %v2328_v37 }
 0x263   : > { %2377 = vrot.lane.b32.xlu0 %v1936_v53, %s4634_s29  ;;  %v2418_v16 = vsel %vm965_vm5, %v5756_v48, %v2142_v43 }
 0x264   : > { %2161 = vrot.lane.b32.xlu1 %v6147_v34, %s4635_s12  ;;  %v2448_v33 = vsel %vm998_vm6, %v2418_v16, %v2247_v54 }
 0x265   : > { %v2388_v5 = vpop.permute.xlu0 %2387 }
 0x266   : > { %v2280_v17 = vpop.permute.xlu1 %2279  ;;  %v2609_v40 = vsel %vm1031_vm7, %v2574_v61, %v2388_v5 }
 0x267   : > { %2407 = vrot.lane.b32.xlu0 %v6162_v11, %s4636_s13  ;;  %2903 = vmatprep.mubr.bf16.mxu1 %v2609_v40  ;;  %v2485_v6 = vsel %vm1031_vm7, %v2448_v33, %v2280_v17 }
 0x268   : > { %2299 = vrot.lane.b32.xlu1 %v1936_v53, %s4636_s13  ;;  %2904 = vmatmul.mubr.bf16.gmra.mrb[48].mxu1 %v2482_v55 }
 0x269   : > { %v2360_v0 = vpop.permute.xlu0 %2359 }
 0x26a   : > { %v2249_v58 = vpop.permute.xlu1 %2248  ;;  %v2576_v28 = vsel %vm998_vm6, %v2534_v20, %v2360_v0 }
 0x26b   : > { %2347 = vrot.lane.b32.xlu0 %v6171_v27, %s4635_s12 }
 0x26d   : > { %v2330_v52 = vpop.permute.xlu0 %2329 }
 0x26e   : > { %v2144_v47 = vpop.permute.xlu1 %2143  ;;  %v2537_v8 = vsel %vm965_vm5, %v5849_v60, %v2330_v52 }
 0x26f   : > { %2266 = vrot.lane.b32.xlu0 %v6112_v63, %s4634_s29  ;;  %v2420_v63 = vsel %vm965_vm5, %v5784_v39, %v2144_v47 }
 0x270   : > { %v2450_v54 = vsel %vm998_vm6, %v2420_v63, %v2249_v58 }
 0x271   : > { %v2390_v21 = vpop.permute.xlu0 %2389 }
 0x272   : > { %v2282_v35 = vpop.permute.xlu1 %2281  ;;  %v2612_v22 = vsel %vm1031_vm7, %v2576_v28, %v2390_v21 }
 0x273   : > { %2911 = vmatprep.mubr.bf16.mxu1 %v2612_v22  ;;  %v2488_v41 = vsel %vm1031_vm7, %v2450_v54, %v2282_v35 }
 0x274   : > { %2912 = vmatmul.mubr.bf16.gmra.mrb[52].mxu1 %v2485_v6 }
 0x275   : > { %v2362_v45 = vpop.permute.xlu0 %2361 }
 0x276   : > { %v2251_v48 = vpop.permute.xlu1 %2250  ;;  %v2578_v50 = vsel %vm998_vm6, %v2537_v8, %v2362_v45 }
 0x279   : > { %v2332_v56 = vpop.permute.xlu0 %2331 }
 0x27a   : > { %v2146_v53 = vpop.permute.xlu1 %2145  ;;  %v2540_v60 = vsel %vm965_vm5, %v5877_v9, %v2332_v56 }
 0x27b   : > { %v2422_v39 = vsel %vm965_vm5, %v5812_v36, %v2146_v53 }
 0x27c   : > { %v2452_v61 = vsel %vm998_vm6, %v2422_v39, %v2251_v48 }
 0x27d   : > { %v2392_v3 = vpop.permute.xlu0 %2391 }
 0x27e   : > { %v2284_v38 = vpop.permute.xlu1 %2283  ;;  %v2615_v19 = vsel %vm1031_vm7, %v2578_v50, %v2392_v3 }
 0x27f   : > { %2919 = vmatprep.mubr.bf16.mxu1 %v2615_v19  ;;  %v2491_v5 = vsel %vm1031_vm7, %v2452_v61, %v2284_v38 }
 0x280   : > { %2920 = vmatmul.mubr.bf16.gmra.mrb[56].mxu1 %v2488_v41 }
 0x281   : > { %v2364_v62 = vpop.permute.xlu0 %2363 }
 0x282   : > { %v2253_v13 = vpop.permute.xlu1 %2252  ;;  %v2580_v12 = vsel %vm998_vm6, %v2540_v60, %v2364_v62 }
 0x285   : > { %v2334_v37 = vpop.permute.xlu0 %2333 }
 0x286   : > { %v2148_v43 = vpop.permute.xlu1 %2147  ;;  %v2543_v9 = vsel %vm965_vm5, %v5905_v30, %v2334_v37 }
 0x287   : > { %v2424_v36 = vsel %vm965_vm5, %v5840_v59, %v2148_v43 }
 0x288   : > { %v2454_v52 = vsel %vm998_vm6, %v2424_v36, %v2253_v13 }
 0x289   : > { %v2394_v2 = vpop.permute.xlu0 %2393 }
 0x28a   : > { %v2286_v32 = vpop.permute.xlu1 %2285  ;;  %v2618_v1 = vsel %vm1031_vm7, %v2580_v12, %v2394_v2 }
 0x28b   : > { %2927 = vmatprep.mubr.bf16.mxu1 %v2618_v1  ;;  %v2494_v47 = vsel %vm1031_vm7, %v2454_v52, %v2286_v32 }
 0x28c   : > { %2928 = vmatmul.mubr.bf16.gmra.mrb[60].mxu1 %v2491_v5 }
 0x28d   : > { %v2366_v17 = vpop.permute.xlu0 %2365 }
 0x28e   : > { %v2255_v40 = vpop.permute.xlu1 %2254  ;;  %v2582_v55 = vsel %vm998_vm6, %v2543_v9, %v2366_v17 }
 0x291   : > { %v2336_v46 = vpop.permute.xlu0 %2335 }
 0x292   : > { %v2150_v29 = vpop.permute.xlu1 %2149  ;;  %v2546_v6 = vsel %vm965_vm5, %v5935_v42, %v2336_v46 }
 0x293   : > { %v2426_v33 = vsel %vm965_vm5, %v5868_v15, %v2150_v29 }
 0x294   : > { %v2456_v63 = vsel %vm998_vm6, %v2426_v33, %v2255_v40 }
 0x295   : > { %v2396_v24 = vpop.permute.xlu0 %2395 }
 0x296   : > { %v2288_v0 = vpop.permute.xlu1 %2287  ;;  %v2621_v58 = vsel %vm1031_vm7, %v2582_v55, %v2396_v24 }
 0x297   : > { %2935 = vmatprep.mubr.bf16.mxu1 %v2621_v58  ;;  %v2497_v8 = vsel %vm1031_vm7, %v2456_v63, %v2288_v0 }
 0x298   : > { %2936 = vmatmul.mubr.bf16.gmra.mrb[64].mxu1 %v2494_v47 }
 0x299   : > { %v2368_v16 = vpop.permute.xlu0 %2367 }
 0x29a   : > { %v6209_v20 = vpop.f32.mrb[64].mxu0  ;;  %v2257_v28 = vpop.permute.xlu1 %2256  ;;  %v2584_v45 = vsel %vm998_vm6, %v2546_v6, %v2368_v16 }
 0x29b   : > { %v6211_v59 = vpop.f32.mrb[65].mxu0 }
 0x29c   : > { %v6213_v21 = vpop.f32.mrb[66].mxu0 }
 0x29d   : > { %v6215_v30 = vpop.f32.mrb[67].mxu0  ;;  %v2338_v35 = vpop.permute.xlu0 %2337 }
 0x29e   : > { %v2152_v22 = vpop.permute.xlu1 %2151  ;;  %v2549_v42 = vsel %vm965_vm5, %v5971_v7, %v2338_v35 }
 0x29f   : > { %v2428_v15 = vsel %vm965_vm5, %v5896_v51, %v2152_v22 }
 0x2a0   : > { %v2458_v43 = vsel %vm998_vm6, %v2428_v15, %v2257_v28 }
 0x2a1   : > { %v2398_v48 = vpop.permute.xlu0 %2397 }
 0x2a2   : > { %v2290_v56 = vpop.permute.xlu1 %2289  ;;  %v2624_v53 = vsel %vm1031_vm7, %v2584_v45, %v2398_v48 }
 0x2a3   : > { %2943 = vmatprep.mubr.bf16.mxu1 %v2624_v53  ;;  %v2500_v60 = vsel %vm1031_vm7, %v2458_v43, %v2290_v56 }
 0x2a4   : > { %2944 = vmatmul.mubr.bf16.gmra.mrb[68].mxu1 %v2497_v8 }
 0x2a5   : > { %v2370_v50 = vpop.permute.xlu0 %2369 }
 0x2a6   : > { %v2259_v3 = vpop.permute.xlu1 %2258  ;;  %v2586_v54 = vsel %vm998_vm6, %v2549_v42, %v2370_v50 }
 0x2a9   : > { %v2340_v38 = vpop.permute.xlu0 %2339 }
 0x2aa   : > { %v2154_v19 = vpop.permute.xlu1 %2153  ;;  %v2552_v5 = vsel %vm965_vm5, %v6020_v18, %v2340_v38 }
 0x2ab   : > { %v2430_v61 = vsel %vm965_vm5, %v5924_v26, %v2154_v19 }
 0x2ac   : > { %v2460_v36 = vsel %vm998_vm6, %v2430_v61, %v2259_v3 }
 0x2ad   : > { %v2400_v41 = vpop.permute.xlu0 %2399 }
 0x2ae   : > { %v6230_v62 = vpop.f32.mrb[68].mxu0  ;;  %v2292_v13 = vpop.permute.xlu1 %2291  ;;  %v2627_v37 = vsel %vm1031_vm7, %v2586_v54, %v2400_v41 }
 0x2af   : > { %2951 = vmatprep.mubr.bf16.mxu1 %v2627_v37  ;;  %v6234_v39 = vpop.f32.mrb[69].mxu0  ;;  %v2503_v9 = vsel %vm1031_vm7, %v2460_v36, %v2292_v13 }
 0x2b0   : > { %2952 = vmatmul.mubr.bf16.gmra.mrb[72].mxu1 %v2500_v60  ;;  %v6237_v51 = vpop.f32.mrb[70].mxu0 }
 0x2b1   : > { %v6239_v12 = vpop.f32.mrb[71].mxu0  ;;  %v2372_v7 = vpop.permute.xlu0 %2371 }
 0x2b2   : > { %v2261_v2 = vpop.permute.xlu1 %2260  ;;  %v2588_v17 = vsel %vm998_vm6, %v2552_v5, %v2372_v7 }
 0x2b5   : > { %v2342_v32 = vpop.permute.xlu0 %2341 }
 0x2b6   : > { %v2156_v1 = vpop.permute.xlu1 %2155  ;;  %v2555_v18 = vsel %vm965_vm5, %v6074_v4, %v2342_v32 }
 0x2b7   : > { %v2432_v26 = vsel %vm965_vm5, %v5957_v57, %v2156_v1 }
 0x2b8   : > { %v2462_v22 = vsel %vm998_vm6, %v2432_v26, %v2261_v2 }
 0x2b9   : > { %v2402_v40 = vpop.permute.xlu0 %2401 }
 0x2ba   : > { %v2294_v46 = vpop.permute.xlu1 %2293  ;;  %v2630_v29 = vsel %vm1031_vm7, %v2588_v17, %v2402_v40 }
 0x2bb   : > { %2959 = vmatprep.mubr.bf16.mxu1 %v2630_v29  ;;  %v2506_v6 = vsel %vm1031_vm7, %v2462_v22, %v2294_v46 }
 0x2bc   : > { %2960 = vmatmul.mubr.bf16.gmra.mrb[76].mxu1 %v2503_v9 }
 0x2bd   : > { %v2374_v55 = vpop.permute.xlu0 %2373 }
 0x2be   : > { %v2263_v24 = vpop.permute.xlu1 %2262  ;;  %v2590_v52 = vsel %vm998_vm6, %v2555_v18, %v2374_v55 }
 0x2c1   : > { %v2344_v0 = vpop.permute.xlu0 %2343 }
 0x2c2   : > { %v2158_v58 = vpop.permute.xlu1 %2157  ;;  %v2558_v63 = vsel %vm965_vm5, %v6115_v49, %v2344_v0 }
 0x2c3   : > { %v2434_v53 = vsel %vm965_vm5, %v6002_v44, %v2158_v58 }
 0x2c4   : > { %v2464_v19 = vsel %vm998_vm6, %v2434_v53, %v2263_v24  ;;  %v6314_v24 = vld [vmem:[%s6831_s4] ss:$0 sm:$0xff] }
 0x2c5   : > { %v2404_v47 = vpop.permute.xlu0 %2403 }
 0x2c6   : > { %v6254_v16 = vpop.f32.mrb[72].mxu0  ;;  %v2296_v28 = vpop.permute.xlu1 %2295  ;;  %v2633_v35 = vsel %vm1031_vm7, %v2590_v52, %v2404_v47 }
 0x2c7   : > { %2967 = vmatprep.mubr.bf16.mxu1 %v2633_v35  ;;  %v6258_v33 = vpop.f32.mrb[73].mxu0  ;;  %v2509_v15 = vsel %vm1031_vm7, %v2464_v19, %v2296_v28 }
 0x2c8   : > { %2968 = vmatmul.mubr.bf16.gmra.mrb[80].mxu1 %v2506_v6  ;;  %v6261_v57 = vpop.f32.mrb[74].mxu0 }
 0x2c9   : > { %v6263_v45 = vpop.f32.mrb[75].mxu0  ;;  %v2376_v4 = vpop.permute.xlu0 %2375 }
 0x2ca   : > { %v2265_v48 = vpop.permute.xlu1 %2264  ;;  %v2592_v50 = vsel %vm998_vm6, %v2558_v63, %v2376_v4 }
 0x2cd   : > { %v2346_v56 = vpop.permute.xlu0 %2345 }
 0x2ce   : > { %v2160_v8 = vpop.permute.xlu1 %2159  ;;  %v2561_v49 = vsel %vm965_vm5, %v6147_v34, %v2346_v56 }
 0x2cf   : > { %v2436_v44 = vsel %vm965_vm5, %v6057_v25, %v2160_v8 }
 0x2d0   : > { %v2466_v43 = vsel %vm998_vm6, %v2436_v44, %v2265_v48 }
 0x2d1   : > { %v2406_v3 = vpop.permute.xlu0 %2405 }
 0x2d2   : > { %v2636_v38 = vsel %vm1031_vm7, %v2592_v50, %v2406_v3  ;;  %v2298_v54 = vpop.permute.xlu1 %2297 }
 0x2d3   : > { %2975 = vmatprep.mubr.bf16.mxu1 %v2636_v38  ;;  %v2512_v60 = vsel %vm1031_vm7, %v2466_v43, %v2298_v54 }
 0x2d4   : > { %2976 = vmatmul.mubr.bf16.gmra.mrb[84].mxu1 %v2509_v15 }
 0x2d5   : > { %v2378_v42 = vpop.permute.xlu0 %2377 }
 0x2d6   : > { %v2594_v41 = vsel %vm998_vm6, %v2561_v49, %v2378_v42  ;;  %v2162_v7 = vpop.permute.xlu1 %2161 }
 0x2d7   : > { %v2438_v17 = vsel %vm965_vm5, %v6102_v14, %v2162_v7 }
 0x2d9   : > { %v2408_v13 = vpop.permute.xlu0 %2407 }
 0x2da   : > { %v2639_v37 = vsel %vm1031_vm7, %v2594_v41, %v2408_v13 }
 0x2db   : > { %2983 = vmatprep.mubr.bf16.mxu1 %v2639_v37 }
 0x2dc   : > { %2984 = vmatmul.mubr.bf16.gmra.mrb[88].mxu1 %v2512_v60 }
 0x2dd   : > { %v2348_v2 = vpop.permute.xlu0 %2347 }
 0x2de   : > { %v2564_v32 = vsel %vm965_vm5, %v6162_v11, %v2348_v2  ;;  %v6283_v25 = vpop.f32.mrb[76].mxu0  ;;  %v2300_v11 = vpop.permute.xlu1 %2299 }
 0x2df   : > { %v6285_v1 = vpop.f32.mrb[77].mxu0  ;;  %v2595_v34 = vsel %vm998_vm6, %v2564_v32, %v5553_v31 }
 0x2e0   : > { %v6289_v61 = vpop.f32.mrb[78].mxu0  ;;  %v2641_v5 = vsel %vm1031_vm7, %v2595_v34, %v5560_v23 }
 0x2e1   : > { %v6295_v40 = vpop.f32.mrb[79].mxu0  ;;  %v2267_v46 = vpop.permute.xlu0 %2266  ;;  %2991 = vmatprep.mubr.bf16.mxu1 %v2641_v5  ;;  %v4500_v5 = vld [vmem:[%s4779_s28] sm:$0xff] }
 0x2e2   : > { %v2468_v29 = vsel %vm998_vm6, %v2438_v17, %v2267_v46  ;;  %v4501_v46 = vld [vmem:[%s4779_s28 + $0x20] sm:$0xff] }
 0x2e3   : > { %v2515_v36 = vsel %vm1031_vm7, %v2468_v29, %v2300_v11 }
 0x2e4   : > { %2992 = vmatmul.mubr.bf16.gmra.mrb[92].mxu1 %v2515_v36  ;;  %v4502_v36 = vld [vmem:[%s4779_s28 + $0x8] sm:$0xff] }
 0x2e5   : > { %4398 = vmatprep.mubr.msk.bf16.mxu1 %vm965_vm5, %v6171_v27 }
 0x2ec   : > { %4399 = vmatmul.mubr.msk.bf16.vlgmr.msra.gmra.mrb[96].mxu1 %vm965_vm5, %v4799_v10 }
 0x2f6   : > { %v6303_v31 = vpop.f32.mrb[80].mxu0 }
 0x2f7   : > { %v6305_v23 = vpop.f32.mrb[81].mxu0 }
 0x2f8   : > { %v6307_v14 = vpop.f32.mrb[82].mxu0 }
 0x2f9   : > { %v6309_v9 = vpop.f32.mrb[83].mxu0 }
 0x30b   : > { %v4216_v55 = vpop.f32.mrb[32].mxu1 }
 0x30c   : > { %v4217_v0 = vpop.f32.mrb[33].mxu1 }
 0x30d   : > { %v4218_v58 = vadd.f32 %v4217_v0, %v4216_v55  ;;  %v4219_v27 = vpop.f32.mrb[34].mxu1 }
 0x30e   : > { %v4220_v26 = vpop.f32.mrb[35].mxu1  ;;  %v6316_v18 = vpop.f32.mrb[84].mxu0 }
 0x30f   : > { %v2874_v10 = vadd.f32 %v4218_v58, %v6314_v24  ;;  %v4221_v52 = vadd.f32 %v4220_v26, %v4219_v27  ;;  %v6319_v47 = vpop.f32.mrb[85].mxu0  ;;  %v4503_v27 = vld [vmem:[%s4779_s28 + $0x28] sm:$0xff] }
 0x310   : > { %v6321_v28 = vpop.f32.mrb[86].mxu0 }
 0x311   : > { %v3035_v35 = vadd.f32 %v6211_v59, %v2874_v10  ;;  %v2877_v22 = vadd.f32 %v4221_v52, %v6314_v24  ;;  %v6325_v6 = vpop.f32.mrb[87].mxu0  ;;  %v4637_v10 = vmov 1983009808  }
 0x312   : > { %v3228_v52 = vunpack.c.l.s4 %v4637_v10 }
 0x313   : > { %v3038_v4 = vadd.f32 %v6215_v30, %v2877_v22  ;;  %v3161_v43 = vmul.f32 0.1, %v3035_v35  ;;  %v3230_v35 = vlaneseq }
 0x315   : > { %v3162_v2 = vmul.f32 0.1, %v3038_v4  ;;  %v3193_v17 = vadd.f32 %v4500_v5, %v3161_v43  ;;  %v4504_v43 = vld [vmem:[%s4779_s28 + $0x10] sm:$0xff]  ;;  %v4507_v5 = vld [vmem:[%s4779_s28 + $0x38] sm:$0xff] }
 0x317   : > { %v4222_v48 = vpop.f32.mrb[36].mxu1  ;;  %v3194_v55 = vadd.f32 %v4502_v36, %v3162_v2 }
 0x318   : > { %v4223_v56 = vpop.f32.mrb[37].mxu1 }
 0x319   : > { %v4224_v53 = vadd.f32 %v4223_v56, %v4222_v48  ;;  %v4225_v63 = vpop.f32.mrb[38].mxu1 }
 0x31a   : > { %v4226_v8 = vpop.f32.mrb[39].mxu1 }
 0x31b   : > { %v2882_v50 = vadd.f32 %v4224_v53, %v6314_v24  ;;  %v4227_v3 = vadd.f32 %v4226_v8, %v4225_v63  ;;  %v3229_v8 = vunpack.c.0.s8 %v3228_v52 }
 0x31d   : > { %v3043_v38 = vadd.f32 %v6209_v20, %v2882_v50  ;;  %v2885_v19 = vadd.f32 %v4227_v3, %v6314_v24  ;;  %v6348_v50 = vshrl.u32 %v3230_v35, 7 }
 0x31f   : > { %v3046_v59 = vadd.f32 %v6213_v21, %v2885_v19 }
 0x323   : > { %v4228_v15 = vpop.f32.mrb[40].mxu1 }
 0x324   : > { %v4229_v42 = vpop.f32.mrb[41].mxu1 }
 0x325   : > { %v4230_v54 = vadd.f32 %v4229_v42, %v4228_v15  ;;  %v4231_v44 = vpop.f32.mrb[42].mxu1  ;;  %v3163_v15 = vmul.f32 0.1, %v3043_v38 }
 0x326   : > { %v4232_v30 = vpop.f32.mrb[43].mxu1  ;;  %v6332_v49 = vpop.f32.mrb[88].mxu0 }
 0x327   : > { %v2890_v41 = vadd.f32 %v4230_v54, %v6314_v24  ;;  %v4233_v13 = vadd.f32 %v4232_v30, %v4231_v44  ;;  %v6335_v37 = vpop.f32.mrb[89].mxu0  ;;  %v3164_v54 = vmul.f32 0.1, %v3046_v59  ;;  %v6355_v30 = vsub.s32 %v3229_v8, %v6348_v50 }
 0x328   : > { %v6337_v20 = vpop.f32.mrb[90].mxu0 }
 0x329   : > { %v3051_v21 = vadd.f32 %v6234_v39, %v2890_v41  ;;  %v2893_v60 = vadd.f32 %v4233_v13, %v6314_v24  ;;  %v6341_v7 = vpop.f32.mrb[91].mxu0 }
 0x32b   : > { %v3165_v32 = vmul.f32 0.1, %v3051_v21  ;;  %v3054_v34 = vadd.f32 %v6239_v12, %v2893_v60  ;;  %v3195_v21 = vadd.f32 %v4504_v43, %v3163_v15  ;;  %v4505_v60 = vld [vmem:[%s4779_s28 + $0x30] sm:$0xff] }
 0x32d   : > { %v3197_v11 = vadd.f32 %v4501_v46, %v3165_v32  ;;  %v3166_v29 = vmul.f32 0.1, %v3054_v34  ;;  %v4506_v32 = vld [vmem:[%s4779_s28 + $0x18] sm:$0xff] }
 0x32e   : > { %v3196_v34 = vadd.f32 %v4506_v32, %v3164_v54 }
 0x32f   : > { %v3225_v0 = vcombine.low %v3193_v17, %v3197_v11  ;;  %v3226_v58 = vcombine.high %v3193_v17, %v3197_v11  ;;  %v3198_v26 = vadd.f32 %v4503_v27, %v3166_v29  ;;  %v4234_v39 = vpop.f32.mrb[44].mxu1 }
 0x330   : > { %v4235_v22 = vpop.f32.mrb[45].mxu1 }
 0x331   : > { %v3497_v4 = vcombine.low %v3194_v55, %v3198_v26  ;;  %v3498_v48 = vcombine.high %v3194_v55, %v3198_v26  ;;  %v4237_v12 = vpop.f32.mrb[46].mxu1  ;;  %v4236_v56 = vadd.f32 %v4235_v22, %v4234_v39  ;;  %v6362_v38 = vrot.slane %v3225_v0, %v6355_v30 }
 0x332   : > { %v4238_v53 = vpop.f32.mrb[47].mxu1  ;;  %v6365_v11 = vrot.slane %v3226_v58, %v6355_v30 }
 0x333   : > { %v4239_v63 = vadd.f32 %v4238_v53, %v4237_v12  ;;  %v2898_v3 = vadd.f32 %v4236_v56, %v6314_v24  ;;  %v6368_v26 = vrot.slane %v3497_v4, %v6355_v30  ;;  %v6371_v39 = vrot.slane %v3498_v48, %v6355_v30 }
 0x335   : > { %v2901_v19 = vadd.f32 %v4239_v63, %v6314_v24  ;;  %v3059_v42 = vadd.f32 %v6230_v62, %v2898_v3 }
 0x337   : > { %v3062_v44 = vadd.f32 %v6237_v51, %v2901_v19  ;;  %v3167_v41 = vmul.f32 0.1, %v3059_v42 }
 0x339   : > { %v3168_v13 = vmul.f32 0.1, %v3062_v44  ;;  %v3199_v2 = vadd.f32 %v4505_v60, %v3167_v41 }
 0x33b   : > { %v3200_v17 = vadd.f32 %v4507_v5, %v3168_v13  ;;  %v4240_v46 = vpop.f32.mrb[48].mxu1  ;;  %v3241_v62 = vcombine.low %v3195_v21, %v3199_v2  ;;  %v3242_v59 = vcombine.high %v3195_v21, %v3199_v2 }
 0x33c   : > { %v4241_v51 = vpop.f32.mrb[49].mxu1 }
 0x33d   : > { %v3513_v29 = vcombine.low %v3196_v34, %v3200_v17  ;;  %v3514_v36 = vcombine.high %v3196_v34, %v3200_v17  ;;  %v4242_v55 = vadd.f32 %v4241_v51, %v4240_v46  ;;  %v4243_v27 = vpop.f32.mrb[50].mxu1  ;;  %v6374_v10 = vrot.slane %v3241_v62, %v6355_v30 }
 0x33e   : > { %v6377_v0 = vrot.slane %v3242_v59, %v6355_v30  ;;  %v4244_v52 = vpop.f32.mrb[51].mxu1 }
 0x33f   : > { %v6380_v58 = vrot.slane %v3513_v29, %v6355_v30  ;;  %v6383_v35 = vrot.slane %v3514_v36, %v6355_v30  ;;  %v2906_v22 = vadd.f32 %v4242_v55, %v6314_v24  ;;  %v4245_v4 = vadd.f32 %v4244_v52, %v4243_v27  ;;  %v4508_v52 = vld [vmem:[%s4779_s28 + $0x40] sm:$0xff] }
 0x340   : > { %v3289_v48 = vcombine.low %v6362_v38, %v6374_v10  ;;  %v3305_v12 = vcombine.low %v6365_v11, %v6377_v0  ;;  %v3290_v56 = vcombine.high %v6362_v38, %v6374_v10  ;;  %v3306_v53 = vcombine.high %v6365_v11, %v6377_v0 }
 0x341   : > { %v3067_v63 = vadd.f32 %v6258_v33, %v2906_v22  ;;  %v2909_v8 = vadd.f32 %v4245_v4, %v6314_v24  ;;  %v3561_v3 = vcombine.low %v6368_v26, %v6380_v58  ;;  %v3577_v19 = vcombine.low %v6371_v39, %v6383_v35  ;;  %v4509_v4 = vld [vmem:[%s4779_s28 + $0x60] sm:$0xff] }
 0x342   : > { %v3562_v42 = vcombine.high %v6368_v26, %v6380_v58  ;;  %v3578_v54 = vcombine.high %v6371_v39, %v6383_v35 }
 0x343   : > { %v3070_v15 = vadd.f32 %v6263_v45, %v2909_v8  ;;  %v3169_v29 = vmul.f32 0.1, %v3067_v63 }
 0x345   : > { %v3170_v55 = vmul.f32 0.1, %v3070_v15  ;;  %v3201_v22 = vadd.f32 %v4508_v52, %v3169_v29 }
 0x347   : > { %v4246_v44 = vpop.f32.mrb[52].mxu1 }
 0x348   : > { %v4247_v41 = vpop.f32.mrb[53].mxu1 }
 0x349   : > { %v4248_v13 = vadd.f32 %v4247_v41, %v4246_v44  ;;  %v4249_v33 = vpop.f32.mrb[54].mxu1  ;;  %v4638_v41 = vmov 1934713408  }
 0x34a   : > { %v4250_v43 = vpop.f32.mrb[55].mxu1 }
 0x34b   : > { %v2914_v21 = vadd.f32 %v4248_v13, %v6314_v24  ;;  %v4251_v60 = vadd.f32 %v4250_v43, %v4249_v33  ;;  %v3292_v13 = vunpack.c.l.s4 %v4638_v41  ;;  %v4510_v33 = vld [vmem:[%s4779_s28 + $0x48] sm:$0xff] }
 0x34c   : > { %v3202_v43 = vadd.f32 %v4510_v33, %v3170_v55 }
 0x34d   : > { %v3075_v2 = vadd.f32 %v6254_v16, %v2914_v21  ;;  %v2917_v32 = vadd.f32 %v4251_v60, %v6314_v24  ;;  %v4511_v60 = vld [vmem:[%s4779_s28 + $0x68] sm:$0xff] }
 0x34f   : > { %v3078_v45 = vadd.f32 %v6261_v57, %v2917_v32 }
 0x353   : > { %v4252_v34 = vpop.f32.mrb[56].mxu1 }
 0x354   : > { %v4253_v5 = vpop.f32.mrb[57].mxu1 }
 0x355   : > { %v4254_v17 = vadd.f32 %v4253_v5, %v4252_v34  ;;  %v4255_v46 = vpop.f32.mrb[58].mxu1 }
 0x356   : > { %v4256_v62 = vpop.f32.mrb[59].mxu1 }
 0x357   : > { %v2922_v59 = vadd.f32 %v4254_v17, %v6314_v24  ;;  %v4257_v51 = vadd.f32 %v4256_v62, %v4255_v46  ;;  %v3293_v62 = vunpack.c.0.s8 %v3292_v13 }
 0x359   : > { %v3083_v36 = vadd.f32 %v6285_v1, %v2922_v59  ;;  %v2925_v16 = vadd.f32 %v4257_v51, %v6314_v24  ;;  %v6421_v55 = vsub.s32 %v3293_v62, %v6348_v50  ;;  %v4514_v50 = vld [vmem:[%s4779_s28 + $0x58] sm:$0xff] }
 0x35b   : > { %v3173_v27 = vmul.f32 0.1, %v3083_v36  ;;  %v3086_v57 = vadd.f32 %v6295_v40, %v2925_v16  ;;  %v3171_v36 = vmul.f32 0.1, %v3075_v2  ;;  %v6430_v13 = vrot.slane %v3289_v48, %v6421_v55  ;;  %v4515_v2 = vld [vmem:[%s4779_s28 + $0x78] sm:$0xff] }
 0x35c   : > { %v6450_v48 = vrot.slane %v3306_v53, %v6421_v55  ;;  %v6522_v26 = vrot.slane %v3578_v54, %v6421_v55 }
 0x35d   : > { %v3205_v8 = vadd.f32 %v4509_v4, %v3173_v27  ;;  %v3174_v44 = vmul.f32 0.1, %v3086_v57  ;;  %v3172_v27 = vmul.f32 0.1, %v3078_v45  ;;  %v4512_v4 = vld [vmem:[%s4779_s28 + $0x50] sm:$0xff] }
 0x35f   : > { %v3257_v21 = vcombine.low %v3201_v22, %v3205_v8  ;;  %v3258_v63 = vcombine.high %v3201_v22, %v3205_v8  ;;  %v3206_v1 = vadd.f32 %v4511_v60, %v3174_v44  ;;  %v4258_v32 = vpop.f32.mrb[60].mxu1  ;;  %v3203_v8 = vadd.f32 %v4512_v4, %v3171_v36  ;;  %v4513_v44 = vld [vmem:[%s4779_s28 + $0x70] sm:$0xff] }
 0x360   : > { %v4259_v34 = vpop.f32.mrb[61].mxu1 }
 0x361   : > { %v3529_v5 = vcombine.low %v3202_v43, %v3206_v1  ;;  %v3530_v15 = vcombine.high %v3202_v43, %v3206_v1  ;;  %v4261_v17 = vpop.f32.mrb[62].mxu1  ;;  %v4260_v40 = vadd.f32 %v4259_v34, %v4258_v32  ;;  %v6444_v43 = vrot.slane %v3290_v56, %v6421_v55 }
 0x362   : > { %v4262_v46 = vpop.f32.mrb[63].mxu1  ;;  %v6457_v34 = vrot.slane %v3561_v3, %v6421_v55  ;;  %v3272_v38 = vrot.slane %v3258_v63, %v6355_v30 }
 0x363   : > { %v4263_v59 = vadd.f32 %v4262_v46, %v4261_v17  ;;  %v2930_v51 = vadd.f32 %v4260_v40, %v6314_v24  ;;  %v3537_v11 = vrot.slane %v3529_v5, %v6355_v30  ;;  %v3544_v0 = vrot.slane %v3530_v15, %v6355_v30 }
 0x365   : > { %v2933_v29 = vadd.f32 %v4263_v59, %v6314_v24  ;;  %v3091_v16 = vadd.f32 %v6283_v25, %v2930_v51  ;;  %v6436_v25 = vrot.slane %v3305_v12, %v6421_v55  ;;  %v3265_v12 = vrot.slane %v3257_v21, %v6355_v30 }
 0x367   : > { %v3094_v57 = vadd.f32 %v6289_v61, %v2933_v29  ;;  %v3175_v52 = vmul.f32 0.1, %v3091_v16  ;;  %v3204_v61 = vadd.f32 %v4514_v50, %v3172_v27 }
 0x369   : > { %v3176_v22 = vmul.f32 0.1, %v3094_v57  ;;  %v3207_v41 = vadd.f32 %v4513_v44, %v3175_v52 }
 0x36b   : > { %v3208_v45 = vadd.f32 %v4515_v2, %v3176_v22  ;;  %v4264_v33 = vpop.f32.mrb[64].mxu1  ;;  %v3273_v60 = vcombine.low %v3203_v8, %v3207_v41  ;;  %v3274_v1 = vcombine.high %v3203_v8, %v3207_v41 }
 0x36c   : > { %v4265_v32 = vpop.f32.mrb[65].mxu1 }
 0x36d   : > { %v3545_v10 = vcombine.low %v3204_v61, %v3208_v45  ;;  %v3546_v56 = vcombine.high %v3204_v61, %v3208_v45  ;;  %v4266_v17 = vadd.f32 %v4265_v32, %v4264_v33  ;;  %v4267_v40 = vpop.f32.mrb[66].mxu1  ;;  %v3281_v53 = vrot.slane %v3273_v60, %v6355_v30 }
 0x36e   : > { %v3288_v21 = vrot.slane %v3274_v1, %v6355_v30  ;;  %v4268_v46 = vpop.f32.mrb[67].mxu1 }
 0x36f   : > { %v3553_v62 = vrot.slane %v3545_v10, %v6355_v30  ;;  %v3560_v3 = vrot.slane %v3546_v56, %v6355_v30  ;;  %v2938_v59 = vadd.f32 %v4266_v17, %v6314_v24  ;;  %v4269_v63 = vadd.f32 %v4268_v46, %v4267_v40 }
 0x370   : > { %v3321_v51 = vcombine.low %v3265_v12, %v3281_v53  ;;  %v3337_v29 = vcombine.low %v3272_v38, %v3288_v21  ;;  %v3322_v36 = vcombine.high %v3265_v12, %v3281_v53  ;;  %v3338_v16 = vcombine.high %v3272_v38, %v3288_v21 }
 0x371   : > { %v3099_v5 = vadd.f32 %v6305_v23, %v2938_v59  ;;  %v2941_v15 = vadd.f32 %v4269_v63, %v6314_v24  ;;  %v3593_v27 = vcombine.low %v3537_v11, %v3553_v62  ;;  %v3609_v57 = vcombine.low %v3544_v0, %v3560_v3 }
 0x372   : > { %v6470_v52 = vrot.slane %v3321_v51, %v6421_v55  ;;  %v6473_v22 = vrot.slane %v3337_v29, %v6421_v55  ;;  %v3336_v4 = vrot.slane %v3322_v36, %v6421_v55  ;;  %v3352_v8 = vrot.slane %v3338_v16, %v6421_v55 }
 0x373   : > { %v3102_v44 = vadd.f32 %v6309_v9, %v2941_v15  ;;  %v6479_v41 = vrot.slane %v3593_v27, %v6421_v55  ;;  %v6485_v23 = vrot.slane %v3577_v19, %v6421_v55  ;;  %v6488_v50 = vrot.slane %v3609_v57, %v6421_v55 }
 0x374   : > { %v3354_v61 = vcombine.high %v6430_v13, %v6470_v52  ;;  %v3358_v2 = vcombine.high %v6436_v25, %v6473_v22  ;;  %v3355_v9 = vcombine.low %v6444_v43, %v3336_v4  ;;  %v3359_v45 = vcombine.low %v6450_v48, %v3352_v8 }
 0x375   : > { %v3356_v33 = vcombine.high %v6444_v43, %v3336_v4  ;;  %v3360_v12 = vcombine.high %v6450_v48, %v3352_v8  ;;  %v3626_v19 = vcombine.high %v6457_v34, %v6479_v41  ;;  %v3630_v60 = vcombine.high %v6485_v23, %v6488_v50 }
 0x376   : > { %3771 = vrot.lane.b32.xlu0 %v3354_v61, %s4635_s12  ;;  %v3594_v1 = vcombine.high %v3537_v11, %v3553_v62  ;;  %v3610_v32 = vcombine.high %v3544_v0, %v3560_v3  ;;  %v6507_v10 = vrot.slane %v3562_v42, %v6421_v55  ;;  %v3353_v43 = vcombine.low %v6430_v13, %v6470_v52 }
 0x377   : > { %v4270_v38 = vpop.f32.mrb[68].mxu1  ;;  %v3357_v48 = vcombine.low %v6436_v25, %v6473_v22  ;;  %v3625_v56 = vcombine.low %v6457_v34, %v6479_v41  ;;  %v3629_v42 = vcombine.low %v6485_v23, %v6488_v50  ;;  %v3177_v57 = vmul.f32 0.1, %v3099_v5 }
 0x378   : > { %v4271_v17 = vpop.f32.mrb[69].mxu1  ;;  %v6516_v40 = vrot.slane %v3594_v1, %v6421_v55  ;;  %v6525_v58 = vrot.slane %v3610_v32, %v6421_v55  ;;  %v3178_v8 = vmul.f32 0.1, %v3102_v44 }
 0x379   : > { %v4272_v11 = vadd.f32 %v4271_v17, %v4270_v38  ;;  %v4273_v0 = vpop.f32.mrb[70].mxu1  ;;  %v4518_v38 = vld [vmem:[%s4779_s28 + $0x88] sm:$0xff] }
 0x37a   : > { %3795 = vrot.lane.b32.xlu0 %v3358_v2, %s4635_s12  ;;  %v4274_v53 = vpop.f32.mrb[71].mxu1  ;;  %v3627_v21 = vcombine.low %v6507_v10, %v6516_v40  ;;  %v3631_v46 = vcombine.low %v6522_v26, %v6525_v58  ;;  %v3628_v39 = vcombine.high %v6507_v10, %v6516_v40  ;;  %v3632_v35 = vcombine.high %v6522_v26, %v6525_v58 }
 0x37b   : > { %v2946_v54 = vadd.f32 %v4272_v11, %v6314_v24  ;;  %v4275_v62 = vadd.f32 %v4274_v53, %v4273_v0  ;;  %v3210_v5 = vadd.f32 %v4518_v38, %v3178_v8  ;;  %v4519_v11 = vld [vmem:[%s4779_s28 + $0xa8] sm:$0xff] }
 0x37d   : > { %v3107_v3 = vadd.f32 %v6303_v31, %v2946_v54  ;;  %v2949_v59 = vadd.f32 %v4275_v62, %v6314_v24 }
 0x37e   : > { %3779 = vrot.lane.b32.xlu0 %v3355_v9, %s4634_s29  ;;  %v4516_v9 = vld [vmem:[%s4779_s28 + $0x80] sm:$0xff] }
 0x37f   : > { %v3110_v63 = vadd.f32 %v6307_v14, %v2949_v59 }
 0x382   : > { %3803 = vrot.lane.b32.xlu0 %v3359_v45, %s4634_s29  ;;  %v3209_v45 = vadd.f32 %v4516_v9, %v3177_v57  ;;  %v4523_v9 = vld [vmem:[%s4779_s28 + $0xb8] sm:$0xff] }
 0x383   : > { %v4276_v51 = vpop.f32.mrb[72].mxu1 }
 0x384   : > { %v4277_v29 = vpop.f32.mrb[73].mxu1 }
 0x385   : > { %v4278_v36 = vadd.f32 %v4277_v29, %v4276_v51  ;;  %v4279_v16 = vpop.f32.mrb[74].mxu1 }
 0x386   : > { %3787 = vrot.lane.b32.xlu0 %v3356_v33, %s4636_s13  ;;  %v4280_v15 = vpop.f32.mrb[75].mxu1  ;;  %v4517_v33 = vld [vmem:[%s4779_s28 + $0xa0] sm:$0xff] }
 0x387   : > { %v2954_v31 = vadd.f32 %v4278_v36, %v6314_v24  ;;  %v4281_v27 = vadd.f32 %v4280_v15, %v4279_v16  ;;  %v3179_v36 = vmul.f32 0.1, %v3107_v3  ;;  %v3180_v15 = vmul.f32 0.1, %v3110_v63 }
 0x389   : > { %v3115_v4 = vadd.f32 %v6319_v47, %v2954_v31  ;;  %v2957_v14 = vadd.f32 %v4281_v27, %v6314_v24 }
 0x38a   : > { %3811 = vrot.lane.b32.xlu0 %v3360_v12, %s4636_s13 }
 0x38b   : > { %v3181_v61 = vmul.f32 0.1, %v3115_v4  ;;  %v3118_v2 = vadd.f32 %v6325_v6, %v2957_v14  ;;  %v4520_v4 = vld [vmem:[%s4779_s28 + $0x90] sm:$0xff] }
 0x38c   : > { %v4521_v14 = vld [vmem:[%s4779_s28 + $0xb0] sm:$0xff] }
 0x38d   : > { %v3213_v1 = vadd.f32 %v4517_v33, %v3181_v61  ;;  %v3182_v32 = vmul.f32 0.1, %v3118_v2  ;;  %v4522_v61 = vld [vmem:[%s4779_s28 + $0x98] sm:$0xff] }
 0x38e   : > { %3819 = vrot.lane.b32.xlu0 %v3626_v19, %s4635_s12  ;;  %v3212_v2 = vadd.f32 %v4522_v61, %v3180_v15 }
 0x38f   : > { %v3361_v17 = vcombine.low %v3209_v45, %v3213_v1  ;;  %v3362_v47 = vcombine.high %v3209_v45, %v3213_v1  ;;  %v3214_v0 = vadd.f32 %v4519_v11, %v3182_v32  ;;  %v4282_v53 = vpop.f32.mrb[76].mxu1 }
 0x390   : > { %v4283_v54 = vpop.f32.mrb[77].mxu1 }
 0x391   : > { %v3633_v12 = vcombine.low %v3210_v5, %v3214_v0  ;;  %v3634_v44 = vcombine.high %v3210_v5, %v3214_v0  ;;  %v4285_v62 = vpop.f32.mrb[78].mxu1  ;;  %v4284_v6 = vadd.f32 %v4283_v54, %v4282_v53 }
 0x392   : > { %3843 = vrot.lane.b32.xlu0 %v3630_v60, %s4635_s12  ;;  %v4286_v59 = vpop.f32.mrb[79].mxu1  ;;  %v3211_v60 = vadd.f32 %v4520_v4, %v3179_v36 }
 0x393   : > { %v4287_v51 = vadd.f32 %v4286_v59, %v4285_v62  ;;  %v2962_v19 = vadd.f32 %v4284_v6, %v6314_v24  ;;  %v6576_v11 = vrot.slane %v3634_v44, %v6355_v30 }
 0x395   : > { %v2965_v29 = vadd.f32 %v4287_v51, %v6314_v24  ;;  %v3123_v16 = vadd.f32 %v6316_v18, %v2962_v19  ;;  %v6567_v18 = vrot.slane %v3361_v17, %v6355_v30 }
 0x396   : > { %3827 = vrot.lane.b32.xlu0 %v3627_v21, %s4634_s29 }
 0x397   : > { %v3126_v31 = vadd.f32 %v6321_v28, %v2965_v29  ;;  %v3183_v27 = vmul.f32 0.1, %v3123_v16  ;;  %v6570_v28 = vrot.slane %v3362_v47, %v6355_v30 }
 0x399   : > { %v3184_v57 = vmul.f32 0.1, %v3126_v31  ;;  %v3215_v8 = vadd.f32 %v4521_v14, %v3183_v27 }
 0x39a   : > { %3851 = vrot.lane.b32.xlu0 %v3631_v46, %s4634_s29  ;;  %v6573_v46 = vrot.slane %v3633_v12, %v6355_v30 }
 0x39b   : > { %v3216_v45 = vadd.f32 %v4523_v9, %v3184_v57  ;;  %v4288_v3 = vpop.f32.mrb[80].mxu1  ;;  %v3377_v21 = vcombine.low %v3211_v60, %v3215_v8  ;;  %v3378_v63 = vcombine.high %v3211_v60, %v3215_v8 }
 0x39c   : > { %v4289_v33 = vpop.f32.mrb[81].mxu1 }
 0x39d   : > { %v3649_v1 = vcombine.low %v3212_v2, %v3216_v45  ;;  %v3650_v32 = vcombine.high %v3212_v2, %v3216_v45  ;;  %v4290_v38 = vadd.f32 %v4289_v33, %v4288_v3  ;;  %v4291_v5 = vpop.f32.mrb[82].mxu1  ;;  %v6579_v0 = vrot.slane %v3377_v21, %v6355_v30 }
 0x39e   : > { %v6582_v17 = vrot.slane %v3378_v63, %v6355_v30  ;;  %3835 = vrot.lane.b32.xlu0 %v3628_v39, %s4636_s13  ;;  %v4292_v47 = vpop.f32.mrb[83].mxu1 }
 0x39f   : > { %v6589_v53 = vrot.slane %v3649_v1, %v6355_v30  ;;  %v6592_v54 = vrot.slane %v3650_v32, %v6355_v30  ;;  %v2970_v12 = vadd.f32 %v4290_v38, %v6314_v24  ;;  %v4293_v44 = vadd.f32 %v4292_v47, %v4291_v5 }
 0x3a0   : > { %v3425_v62 = vcombine.low %v6567_v18, %v6579_v0  ;;  %v3441_v6 = vcombine.low %v6570_v28, %v6582_v17  ;;  %v3426_v10 = vcombine.high %v6567_v18, %v6579_v0  ;;  %v3442_v40 = vcombine.high %v6570_v28, %v6582_v17 }
 0x3a1   : > { %v3131_v39 = vadd.f32 %v6335_v37, %v2970_v12  ;;  %v2973_v59 = vadd.f32 %v4293_v44, %v6314_v24  ;;  %v3697_v51 = vcombine.low %v6573_v46, %v6589_v53  ;;  %v3713_v19 = vcombine.low %v6576_v11, %v6592_v54 }
 0x3a2   : > { %3859 = vrot.lane.b32.xlu0 %v3632_v35, %s4636_s13  ;;  %v3698_v36 = vcombine.high %v6573_v46, %v6589_v53  ;;  %v3714_v37 = vcombine.high %v6576_v11, %v6592_v54 }
 0x3a3   : > { %v3134_v29 = vadd.f32 %v6341_v7, %v2973_v59  ;;  %v3185_v0 = vmul.f32 0.1, %v3131_v39  ;;  %v4524_v39 = vld [vmem:[%s4779_s28 + $0xd0] sm:$0xff] }
 0x3a7   : > { %v4294_v16 = vpop.f32.mrb[84].mxu1 }
 0x3a8   : > { %v4295_v15 = vpop.f32.mrb[85].mxu1 }
 0x3a9   : > { %v4296_v31 = vadd.f32 %v4295_v15, %v4294_v16  ;;  %v4297_v27 = vpop.f32.mrb[86].mxu1 }
 0x3aa   : > { %v4298_v57 = vpop.f32.mrb[87].mxu1 }
 0x3ab   : > { %v2978_v4 = vadd.f32 %v4296_v31, %v6314_v24  ;;  %v4299_v60 = vadd.f32 %v4298_v57, %v4297_v27  ;;  %v6627_v31 = vrot.slane %v3425_v62, %v6421_v55  ;;  %v3186_v27 = vmul.f32 0.1, %v3134_v29  ;;  %v4527_v29 = vld [vmem:[%s4779_s28 + $0xe0] sm:$0xff] }
 0x3ad   : > { %v3139_v14 = vadd.f32 %v6332_v49, %v2978_v4  ;;  %v2981_v26 = vadd.f32 %v4299_v60, %v6314_v24  ;;  %v6630_v60 = vrot.slane %v3441_v6, %v6421_v55 }
 0x3af   : > { %v3142_v7 = vadd.f32 %v6337_v20, %v2981_v26  ;;  %v4300_v58 = vpop.f32.mrb[88].mxu1  ;;  %v3187_v32 = vmul.f32 0.1, %v3139_v14 }
 0x3b0   : > { %v4301_v35 = vpop.f32.mrb[89].mxu1 }
 0x3b1   : > { %v4302_v8 = vadd.f32 %v4301_v35, %v4300_v58  ;;  %v4303_v61 = vpop.f32.mrb[90].mxu1  ;;  %v3188_v44 = vmul.f32 0.1, %v3142_v7  ;;  %v3219_v14 = vadd.f32 %v4524_v39, %v3187_v32  ;;  %v6635_v58 = vrot.slane %v3426_v10, %v6421_v55  ;;  %v4526_v35 = vld [vmem:[%s4779_s28 + $0xc0] sm:$0xff] }
 0x3b2   : > { %v4304_v2 = vpop.f32.mrb[91].mxu1  ;;  %v3217_v62 = vadd.f32 %v4526_v35, %v3185_v0 }
 0x3b3   : > { %v4305_v9 = vadd.f32 %v4304_v2, %v4303_v61  ;;  %v2986_v49 = vadd.f32 %v4302_v8, %v6314_v24  ;;  %v6640_v2 = vrot.slane %v3442_v40, %v6421_v55 }
 0x3b5   : > { %v2989_v12 = vadd.f32 %v4305_v9, %v6314_v24 }
 0x3b7   : > { %v4306_v45 = vpop.f32.mrb[92].mxu1 }
 0x3b8   : > { %v4307_v3 = vpop.f32.mrb[93].mxu1 }
 0x3b9   : > { %v4308_v18 = vadd.f32 %v4307_v3, %v4306_v45  ;;  %v4309_v21 = vpop.f32.mrb[94].mxu1  ;;  %v4528_v45 = vld [vmem:[%s4779_s28 + $0xd8] sm:$0xff] }
 0x3ba   : > { %v4310_v63 = vpop.f32.mrb[95].mxu1  ;;  %v3220_v3 = vadd.f32 %v4528_v45, %v3188_v44 }
 0x3bb   : > { %v4311_v33 = vadd.f32 %v4310_v63, %v4309_v21  ;;  %v2994_v28 = vadd.f32 %v4308_v18, %v6314_v24  ;;  %v4529_v18 = vld [vmem:[%s4779_s28 + $0xf8] sm:$0xff] }
 0x3bd   : > { %v2997_v5 = vadd.f32 %v4311_v33, %v6314_v24  ;;  %v4525_v24 = vld [vmem:[%s4779_s28 + $0xf0] sm:$0xff] }
 0x3bf   : > { %v4400_v1 = vpop.f32.mrb[96].mxu1 }
 0x3c0   : > { %v3155_v38 = vadd.f32 %v4400_v1, %v2994_v28  ;;  %v3146_v20 = vpop.f32.mrb[97].mxu1  ;;  %v4530_v28 = vld [vmem:[%s4779_s28 + $0xc8] sm:$0xff] }
 0x3c1   : > { %v3147_v17 = vadd.f32 %v3146_v20, %v2986_v49  ;;  %v4401_v47 = vpop.f32.mrb[98].mxu1  ;;  %v3218_v10 = vadd.f32 %v4530_v28, %v3186_v27  ;;  %v4531_v1 = vld [vmem:[%s4779_s28 + $0xe8] sm:$0xff]  ;;  %s3992_s28 = sshll.u32 %s4775_s23, 6 }
 0x3c2   : > { %v3191_v59 = vmul.f32 0.1, %v3155_v38  ;;  %v3158_v16 = vadd.f32 %v4401_v47, %v2997_v5  ;;  %v3149_v15 = vpop.f32.mrb[99].mxu1  ;;  %s6728_s9 = scalar_lea.vmem [#allocation5], %s3992_s28 }
 0x3c3   : > { %v3189_v57 = vmul.f32 0.1, %v3147_v17  ;;  %v3150_v4 = vadd.f32 %v3149_v15, %v2989_v12 }
 0x3c4   : > { %v3223_v26 = vadd.f32 %v4525_v24, %v3191_v59  ;;  %v3192_v7 = vmul.f32 0.1, %v3158_v16  ;;  %v6656_v59 = vrot.slane %v3697_v51, %v6421_v55  ;;  %v6662_v16 = vrot.slane %v3713_v19, %v6421_v55 }
 0x3c5   : > { %v3221_v8 = vadd.f32 %v4527_v29, %v3189_v57  ;;  %v3190_v61 = vmul.f32 0.1, %v3150_v4  ;;  %v3712_v51 = vrot.slane %v3698_v36, %v6421_v55  ;;  %v3728_v24 = vrot.slane %v3714_v37, %v6421_v55 }
 0x3c6   : > { %v3409_v6 = vcombine.low %v3219_v14, %v3223_v26  ;;  %v3410_v9 = vcombine.high %v3219_v14, %v3223_v26  ;;  %v3224_v21 = vadd.f32 %v4529_v18, %v3192_v7 }
 0x3c7   : > { %v3393_v63 = vcombine.low %v3217_v62, %v3221_v8  ;;  %v3394_v33 = vcombine.high %v3217_v62, %v3221_v8  ;;  %v3222_v49 = vadd.f32 %v4531_v1, %v3190_v61 }
 0x3c8   : > { %v3417_v32 = vrot.slane %v3409_v6, %v6355_v30  ;;  %v3424_v38 = vrot.slane %v3410_v9, %v6355_v30  ;;  %v3681_v20 = vcombine.low %v3220_v3, %v3224_v21  ;;  %v3682_v5 = vcombine.high %v3220_v3, %v3224_v21 }
 0x3c9   : > { %v3401_v40 = vrot.slane %v3393_v63, %v6355_v30  ;;  %v3408_v0 = vrot.slane %v3394_v33, %v6355_v30  ;;  %v3665_v17 = vcombine.low %v3218_v10, %v3222_v49  ;;  %v3666_v47 = vcombine.high %v3218_v10, %v3222_v49 }
 0x3ca   : > { %v3689_v12 = vrot.slane %v3681_v20, %v6355_v30  ;;  %v3696_v44 = vrot.slane %v3682_v5, %v6355_v30 }
 0x3cb   : > { %v3457_v15 = vcombine.low %v3401_v40, %v3417_v32  ;;  %v3458_v27 = vcombine.high %v3401_v40, %v3417_v32  ;;  %v3473_v57 = vcombine.low %v3408_v0, %v3424_v38  ;;  %v3474_v4 = vcombine.high %v3408_v0, %v3424_v38 }
 0x3cc   : > { %v3673_v39 = vrot.slane %v3665_v17, %v6355_v30  ;;  %v3680_v14 = vrot.slane %v3666_v47, %v6355_v30 }
 0x3cd   : > { %v6675_v19 = vrot.slane %v3457_v15, %v6421_v55  ;;  %v6678_v26 = vrot.slane %v3473_v57, %v6421_v55  ;;  %v3472_v7 = vrot.slane %v3458_v27, %v6421_v55  ;;  %v3488_v30 = vrot.slane %v3474_v4, %v6421_v55 }
 0x3ce   : > { %v3729_v35 = vcombine.low %v3673_v39, %v3689_v12  ;;  %v3730_v62 = vcombine.high %v3673_v39, %v3689_v12  ;;  %v3745_v29 = vcombine.low %v3680_v14, %v3696_v44  ;;  %v3746_v46 = vcombine.high %v3680_v14, %v3696_v44 }
 0x3cf   : > { %v3490_v53 = vcombine.high %v6627_v31, %v6675_v19  ;;  %v3494_v11 = vcombine.high %v6630_v60, %v6678_v26  ;;  %v3491_v54 = vcombine.low %v6635_v58, %v3472_v7  ;;  %v3495_v36 = vcombine.low %v6640_v2, %v3488_v30 }
 0x3d0   : > { %v3492_v37 = vcombine.high %v6635_v58, %v3472_v7  ;;  %v3496_v8 = vcombine.high %v6640_v2, %v3488_v30  ;;  %v6691_v61 = vrot.slane %v3729_v35, %v6421_v55  ;;  %v6694_v6 = vrot.slane %v3745_v29, %v6421_v55 }
 0x3d1   : > { %3773 = vrot.lane.b32.xlu1 %v3490_v53, %s4635_s12  ;;  %v3744_v9 = vrot.slane %v3730_v62, %v6421_v55  ;;  %v3760_v45 = vrot.slane %v3746_v46, %v6421_v55  ;;  %v3489_v3 = vcombine.low %v6627_v31, %v6675_v19  ;;  %v3493_v58 = vcombine.low %v6630_v60, %v6678_v26 }
 0x3d2   : > { %v3762_v2 = vcombine.high %v6656_v59, %v6691_v61  ;;  %v3766_v18 = vcombine.high %v6662_v16, %v6694_v6  ;;  %v3761_v21 = vcombine.low %v6656_v59, %v6691_v61  ;;  %v3765_v63 = vcombine.low %v6662_v16, %v6694_v6 }
 0x3d3   : > { %v3763_v33 = vcombine.low %v3712_v51, %v3744_v9  ;;  %v3767_v55 = vcombine.low %v3728_v24, %v3760_v45  ;;  %v3764_v28 = vcombine.high %v3712_v51, %v3744_v9  ;;  %v3768_v31 = vcombine.high %v3728_v24, %v3760_v45 }
 0x3d5   : > { %3797 = vrot.lane.b32.xlu1 %v3494_v11, %s4635_s12 }
 0x3d9   : > { %3781 = vrot.lane.b32.xlu1 %v3491_v54, %s4634_s29 }
 0x3dd   : > { %3805 = vrot.lane.b32.xlu1 %v3495_v36, %s4634_s29 }
 0x3e1   : > { %3789 = vrot.lane.b32.xlu1 %v3492_v37, %s4636_s13 }
 0x3e5   : > { %3813 = vrot.lane.b32.xlu1 %v3496_v8, %s4636_s13 }
 0x3e8   : > { %v3772_v60 = vpop.permute.xlu0 %3771 }
 0x3e9   : > { %3821 = vrot.lane.b32.xlu1 %v3762_v2, %s4635_s12  ;;  %v3865_v32 = vsel %vm965_vm5, %v3353_v43, %v3772_v60 }
 0x3ec   : > { %v3796_v10 = vpop.permute.xlu0 %3795 }
 0x3ed   : > { %3845 = vrot.lane.b32.xlu1 %v3766_v18, %s4635_s12  ;;  %v3871_v13 = vsel %vm965_vm5, %v3357_v48, %v3796_v10 }
 0x3f0   : > { %v3780_v1 = vpop.permute.xlu0 %3779 }
 0x3f1   : > { %3829 = vrot.lane.b32.xlu1 %v3763_v33, %s4634_s29  ;;  %v3867_v38 = vsel %vm998_vm6, %v3865_v32, %v3780_v1 }
 0x3f4   : > { %v3804_v49 = vpop.permute.xlu0 %3803 }
 0x3f5   : > { %3853 = vrot.lane.b32.xlu1 %v3767_v55, %s4634_s29  ;;  %v3873_v52 = vsel %vm998_vm6, %v3871_v13, %v3804_v49  ;;  %s3911_s29 = sshll.u32 %s6728_s9, 4  ;;  %s6770_s29 = int_to_ptr.vmem [resolvable:$true] %s3911_s29 }
 0x3f6   : > { %s4562_s25 = scalar_lea.vmem %s6770_s29, 1024  ;;  %p4569_p8 = scmp.lt.s32.totalorder %s6770_s29, %s4567_s14 }
 0x3f7   : > { %p4563_p6 = scmp.ne.s32.totalorder %s6770_s29, %s4562_s25  ;;  %p4570_p10 = scmp.lt.s32.totalorder %s4568_s15, %s4562_s25 }
 0x3f8   : > { %v3788_v20 = vpop.permute.xlu0 %3787 }
 0x3f9   : > { %v3869_v5 = vsel %vm1031_vm7, %v3867_v38, %v3788_v20  ;;  %3837 = vrot.lane.b32.xlu1 %v3764_v28, %s4636_s13  ;;  %p4564_p12 = pnand %p4563_p6, %p6841_p11  ;;  %p4571_p0 = por %p4570_p10, %p4569_p8 }
 0x3fa   : > { %3889 = vst [vmem:[%s6728_s9] sm:$0xff] %v3869_v5 }
 0x3fb   : > { %p4565_p13 = pneg %p4564_p12 }
 0x3fc   : > { %v3812_v43 = vpop.permute.xlu0 %3811 }
 0x3fd   : > { %v3875_v40 = vsel %vm1031_vm7, %v3873_v52, %v3812_v43  ;;  %3861 = vrot.lane.b32.xlu1 %v3768_v31, %s4636_s13  ;;  %s4069_s13 = sshll.u32 %s4692_s22, 10  ;;  %s3898_s22 = scalar_lea.sflag [#allocation4], %s4775_s23 }
 0x3fe   : > { %3890 = vst [vmem:[%s6728_s9 + $0x8] sm:$0xff] %v3875_v40  ;;  %s6780_s17 = scalar_lea.hbm %s6832_s5, %s4069_s13  ;;  %p4572_p2 = pnand %p4571_p0, %p4565_p13 }
 0x400   : > { %v3820_v0 = vpop.permute.xlu0 %3819 }
 0x401   : > { %v3877_v25 = vsel %vm965_vm5, %v3625_v56, %v3820_v0 }
 0x404   : > { %v3844_v17 = vpop.permute.xlu0 %3843 }
 0x405   : > { %v3883_v15 = vsel %vm965_vm5, %v3629_v42, %v3844_v17 }
 0x408   : > { %v3828_v47 = vpop.permute.xlu0 %3827 }
 0x409   : > { %v3879_v22 = vsel %vm998_vm6, %v3877_v25, %v3828_v47 }
 0x40c   : > { %v3852_v12 = vpop.permute.xlu0 %3851 }
 0x40d   : > { %v3885_v27 = vsel %vm998_vm6, %v3883_v15, %v3852_v12 }
 0x410   : > { %v3836_v48 = vpop.permute.xlu0 %3835 }
 0x411   : > { %v3881_v44 = vsel %vm1031_vm7, %v3879_v22, %v3836_v48 }
 0x412   : > { %3891 = vst [vmem:[%s6728_s9 + $0x10] sm:$0xff] %v3881_v44 }
 0x414   : > { %v3860_v57 = vpop.permute.xlu0 %3859 }
 0x415   : > { %v3887_v34 = vsel %vm1031_vm7, %v3885_v27, %v3860_v57 }
 0x416   : > { %3892 = vst [vmem:[%s6728_s9 + $0x18] sm:$0xff] %v3887_v34 }
 0x443   : > { %v3774_v41 = vpop.permute.xlu1 %3773 }
 0x444   : > { %v3866_v14 = vsel %vm965_vm5, %v3489_v3, %v3774_v41 }
 0x447   : > { %v3798_v56 = vpop.permute.xlu1 %3797 }
 0x448   : > { %v3872_v50 = vsel %vm965_vm5, %v3493_v58, %v3798_v56 }
 0x44b   : > { %v3782_v4 = vpop.permute.xlu1 %3781 }
 0x44c   : > { %v3868_v51 = vsel %vm998_vm6, %v3866_v14, %v3782_v4 }
 0x44f   : > { %v3806_v39 = vpop.permute.xlu1 %3805 }
 0x450   : > { %v3874_v42 = vsel %vm998_vm6, %v3872_v50, %v3806_v39 }
 0x453   : > { %v3790_v24 = vpop.permute.xlu1 %3789 }
 0x454   : > { %v3870_v23 = vsel %vm1031_vm7, %v3868_v51, %v3790_v24 }
 0x455   : > { %3893 = vst [vmem:[%s6728_s9 + $0x20] sm:$0xff] %v3870_v23 }
 0x457   : > { %v3814_v19 = vpop.permute.xlu1 %3813 }
 0x458   : > { %v3876_v26 = vsel %vm1031_vm7, %v3874_v42, %v3814_v19 }
 0x459   : > { %3894 = vst [vmem:[%s6728_s9 + $0x28] sm:$0xff] %v3876_v26 }
 0x45b   : > { %v3822_v7 = vpop.permute.xlu1 %3821 }
 0x45c   : > { %v3878_v29 = vsel %vm965_vm5, %v3761_v21, %v3822_v7 }
 0x45f   : > { %v3846_v30 = vpop.permute.xlu1 %3845 }
 0x460   : > { %v3884_v59 = vsel %vm965_vm5, %v3765_v63, %v3846_v30 }
 0x463   : > { %v3830_v35 = vpop.permute.xlu1 %3829 }
 0x464   : > { %v3880_v46 = vsel %vm998_vm6, %v3878_v29, %v3830_v35 }
 0x467   : > { %v3854_v62 = vpop.permute.xlu1 %3853 }
 0x468   : > { %v3886_v54 = vsel %vm998_vm6, %v3884_v59, %v3854_v62 }
 0x46b   : > { %v3838_v53 = vpop.permute.xlu1 %3837 }
 0x46c   : > { %v3882_v11 = vsel %vm1031_vm7, %v3880_v46, %v3838_v53 }
 0x46d   : > { %3895 = vst [vmem:[%s6728_s9 + $0x30] sm:$0xff] %v3882_v11 }
 0x46f   : > { %v3862_v36 = vpop.permute.xlu1 %3861 }
 0x470   : > { %v3888_v37 = vsel %vm1031_vm7, %v3886_v54, %v3862_v36 }
 0x471   : > { %3896 = vst [vmem:[%s6728_s9 + $0x38] sm:$0xff] %v3888_v37 }
 0x472   : > { %4575 = shalt.err (!%p4572_p2)
}
 0x473   : > { %s4576_s16 = scalar_lea.hbm %s6780_s17, 1024  ;;  %s4580_s28 = scalar_lea.hbm %s6832_s5, 2048 }
 0x474   : > { %p4577_p4 = scmp.ne.s32.totalorder %s6780_s17, %s4576_s16  ;;  %p4581_p9 = scmp.lt.u32.totalorder %s6780_s17, %s6832_s5 }
 0x475   : > { %p4582_p1 = scmp.lt.u32.totalorder %s4580_s28, %s4576_s16  ;;  %p4584_p6 = scmp.lt.u32.totalorder %s4576_s16, %s6780_s17 }
 0x476   : > { %p4578_p5 = pnand %p4577_p4, %p6841_p11 }
 0x477   : > { %p4583_p3 = por %p4582_p1, %p4581_p9 }
 0x478   : > { %p4579_p7 = pneg %p4578_p5 }
 0x479   : > { %p4585_p12 = por %p4584_p6, %p4583_p3 }
 0x47b   : > { %p4586_p13 = pnand %p4585_p12, %p4579_p7 }
 0x47d   : > { %4589 = shalt.err (!%p4586_p13)
}
 0x47e   : > { %s4640_s10 = smov 512  }
 0x47f   : > { %4408 = dma.vmem_to_hbm [thread:$0]  (%p6841_p11), %s6770_s29, 1024, %s6780_s17, %s3898_s22, %s4640_s10, %s4640_s10, %s4635_s12  }
 0x480 PF: > { %s3926_s11 = sand.u32 1, %s4616_s18   ;;  %p6842_p8 = scmp.ne.s32.totalorder %s6837_s6, 0 }
 0x481   : > { %p6843_p10 = scmp.ge.s32.totalorder %s4628_s21, 2  ;;  %s3927_s25 = scalar_lea.sflag [#allocation4], %s3926_s11 }
 0x483   : > { %p4415_p0 = pnand %p6843_p10, %p6842_p8 }
 0x485   : > { %4611 = dma.done.wait (!%p4415_p0), %s3927_s25, 1024  }
 0x486   : > { %4613 = vsyncadd (!%p4415_p0), %s3927_s25, 4294966272  ;;  %p18_p2 = scmp.ge.s32.totalorder %s4696_s24, 4   ;;  %s6844_s18 = smov %s4620_s19 }
 0x487   : > { %s6845_s19 = smov %s4624_s20  ;;  %s6846_s20 = smov %s4708_s27 }
 0x488   : > { %s6847_s21 = smov %s4696_s24  ;;  %20 = sbr.rel (!%p18_p2) target bundleno = 5 (0x5), region = 85 }
 0x48f   :  { %3932 = vsyncpa [#allocation3], 1 }
 0x490   :  { %3934 = vsyncpa [#allocation3 + $0x1], 1 }
 0x491   :  { %3935 = vsyncpa [#allocation4], 1 }
 0x492   :  { %3937 = vsyncpa [#allocation4 + $0x1], 1 }

</bundles_post_ra>
